<compile_context>
chip_gen: v7x
topology: tpu7x:2x2x1
jax: 0.10.0
libtpu: 0.0.40
codegen_flags: <defaults>
</compile_context>

<pallas_src>
import numpy as np
import jax
import jax.numpy as jnp
from jax import lax
from jax.experimental import pallas as pl
from jax.experimental.pallas import tpu as pltpu


_VMEM = pl.BlockSpec(memory_space=pltpu.MemorySpace.VMEM)
_BATCH_PAD = 8                    # pad batch to a sublane multiple inside the fused head
_TARGET_MBLK = 640                # ~5 x 128 lanes per conv grid step
_VMEM_LIMIT = 48 * 1024 * 1024    # headroom, still < v7x's 64 MiB physical VMEM


def _round_up(x, m):
    return -(-x // m) * m


def _choose_blocks(m, target=_TARGET_MBLK):
    """Pick (mblk, nblk): mblk a multiple of 128, nblk * mblk >= m, mblk ~= target."""
    mpad = _round_up(m, 128)
    nblk = max(1, -(-mpad // target))
    mblk = _round_up(-(-mpad // nblk), 128)
    return mblk, nblk


# ----------------------------- Pallas kernels --------------------------------


def _conv_relu_pool_kernel(x_ref, w_ref, b_ref, o_ref):
    """One grid step over M.

    x: (K, 4*Mblk) bf16 -- the 4 max-pool parities of this M-block concatenated on lanes
    w: (Cout, K)   bf16,  b: (Cout, 1) f32
    o: (Cout, Mblk) bf16 = relu(max_s(w @ x_s) + b) == maxpool2x2(relu(conv2d + b))
    (bias is per-channel, relu monotone, so max-before-bias is exact).
    Single MXU dot, pooling max on the VPU, lane-dense unmasked store.
    """
    mblk = o_ref.shape[1]
    y = jnp.dot(w_ref[...], x_ref[...], preferred_element_type=jnp.float32)
    acc = jnp.maximum(jnp.maximum(y[:, :mblk], y[:, mblk:2 * mblk]),
                      jnp.maximum(y[:, 2 * mblk:3 * mblk], y[:, 3 * mblk:]))
    o_ref[...] = jnp.maximum(acc + b_ref[...], 0.0).astype(o_ref.dtype)


def _head_kernel(p_ref, w4_ref, b4_ref, w1_ref, b1_ref, w2_ref, b2_ref, o_ref):
    """Fused conv4 (no pool) + flatten + fc1 + fc2, everything resident in VMEM.

    p : (9*NP, K4) bf16  conv4 im2col patches, rows ordered (spatial hw, padded batch n)
    w4: (K4, 64)   bf16  conv4 weight transposed;         b4: (1, 64)  f32
    w1: (9, 64, F1) bf16 fc1 weight re-blocked per conv4 spatial position (flatten fused)
    b1: (1, F1)    f32
    w2: (F1, A)    bf16  fc2 weight transposed;           b2: (1, A)   f32
    o : (NP, A)    f32
    """
    npad = o_ref.shape[0]                                   # padded batch (multiple of 8)
    y4 = jnp.maximum(
        jnp.dot(p_ref[...], w4_ref[...], preferred_element_type=jnp.float32)
        + b4_ref[...], 0.0).astype(jnp.bfloat16)            # (9*NP, 64) value, ~4.6 vregs
    # fc1: flatten(c, hw) is folded into the per-hw weight blocks -> 9 aligned matmuls.
    h1 = jnp.dot(y4[0:npad, :], w1_ref[0], preferred_element_type=jnp.float32)
    for hw in range(1, w1_ref.shape[0]):
        h1 = h1 + jnp.dot(y4[hw * npad:(hw + 1) * npad, :], w1_ref[hw],
                          preferred_element_type=jnp.float32)
    h1 = jnp.maximum(h1 + b1_ref[...], 0.0).astype(jnp.bfloat16)   # (NP, F1), lane-dense
    o_ref[...] = jnp.maximum(
        jnp.dot(h1, w2_ref[...], preferred_element_type=jnp.float32) + b2_ref[...], 0.0)


def _conv_relu_pool_call(xs, wmat, bcol, mblk, nblk):
    _, kdim, four_mblk = xs.shape
    cout = wmat.shape[0]
    return pl.pallas_call(
        _conv_relu_pool_kernel,
        out_shape=jax.ShapeDtypeStruct((cout, nblk * mblk), jnp.bfloat16),
        grid_spec=pltpu.PrefetchScalarGridSpec(
            num_scalar_prefetch=0,
            grid=(nblk,),
            in_specs=[
                pl.BlockSpec((None, kdim, four_mblk), lambda i: (i, 0, 0)),
                pl.BlockSpec((cout, kdim), lambda i: (0, 0)),
                pl.BlockSpec((cout, 1), lambda i: (0, 0)),
            ],
            out_specs=pl.BlockSpec((cout, mblk), lambda i: (0, i)),
        ),
        compiler_params=pltpu.CompilerParams(
            dimension_semantics=("parallel",),
            vmem_limit_bytes=_VMEM_LIMIT),
    )(xs, wmat, bcol)


def _head_call(p, w4t, b4, w1blk, b1, w2t, b2):
    npad = p.shape[0] // w1blk.shape[0]
    return pl.pallas_call(
        _head_kernel,
        out_shape=jax.ShapeDtypeStruct((npad, w2t.shape[1]), jnp.float32),
        in_specs=[_VMEM] * 7,
        out_specs=_VMEM,
        compiler_params=pltpu.CompilerParams(vmem_limit_bytes=_VMEM_LIMIT),
    )(p, w4t, b4, w1blk, b1, w2t, b2)


# ------------------------------- JAX glue ------------------------------------


def _im2col_cnhw(x, k):
    """x: (C, N, H, W) -> patches (C*k*k, N, Ho, Wo); leading index order (c, kh, kw)
    matches weight.reshape(Cout, Cin*k*k)."""
    c, n, h, w = x.shape
    ho, wo = h - k + 1, w - k + 1
    cols = [x[:, :, kh:kh + ho, kw:kw + wo] for kh in range(k) for kw in range(k)]
    p = jnp.stack(cols, axis=1)                      # (C, k*k, N, Ho, Wo)
    return p.reshape(c * k * k, n, ho, wo)


def conv_relu_pool_block(x, wmat, bcol, k=5):
    """maxpool2x2(relu(conv2d_valid(x))) with activations kept in (C, N, H, W) layout."""
    cin, n, h, w = x.shape
    ho, wo = h - k + 1, w - k + 1
    hp, wp = ho // 2, wo // 2
    m = n * hp * wp
    p = _im2col_cnhw(x, k)                           # (K, N, Ho, Wo)
    kdim = p.shape[0]
    # 4 pooling parities on a leading axis; flattened M order = (n, hp, wp).
    par = (p.reshape(kdim, n, hp, 2, wp, 2)
             .transpose(3, 5, 0, 1, 2, 4)
             .reshape(4, kdim, m))
    mblk, nblk = _choose_blocks(m)
    par = jnp.pad(par, ((0, 0), (0, 0), (0, nblk * mblk - m)))
    # Interleave parities per M-block so each grid step does ONE (Cout,K)@(K,4*Mblk) dot.
    xs = (par.reshape(4, kdim, nblk, mblk)
             .transpose(2, 1, 0, 3)
             .reshape(nblk, kdim, 4 * mblk)
             .astype(jnp.bfloat16))
    out = _conv_relu_pool_call(xs, wmat, bcol, mblk, nblk)   # (Cout, nblk*mblk) bf16
    return out[:, :m].reshape(-1, n, hp, wp)                 # (Cout, N, Hp, Wp) bf16


def head_block(x, kp, k=5):
    """relu(fc2(relu(fc1(flatten(relu(conv4(x))))))), x = (32, N, 7, 7) -> (N, 4)."""
    cin, n, h, w = x.shape
    ho, wo = h - k + 1, w - k + 1                    # 3, 3
    p = _im2col_cnhw(x, k)                           # (800, N, 3, 3)
    p = p.reshape(cin * k * k, n, ho * wo)           # (800, N, 9)
    p = p.transpose(2, 1, 0)                         # (9, N, 800)
    p = jnp.pad(p, ((0, 0), (0, _BATCH_PAD - n), (0, 0)))
    p = p.reshape(ho * wo * _BATCH_PAD, cin * k * k).astype(jnp.bfloat16)   # (72, 800)
    out = _head_call(p, kp["w4t"], kp["b4"], kp["w1blk"], kp["b1"], kp["w2t"], kp["b2"])
    return out[:n, :]                                # (N, 4), f32


def prepare_params(params):
    """One-time reshape/cast of torch-layout parameters into kernel-ready layouts."""
    kp = {}
    for name in ("conv1", "conv2", "conv3"):
        w = params[f"{name}_w"]
        kp[f"{name}_w"] = w.reshape(w.shape[0], -1).astype(jnp.bfloat16)   # (Cout, Cin*25)
        kp[f"{name}_b"] = params[f"{name}_b"].reshape(-1, 1)               # (Cout, 1) f32
    c4 = params["conv4_w"]                                                 # (64, 32, 5, 5)
    c4out = c4.shape[0]
    kp["w4t"] = c4.reshape(c4out, -1).T.astype(jnp.bfloat16)               # (800, 64)
    kp["b4"] = params["conv4_b"].reshape(1, -1)                            # (1, 64) f32
    w1 = params["fc1_w"]                                                   # (1024, 576)
    f1 = w1.shape[0]
    hw4 = w1.shape[1] // c4out                                             # 9
    kp["w1blk"] = (w1.reshape(f1, c4out, hw4).transpose(2, 1, 0)
                     .astype(jnp.bfloat16))                                # (9, 64, 1024)
    kp["b1"] = params["fc1_b"].reshape(1, -1)                              # (1, 1024) f32
    kp["w2t"] = params["fc2_w"].T.astype(jnp.bfloat16)                     # (1024, 4)
    kp["b2"] = params["fc2_b"].reshape(1, -1)                              # (1, 4) f32
    return kp


def qnetwork_forward(kp, state):
    x = state.transpose(1, 0, 2, 3)                             # (1, N, 84, 84)
    x = conv_relu_pool_block(x, kp["conv1_w"], kp["conv1_b"])   # (8,  N, 40, 40)
    x = conv_relu_pool_block(x, kp["conv2_w"], kp["conv2_b"])   # (16, N, 18, 18)
    x = conv_relu_pool_block(x, kp["conv3_w"], kp["conv3_b"])   # (32, N, 7, 7)
    return head_block(x, kp)                                    # (N, 4)


# ------------------------- deterministic parameters --------------------------


def init_params(key):
    def uniform(k_, shape, fan_in):
        bound = 1.0 / np.sqrt(fan_in)
        return jax.random.uniform(k_, shape, jnp.float32, -bound, bound)

    specs = [
        ("conv1", (8, 1, 5, 5)),
        ("conv2", (16, 8, 5, 5)),
        ("conv3", (32, 16, 5, 5)),
        ("conv4", (64, 32, 5, 5)),
        ("fc1", (256 * 4, 64 * 3 * 3)),
        ("fc2", (4, 256 * 4)),
    ]
    keys = jax.random.split(key, 2 * len(specs))
    params = {}
    for i, (name, wshape) in enumerate(specs):
        fan_in = int(np.prod(wshape[1:]))
        params[f"{name}_w"] = uniform(keys[2 * i], wshape, fan_in)
        params[f"{name}_b"] = uniform(keys[2 * i + 1], (wshape[0],), fan_in)
    return params


# --------------------------- pure-JAX reference -------------------------------


def reference_forward(params, state):
    def conv(x, w, b):
        y = lax.conv_general_dilated(
            x, w, window_strides=(1, 1), padding="VALID",
            dimension_numbers=("NCHW", "OIHW", "NCHW"),
            precision=lax.Precision.HIGHEST)
        return y + b.reshape(1, -1, 1, 1)

    def pool(x):
        return lax.reduce_window(x, -jnp.inf, lax.max,
                                 (1, 1, 2, 2), (1, 1, 2, 2), "VALID")

    x = pool(jax.nn.relu(conv(state, params["conv1_w"], params["conv1_b"])))
    x = pool(jax.nn.relu(conv(x, params["conv2_w"], params["conv2_b"])))
    x = pool(jax.nn.relu(conv(x, params["conv3_w"], params["conv3_b"])))
    x = jax.nn.relu(conv(x, params["conv4_w"], params["conv4_b"]))
    x = x.reshape(x.shape[0], -1)
    x = jax.nn.relu(jnp.dot(x, params["fc1_w"].T, precision=lax.Precision.HIGHEST)
                    + params["fc1_b"])
    x = jax.nn.relu(jnp.dot(x, params["fc2_w"].T, precision=lax.Precision.HIGHEST)
                    + params["fc2_b"])
    return x


# ----------------------------------- main -------------------------------------

if __name__ == "__main__":
    key = jax.random.PRNGKey(0)
    pkey, xkey = jax.random.split(key)
    params = init_params(pkey)
    kparams = prepare_params(params)   # one-time weight re-layout/cast, outside jit

    # Input spatial size 84x84 is forced by the architecture (84->80->40->36->18->14->7->3).
    state = jax.random.uniform(xkey, (2, 1, 84, 84), jnp.float32)

    fwd = jax.jit(qnetwork_forward)
    out = jax.block_until_ready(fwd(kparams, state))
    assert out.shape == (2, 4) and out.dtype == jnp.float32

    ref = reference_forward(params, state)
    np.testing.assert_allclose(np.asarray(out), np.asarray(ref), rtol=2e-2, atol=2e-2)

    print("KERNEL_OK")
</pallas_src>

<mosaic_0001>
module attributes {stable_mosaic.version = 11 : i64} {
  func.func @_conv_relu_pool_kernel(%arg0: i32, %arg1: memref<1x25x2560xbf16, #tpu.memory_space<vmem>>, %arg2: memref<8x25xbf16, #tpu.memory_space<vmem>>, %arg3: memref<8x1xf32, #tpu.memory_space<vmem>>, %arg4: memref<8x640xbf16, #tpu.memory_space<vmem>>) attributes {dimension_semantics = [#tpu.dimension_semantics<parallel>], iteration_bounds = array<i64: 5>, scalar_prefetch = 0 : i64, scratch_operands = 0 : i64, tpu.core_type = #tpu.core_type<tc>, window_params = [{transform_indices = @transform_0, window_bounds = array<i64: 1, 25, 2560>}, {pipeline_mode = #tpu.pipeline_mode<synchronous>, transform_indices = @transform_1, window_bounds = array<i64: 8, 25>}, {pipeline_mode = #tpu.pipeline_mode<synchronous>, transform_indices = @transform_2, window_bounds = array<i64: 8, 1>}, {transform_indices = @transform_3, window_bounds = array<i64: 8, 640>}]} {
    %c0 = arith.constant 0 : index
    %c0_0 = arith.constant 0 : index
    %0 = vector.load %arg2[%c0, %c0_0] : memref<8x25xbf16, #tpu.memory_space<vmem>>, vector<8x25xbf16>
    %c0_1 = arith.constant 0 : index
    %c0_2 = arith.constant 0 : index
    %c0_3 = arith.constant 0 : index
    %1 = vector.load %arg1[%c0_1, %c0_2, %c0_3] : memref<1x25x2560xbf16, #tpu.memory_space<vmem>>, vector<1x25x2560xbf16>
    %2 = vector.shape_cast %1 : vector<1x25x2560xbf16> to vector<25x2560xbf16>
    %cst = arith.constant dense<0.000000e+00> : vector<8x2560xf32>
    %3 = tpu.matmul %0, %2, %cst {dimension_numbers = #tpu.dot_dimension_numbers<[1], [0], [0], [1], [0, 0, 1, 1], [], []>} : vector<8x25xbf16>, vector<25x2560xbf16>, vector<8x2560xf32> -> vector<8x2560xf32>
    %4 = vector.extract_strided_slice %3 {offsets = [0, 0], sizes = [8, 640], strides = [1, 1]} : vector<8x2560xf32> to vector<8x640xf32>
    %5 = vector.extract_strided_slice %3 {offsets = [0, 640], sizes = [8, 640], strides = [1, 1]} : vector<8x2560xf32> to vector<8x640xf32>
    %6 = arith.maximumf %4, %5 : vector<8x640xf32>
    %7 = vector.extract_strided_slice %3 {offsets = [0, 1280], sizes = [8, 640], strides = [1, 1]} : vector<8x2560xf32> to vector<8x640xf32>
    %8 = vector.extract_strided_slice %3 {offsets = [0, 1920], sizes = [8, 640], strides = [1, 1]} : vector<8x2560xf32> to vector<8x640xf32>
    %9 = arith.maximumf %7, %8 : vector<8x640xf32>
    %10 = arith.maximumf %6, %9 : vector<8x640xf32>
    %c0_4 = arith.constant 0 : index
    %c0_5 = arith.constant 0 : index
    %11 = vector.load %arg3[%c0_4, %c0_5] : memref<8x1xf32, #tpu.memory_space<vmem>>, vector<8x1xf32>
    %12 = vector.broadcast %11 : vector<8x1xf32> to vector<8x640xf32>
    %13 = arith.addf %10, %12 : vector<8x640xf32>
    %cst_6 = arith.constant 0.000000e+00 : f32
    %14 = vector.broadcast %cst_6 : f32 to vector<8x640xf32>
    %15 = arith.maximumf %13, %14 : vector<8x640xf32>
    %16 = arith.truncf %15 : vector<8x640xf32> to vector<8x640xbf16>
    %c0_7 = arith.constant 0 : index
    %c0_8 = arith.constant 0 : index
    %17 = vector.load %arg4[%c0_7, %c0_8] : memref<8x640xbf16, #tpu.memory_space<vmem>>, vector<8x640xbf16>
    tpu.vector_store %arg4[%c0_7, %c0_8], %16 {strides = array<i32>} : memref<8x640xbf16, #tpu.memory_space<vmem>>, vector<8x640xbf16>,
    return
  }
  func.func @transform_0(%arg0: i32) -> (i32, i32, i32) {
    %c0_i32 = arith.constant 0 : i32
    %c0_i32_0 = arith.constant 0 : i32
    %c0_i32_1 = arith.constant 0 : i32
    return %arg0, %c0_i32, %c0_i32_0 : i32, i32, i32
  }
  func.func @transform_1(%arg0: i32) -> (i32, i32) {
    %c0_i32 = arith.constant 0 : i32
    %c0_i32_0 = arith.constant 0 : i32
    %c0_i32_1 = arith.constant 0 : i32
    return %c0_i32, %c0_i32_0 : i32, i32
  }
  func.func @transform_2(%arg0: i32) -> (i32, i32) {
    %c0_i32 = arith.constant 0 : i32
    %c0_i32_0 = arith.constant 0 : i32
    %c0_i32_1 = arith.constant 0 : i32
    return %c0_i32, %c0_i32_0 : i32, i32
  }
  func.func @transform_3(%arg0: i32) -> (i32, i32) {
    %c0_i32 = arith.constant 0 : i32
    %c0_i32_0 = arith.constant 0 : i32
    return %c0_i32, %arg0 : i32, i32
  }
}

module attributes {stable_mosaic.version = 11 : i64} {
  func.func @_conv_relu_pool_kernel(%arg0: i32, %arg1: memref<1x200x1536xbf16, #tpu.memory_space<vmem>>, %arg2: memref<16x200xbf16, #tpu.memory_space<vmem>>, %arg3: memref<16x1xf32, #tpu.memory_space<vmem>>, %arg4: memref<16x384xbf16, #tpu.memory_space<vmem>>) attributes {dimension_semantics = [#tpu.dimension_semantics<parallel>], iteration_bounds = array<i64: 2>, scalar_prefetch = 0 : i64, scratch_operands = 0 : i64, tpu.core_type = #tpu.core_type<tc>, window_params = [{transform_indices = @transform_0, window_bounds = array<i64: 1, 200, 1536>}, {pipeline_mode = #tpu.pipeline_mode<synchronous>, transform_indices = @transform_1, window_bounds = array<i64: 16, 200>}, {pipeline_mode = #tpu.pipeline_mode<synchronous>, transform_indices = @transform_2, window_bounds = array<i64: 16, 1>}, {transform_indices = @transform_3, window_bounds = array<i64: 16, 384>}]} {
    %c0 = arith.constant 0 : index
    %c0_0 = arith.constant 0 : index
    %0 = vector.load %arg2[%c0, %c0_0] : memref<16x200xbf16, #tpu.memory_space<vmem>>, vector<16x200xbf16>
    %c0_1 = arith.constant 0 : index
    %c0_2 = arith.constant 0 : index
    %c0_3 = arith.constant 0 : index
    %1 = vector.load %arg1[%c0_1, %c0_2, %c0_3] : memref<1x200x1536xbf16, #tpu.memory_space<vmem>>, vector<1x200x1536xbf16>
    %2 = vector.shape_cast %1 : vector<1x200x1536xbf16> to vector<200x1536xbf16>
    %cst = arith.constant dense<0.000000e+00> : vector<16x1536xf32>
    %3 = tpu.matmul %0, %2, %cst {dimension_numbers = #tpu.dot_dimension_numbers<[1], [0], [0], [1], [0, 0, 1, 1], [], []>} : vector<16x200xbf16>, vector<200x1536xbf16>, vector<16x1536xf32> -> vector<16x1536xf32>
    %4 = vector.extract_strided_slice %3 {offsets = [0, 0], sizes = [16, 384], strides = [1, 1]} : vector<16x1536xf32> to vector<16x384xf32>
    %5 = vector.extract_strided_slice %3 {offsets = [0, 384], sizes = [16, 384], strides = [1, 1]} : vector<16x1536xf32> to vector<16x384xf32>
    %6 = arith.maximumf %4, %5 : vector<16x384xf32>
    %7 = vector.extract_strided_slice %3 {offsets = [0, 768], sizes = [16, 384], strides = [1, 1]} : vector<16x1536xf32> to vector<16x384xf32>
    %8 = vector.extract_strided_slice %3 {offsets = [0, 1152], sizes = [16, 384], strides = [1, 1]} : vector<16x1536xf32> to vector<16x384xf32>
    %9 = arith.maximumf %7, %8 : vector<16x384xf32>
    %10 = arith.maximumf %6, %9 : vector<16x384xf32>
    %c0_4 = arith.constant 0 : index
    %c0_5 = arith.constant 0 : index
    %11 = vector.load %arg3[%c0_4, %c0_5] : memref<16x1xf32, #tpu.memory_space<vmem>>, vector<16x1xf32>
    %12 = vector.broadcast %11 : vector<16x1xf32> to vector<16x384xf32>
    %13 = arith.addf %10, %12 : vector<16x384xf32>
    %cst_6 = arith.constant 0.000000e+00 : f32
    %14 = vector.broadcast %cst_6 : f32 to vector<16x384xf32>
    %15 = arith.maximumf %13, %14 : vector<16x384xf32>
    %16 = arith.truncf %15 : vector<16x384xf32> to vector<16x384xbf16>
    %c0_7 = arith.constant 0 : index
    %c0_8 = arith.constant 0 : index
    %17 = vector.load %arg4[%c0_7, %c0_8] : memref<16x384xbf16, #tpu.memory_space<vmem>>, vector<16x384xbf16>
    tpu.vector_store %arg4[%c0_7, %c0_8], %16 {strides = array<i32>} : memref<16x384xbf16, #tpu.memory_space<vmem>>, vector<16x384xbf16>,
    return
  }
  func.func @transform_0(%arg0: i32) -> (i32, i32, i32) {
    %c0_i32 = arith.constant 0 : i32
    %c0_i32_0 = arith.constant 0 : i32
    %c0_i32_1 = arith.constant 0 : i32
    return %arg0, %c0_i32, %c0_i32_0 : i32, i32, i32
  }
  func.func @transform_1(%arg0: i32) -> (i32, i32) {
    %c0_i32 = arith.constant 0 : i32
    %c0_i32_0 = arith.constant 0 : i32
    %c0_i32_1 = arith.constant 0 : i32
    return %c0_i32, %c0_i32_0 : i32, i32
  }
  func.func @transform_2(%arg0: i32) -> (i32, i32) {
    %c0_i32 = arith.constant 0 : i32
    %c0_i32_0 = arith.constant 0 : i32
    %c0_i32_1 = arith.constant 0 : i32
    return %c0_i32, %c0_i32_0 : i32, i32
  }
  func.func @transform_3(%arg0: i32) -> (i32, i32) {
    %c0_i32 = arith.constant 0 : i32
    %c0_i32_0 = arith.constant 0 : i32
    return %c0_i32, %arg0 : i32, i32
  }
}

module attributes {stable_mosaic.version = 11 : i64} {
  func.func @_conv_relu_pool_kernel(%arg0: i32, %arg1: memref<1x400x512xbf16, #tpu.memory_space<vmem>>, %arg2: memref<32x400xbf16, #tpu.memory_space<vmem>>, %arg3: memref<32x1xf32, #tpu.memory_space<vmem>>, %arg4: memref<32x128xbf16, #tpu.memory_space<vmem>>) attributes {dimension_semantics = [#tpu.dimension_semantics<parallel>], iteration_bounds = array<i64: 1>, scalar_prefetch = 0 : i64, scratch_operands = 0 : i64, tpu.core_type = #tpu.core_type<tc>, window_params = [{transform_indices = @transform_0, window_bounds = array<i64: 1, 400, 512>}, {pipeline_mode = #tpu.pipeline_mode<synchronous>, transform_indices = @transform_1, window_bounds = array<i64: 32, 400>}, {pipeline_mode = #tpu.pipeline_mode<synchronous>, transform_indices = @transform_2, window_bounds = array<i64: 32, 1>}, {transform_indices = @transform_3, window_bounds = array<i64: 32, 128>}]} {
    %c0 = arith.constant 0 : index
    %c0_0 = arith.constant 0 : index
    %0 = vector.load %arg2[%c0, %c0_0] : memref<32x400xbf16, #tpu.memory_space<vmem>>, vector<32x400xbf16>
    %c0_1 = arith.constant 0 : index
    %c0_2 = arith.constant 0 : index
    %c0_3 = arith.constant 0 : index
    %1 = vector.load %arg1[%c0_1, %c0_2, %c0_3] : memref<1x400x512xbf16, #tpu.memory_space<vmem>>, vector<1x400x512xbf16>
    %2 = vector.shape_cast %1 : vector<1x400x512xbf16> to vector<400x512xbf16>
    %cst = arith.constant dense<0.000000e+00> : vector<32x512xf32>
    %3 = tpu.matmul %0, %2, %cst {dimension_numbers = #tpu.dot_dimension_numbers<[1], [0], [0], [1], [0, 0, 1, 1], [], []>} : vector<32x400xbf16>, vector<400x512xbf16>, vector<32x512xf32> -> vector<32x512xf32>
    %4 = vector.extract_strided_slice %3 {offsets = [0, 0], sizes = [32, 128], strides = [1, 1]} : vector<32x512xf32> to vector<32x128xf32>
    %5 = vector.extract_strided_slice %3 {offsets = [0, 128], sizes = [32, 128], strides = [1, 1]} : vector<32x512xf32> to vector<32x128xf32>
    %6 = arith.maximumf %4, %5 : vector<32x128xf32>
    %7 = vector.extract_strided_slice %3 {offsets = [0, 256], sizes = [32, 128], strides = [1, 1]} : vector<32x512xf32> to vector<32x128xf32>
    %8 = vector.extract_strided_slice %3 {offsets = [0, 384], sizes = [32, 128], strides = [1, 1]} : vector<32x512xf32> to vector<32x128xf32>
    %9 = arith.maximumf %7, %8 : vector<32x128xf32>
    %10 = arith.maximumf %6, %9 : vector<32x128xf32>
    %c0_4 = arith.constant 0 : index
    %c0_5 = arith.constant 0 : index
    %11 = vector.load %arg3[%c0_4, %c0_5] : memref<32x1xf32, #tpu.memory_space<vmem>>, vector<32x1xf32>
    %12 = vector.broadcast %11 : vector<32x1xf32> to vector<32x128xf32>
    %13 = arith.addf %10, %12 : vector<32x128xf32>
    %cst_6 = arith.constant 0.000000e+00 : f32
    %14 = vector.broadcast %cst_6 : f32 to vector<32x128xf32>
    %15 = arith.maximumf %13, %14 : vector<32x128xf32>
    %16 = arith.truncf %15 : vector<32x128xf32> to vector<32x128xbf16>
    %c0_7 = arith.constant 0 : index
    %c0_8 = arith.constant 0 : index
    %17 = vector.load %arg4[%c0_7, %c0_8] : memref<32x128xbf16, #tpu.memory_space<vmem>>, vector<32x128xbf16>
    tpu.vector_store %arg4[%c0_7, %c0_8], %16 {strides = array<i32>} : memref<32x128xbf16, #tpu.memory_space<vmem>>, vector<32x128xbf16>,
    return
  }
  func.func @transform_0(%arg0: i32) -> (i32, i32, i32) {
    %c0_i32 = arith.constant 0 : i32
    %c0_i32_0 = arith.constant 0 : i32
    %c0_i32_1 = arith.constant 0 : i32
    return %arg0, %c0_i32, %c0_i32_0 : i32, i32, i32
  }
  func.func @transform_1(%arg0: i32) -> (i32, i32) {
    %c0_i32 = arith.constant 0 : i32
    %c0_i32_0 = arith.constant 0 : i32
    %c0_i32_1 = arith.constant 0 : i32
    return %c0_i32, %c0_i32_0 : i32, i32
  }
  func.func @transform_2(%arg0: i32) -> (i32, i32) {
    %c0_i32 = arith.constant 0 : i32
    %c0_i32_0 = arith.constant 0 : i32
    %c0_i32_1 = arith.constant 0 : i32
    return %c0_i32, %c0_i32_0 : i32, i32
  }
  func.func @transform_3(%arg0: i32) -> (i32, i32) {
    %c0_i32 = arith.constant 0 : i32
    %c0_i32_0 = arith.constant 0 : i32
    return %c0_i32, %arg0 : i32, i32
  }
}

module attributes {stable_mosaic.version = 11 : i64} {
  func.func @_head_kernel(%arg0: memref<72x800xbf16, #tpu.memory_space<vmem>>, %arg1: memref<800x64xbf16, #tpu.memory_space<vmem>>, %arg2: memref<1x64xf32, #tpu.memory_space<vmem>>, %arg3: memref<9x64x1024xbf16, #tpu.memory_space<vmem>>, %arg4: memref<1x1024xf32, #tpu.memory_space<vmem>>, %arg5: memref<1024x4xbf16, #tpu.memory_space<vmem>>, %arg6: memref<1x4xf32, #tpu.memory_space<vmem>>, %arg7: memref<8x4xf32, #tpu.memory_space<vmem>>) attributes {dimension_semantics = [], scalar_prefetch = 0 : i64, scratch_operands = 0 : i64, tpu.core_type = #tpu.core_type<tc>} {
    %c0 = arith.constant 0 : index
    %c0_0 = arith.constant 0 : index
    %0 = vector.load %arg0[%c0, %c0_0] : memref<72x800xbf16, #tpu.memory_space<vmem>>, vector<72x800xbf16>
    %c0_1 = arith.constant 0 : index
    %c0_2 = arith.constant 0 : index
    %1 = vector.load %arg1[%c0_1, %c0_2] : memref<800x64xbf16, #tpu.memory_space<vmem>>, vector<800x64xbf16>
    %cst = arith.constant dense<0.000000e+00> : vector<72x64xf32>
    %2 = tpu.matmul %0, %1, %cst {dimension_numbers = #tpu.dot_dimension_numbers<[1], [0], [0], [1], [0, 0, 1, 1], [], []>} : vector<72x800xbf16>, vector<800x64xbf16>, vector<72x64xf32> -> vector<72x64xf32>
    %c0_3 = arith.constant 0 : index
    %c0_4 = arith.constant 0 : index
    %3 = vector.load %arg2[%c0_3, %c0_4] : memref<1x64xf32, #tpu.memory_space<vmem>>, vector<1x64xf32>
    %4 = vector.broadcast %3 : vector<1x64xf32> to vector<72x64xf32>
    %5 = arith.addf %2, %4 : vector<72x64xf32>
    %cst_5 = arith.constant 0.000000e+00 : f32
    %6 = vector.broadcast %cst_5 : f32 to vector<72x64xf32>
    %7 = arith.maximumf %5, %6 : vector<72x64xf32>
    %8 = arith.truncf %7 : vector<72x64xf32> to vector<72x64xbf16>
    %9 = vector.extract_strided_slice %8 {offsets = [0, 0], sizes = [8, 64], strides = [1, 1]} : vector<72x64xbf16> to vector<8x64xbf16>
    %c0_6 = arith.constant 0 : index
    %c0_7 = arith.constant 0 : index
    %c0_8 = arith.constant 0 : index
    %10 = vector.load %arg3[%c0_6, %c0_7, %c0_8] : memref<9x64x1024xbf16, #tpu.memory_space<vmem>>, vector<1x64x1024xbf16>
    %11 = vector.shape_cast %10 : vector<1x64x1024xbf16> to vector<64x1024xbf16>
    %cst_9 = arith.constant dense<0.000000e+00> : vector<8x1024xf32>
    %12 = tpu.matmul %9, %11, %cst_9 {dimension_numbers = #tpu.dot_dimension_numbers<[1], [0], [0], [1], [0, 0, 1, 1], [], []>} : vector<8x64xbf16>, vector<64x1024xbf16>, vector<8x1024xf32> -> vector<8x1024xf32>
    %13 = vector.extract_strided_slice %8 {offsets = [8, 0], sizes = [8, 64], strides = [1, 1]} : vector<72x64xbf16> to vector<8x64xbf16>
    %c1 = arith.constant 1 : index
    %c0_10 = arith.constant 0 : index
    %c0_11 = arith.constant 0 : index
    %14 = vector.load %arg3[%c1, %c0_10, %c0_11] : memref<9x64x1024xbf16, #tpu.memory_space<vmem>>, vector<1x64x1024xbf16>
    %15 = vector.shape_cast %14 : vector<1x64x1024xbf16> to vector<64x1024xbf16>
    %cst_12 = arith.constant dense<0.000000e+00> : vector<8x1024xf32>
    %16 = tpu.matmul %13, %15, %cst_12 {dimension_numbers = #tpu.dot_dimension_numbers<[1], [0], [0], [1], [0, 0, 1, 1], [], []>} : vector<8x64xbf16>, vector<64x1024xbf16>, vector<8x1024xf32> -> vector<8x1024xf32>
    %17 = arith.addf %12, %16 : vector<8x1024xf32>
    %18 = vector.extract_strided_slice %8 {offsets = [16, 0], sizes = [8, 64], strides = [1, 1]} : vector<72x64xbf16> to vector<8x64xbf16>
    %c2 = arith.constant 2 : index
    %c0_13 = arith.constant 0 : index
    %c0_14 = arith.constant 0 : index
    %19 = vector.load %arg3[%c2, %c0_13, %c0_14] : memref<9x64x1024xbf16, #tpu.memory_space<vmem>>, vector<1x64x1024xbf16>
    %20 = vector.shape_cast %19 : vector<1x64x1024xbf16> to vector<64x1024xbf16>
    %cst_15 = arith.constant dense<0.000000e+00> : vector<8x1024xf32>
    %21 = tpu.matmul %18, %20, %cst_15 {dimension_numbers = #tpu.dot_dimension_numbers<[1], [0], [0], [1], [0, 0, 1, 1], [], []>} : vector<8x64xbf16>, vector<64x1024xbf16>, vector<8x1024xf32> -> vector<8x1024xf32>
    %22 = arith.addf %17, %21 : vector<8x1024xf32>
    %23 = vector.extract_strided_slice %8 {offsets = [24, 0], sizes = [8, 64], strides = [1, 1]} : vector<72x64xbf16> to vector<8x64xbf16>
    %c3 = arith.constant 3 : index
    %c0_16 = arith.constant 0 : index
    %c0_17 = arith.constant 0 : index
    %24 = vector.load %arg3[%c3, %c0_16, %c0_17] : memref<9x64x1024xbf16, #tpu.memory_space<vmem>>, vector<1x64x1024xbf16>
    %25 = vector.shape_cast %24 : vector<1x64x1024xbf16> to vector<64x1024xbf16>
    %cst_18 = arith.constant dense<0.000000e+00> : vector<8x1024xf32>
    %26 = tpu.matmul %23, %25, %cst_18 {dimension_numbers = #tpu.dot_dimension_numbers<[1], [0], [0], [1], [0, 0, 1, 1], [], []>} : vector<8x64xbf16>, vector<64x1024xbf16>, vector<8x1024xf32> -> vector<8x1024xf32>
    %27 = arith.addf %22, %26 : vector<8x1024xf32>
    %28 = vector.extract_strided_slice %8 {offsets = [32, 0], sizes = [8, 64], strides = [1, 1]} : vector<72x64xbf16> to vector<8x64xbf16>
    %c4 = arith.constant 4 : index
    %c0_19 = arith.constant 0 : index
    %c0_20 = arith.constant 0 : index
    %29 = vector.load %arg3[%c4, %c0_19, %c0_20] : memref<9x64x1024xbf16, #tpu.memory_space<vmem>>, vector<1x64x1024xbf16>
    %30 = vector.shape_cast %29 : vector<1x64x1024xbf16> to vector<64x1024xbf16>
    %cst_21 = arith.constant dense<0.000000e+00> : vector<8x1024xf32>
    %31 = tpu.matmul %28, %30, %cst_21 {dimension_numbers = #tpu.dot_dimension_numbers<[1], [0], [0], [1], [0, 0, 1, 1], [], []>} : vector<8x64xbf16>, vector<64x1024xbf16>, vector<8x1024xf32> -> vector<8x1024xf32>
    %32 = arith.addf %27, %31 : vector<8x1024xf32>
    %33 = vector.extract_strided_slice %8 {offsets = [40, 0], sizes = [8, 64], strides = [1, 1]} : vector<72x64xbf16> to vector<8x64xbf16>
    %c5 = arith.constant 5 : index
    %c0_22 = arith.constant 0 : index
    %c0_23 = arith.constant 0 : index
    %34 = vector.load %arg3[%c5, %c0_22, %c0_23] : memref<9x64x1024xbf16, #tpu.memory_space<vmem>>, vector<1x64x1024xbf16>
    %35 = vector.shape_cast %34 : vector<1x64x1024xbf16> to vector<64x1024xbf16>
    %cst_24 = arith.constant dense<0.000000e+00> : vector<8x1024xf32>
    %36 = tpu.matmul %33, %35, %cst_24 {dimension_numbers = #tpu.dot_dimension_numbers<[1], [0], [0], [1], [0, 0, 1, 1], [], []>} : vector<8x64xbf16>, vector<64x1024xbf16>, vector<8x1024xf32> -> vector<8x1024xf32>
    %37 = arith.addf %32, %36 : vector<8x1024xf32>
    %38 = vector.extract_strided_slice %8 {offsets = [48, 0], sizes = [8, 64], strides = [1, 1]} : vector<72x64xbf16> to vector<8x64xbf16>
    %c6 = arith.constant 6 : index
    %c0_25 = arith.constant 0 : index
    %c0_26 = arith.constant 0 : index
    %39 = vector.load %arg3[%c6, %c0_25, %c0_26] : memref<9x64x1024xbf16, #tpu.memory_space<vmem>>, vector<1x64x1024xbf16>
    %40 = vector.shape_cast %39 : vector<1x64x1024xbf16> to vector<64x1024xbf16>
    %cst_27 = arith.constant dense<0.000000e+00> : vector<8x1024xf32>
    %41 = tpu.matmul %38, %40, %cst_27 {dimension_numbers = #tpu.dot_dimension_numbers<[1], [0], [0], [1], [0, 0, 1, 1], [], []>} : vector<8x64xbf16>, vector<64x1024xbf16>, vector<8x1024xf32> -> vector<8x1024xf32>
    %42 = arith.addf %37, %41 : vector<8x1024xf32>
    %43 = vector.extract_strided_slice %8 {offsets = [56, 0], sizes = [8, 64], strides = [1, 1]} : vector<72x64xbf16> to vector<8x64xbf16>
    %c7 = arith.constant 7 : index
    %c0_28 = arith.constant 0 : index
    %c0_29 = arith.constant 0 : index
    %44 = vector.load %arg3[%c7, %c0_28, %c0_29] : memref<9x64x1024xbf16, #tpu.memory_space<vmem>>, vector<1x64x1024xbf16>
    %45 = vector.shape_cast %44 : vector<1x64x1024xbf16> to vector<64x1024xbf16>
    %cst_30 = arith.constant dense<0.000000e+00> : vector<8x1024xf32>
    %46 = tpu.matmul %43, %45, %cst_30 {dimension_numbers = #tpu.dot_dimension_numbers<[1], [0], [0], [1], [0, 0, 1, 1], [], []>} : vector<8x64xbf16>, vector<64x1024xbf16>, vector<8x1024xf32> -> vector<8x1024xf32>
    %47 = arith.addf %42, %46 : vector<8x1024xf32>
    %48 = vector.extract_strided_slice %8 {offsets = [64, 0], sizes = [8, 64], strides = [1, 1]} : vector<72x64xbf16> to vector<8x64xbf16>
    %c8 = arith.constant 8 : index
    %c0_31 = arith.constant 0 : index
    %c0_32 = arith.constant 0 : index
    %49 = vector.load %arg3[%c8, %c0_31, %c0_32] : memref<9x64x1024xbf16, #tpu.memory_space<vmem>>, vector<1x64x1024xbf16>
    %50 = vector.shape_cast %49 : vector<1x64x1024xbf16> to vector<64x1024xbf16>
    %cst_33 = arith.constant dense<0.000000e+00> : vector<8x1024xf32>
    %51 = tpu.matmul %48, %50, %cst_33 {dimension_numbers = #tpu.dot_dimension_numbers<[1], [0], [0], [1], [0, 0, 1, 1], [], []>} : vector<8x64xbf16>, vector<64x1024xbf16>, vector<8x1024xf32> -> vector<8x1024xf32>
    %52 = arith.addf %47, %51 : vector<8x1024xf32>
    %c0_34 = arith.constant 0 : index
    %c0_35 = arith.constant 0 : index
    %53 = vector.load %arg4[%c0_34, %c0_35] : memref<1x1024xf32, #tpu.memory_space<vmem>>, vector<1x1024xf32>
    %54 = vector.broadcast %53 : vector<1x1024xf32> to vector<8x1024xf32>
    %55 = arith.addf %52, %54 : vector<8x1024xf32>
    %cst_36 = arith.constant 0.000000e+00 : f32
    %56 = vector.broadcast %cst_36 : f32 to vector<8x1024xf32>
    %57 = arith.maximumf %55, %56 : vector<8x1024xf32>
    %58 = arith.truncf %57 : vector<8x1024xf32> to vector<8x1024xbf16>
    %c0_37 = arith.constant 0 : index
    %c0_38 = arith.constant 0 : index
    %59 = vector.load %arg5[%c0_37, %c0_38] : memref<1024x4xbf16, #tpu.memory_space<vmem>>, vector<1024x4xbf16>
    %cst_39 = arith.constant dense<0.000000e+00> : vector<8x4xf32>
    %60 = tpu.matmul %58, %59, %cst_39 {dimension_numbers = #tpu.dot_dimension_numbers<[1], [0], [0], [1], [0, 0, 1, 1], [], []>} : vector<8x1024xbf16>, vector<1024x4xbf16>, vector<8x4xf32> -> vector<8x4xf32>
    %c0_40 = arith.constant 0 : index
    %c0_41 = arith.constant 0 : index
    %61 = vector.load %arg6[%c0_40, %c0_41] : memref<1x4xf32, #tpu.memory_space<vmem>>, vector<1x4xf32>
    %62 = vector.broadcast %61 : vector<1x4xf32> to vector<8x4xf32>
    %63 = arith.addf %60, %62 : vector<8x4xf32>
    %cst_42 = arith.constant 0.000000e+00 : f32
    %64 = vector.broadcast %cst_42 : f32 to vector<8x4xf32>
    %65 = arith.maximumf %63, %64 : vector<8x4xf32>
    %c0_43 = arith.constant 0 : index
    %c0_44 = arith.constant 0 : index
    %66 = vector.load %arg7[%c0_43, %c0_44] : memref<8x4xf32, #tpu.memory_space<vmem>>, vector<8x4xf32>
    tpu.vector_store %arg7[%c0_43, %c0_44], %65 {strides = array<i32>} : memref<8x4xf32, #tpu.memory_space<vmem>>, vector<8x4xf32>,
    return
  }
}

</mosaic_0001>

<bundles_post_ra>
// kernel: qnetwork_forward.4
= control target key start
LH: loop header
LB: loop body
LE: loop exit
PB: predicated region body
PF: predicated region fallthrough
CT: control target
= control target key end

     0   :  { %s1150_s12 = smov 0   ;;  %s1275_s0 = inlined_call_operand.vmem [shape: bf16[5,25,2560], index: 0, kind: input, shape index: {}]   ;;  %s1276_s1 = inlined_call_operand.vmem [shape: bf16[8,25], index: 1, kind: input, shape index: {}]   ;;  %s1277_s2 = inlined_call_operand.vmem [shape: f32[8,1], index: 2, kind: input, shape index: {}]   ;;  %s1278_s3 = inlined_call_operand.vmem [shape: bf16[8,3200], index: 3, kind: output, shape index: {}]  }
   0x1 LB: > { %s1156_s13 = sadd.s32 4294967295, %s1126_s12   ;;  %p987_p0 = scmp.ge.s32.totalorder %s1126_s12, 1  ;;  %s1126_s12 = sphi %s1150_s12, %s13_s12  }
   0x2   : > { %p137_p1 = scmp.lt.s32.totalorder %s1126_s12, 6 }
   0x4   : > { %p138_p2 = pnand %p987_p0, %p137_p1 }
   0x5   : > { %p161_p3 = scmp.lt.s32.totalorder (!%p138_p2), %s1156_s13, 4  ;;  %v887_v0 = vld [vmem:[%s1277_s2] sm:$0xff] (!%p138_p2)  ;;  %v1128_v1 = vmov (!%p138_p2), 0   ;;  %vm398_vm0 = vcmask (!%p138_p2), 1043456   ;;  %vm399_vm1 = vcmask (!%p138_p2), 1044480   ;;  %v1129_v2 = vmov (!%p138_p2), 65535  }
   0x6   : > { %141 = sbr.rel (%p138_p2) target bundleno = 283 (0x11b), region = 32  ;;  %494 = vmatprep.mubr.bf16.mxu0 (!%p138_p2), %v1128_v1  ;;  %535 = vmatprep.mubr.bf16.mxu1 (!%p138_p2), %v1128_v1  ;;  %v400_v3 = vsel (!%p138_p2), %vm398_vm0, 4294967295, %v1129_v2  ;;  %v1191_v18 = vld [vmem:[%s1276_s1] sm:$0xf] (!%p138_p2)  ;;  %vm394_vm2 = vcmask (!%p138_p2), 203776  }
   0x7   : > { %1059 = vset.pattern.permute.xlu0 (!%p138_p2), %v1128_v1  ;;  %v1177_v8 = vsel (!%p138_p2), %vm399_vm1, %v400_v3, 0  ;;  %s166_s23 = smul.u32 (!%p138_p2), 5, %s1156_s13 }
   0x8   : > { %890 = vperm.xlu0 (!%p138_p2), %1059, %v887_v0  }
   0x9   : > { %p167_p4 = scmp.lt.s32.totalorder (!%p138_p2), %s166_s23, 24 }
   0xd   : > { %s162_s16 = scalar_select %p161_p3, %s1156_s13, 4 }
   0xe   : > { %s1280_s23 = smov (!%p167_p4, %s166_s23), 24 }
   0xf   : > { %s1048_s17 = smul.u32 320, %s162_s16  ;;  %s989_s24 = sshll.u32 %s1280_s23, 2 }
  0x10   : > { %s170_s27 = scalar_lea.vmem %s1278_s3, %s989_s24 }
  0x11   : > { %s1171_s20 = scalar_lea.vmem %s1275_s0, %s1048_s17 }
  0x12   : > { %v1060_v4 = vld [vmem:[%s1171_s20 + $0x4] ss:$80 sps:$4 sm:$0xff]   ;;  %v1062_v5 = vld [vmem:[%s1171_s20 + $0xc] ss:$80 sps:$4 sm:$0xff]   ;;  %v1064_v6 = vld [vmem:[%s1171_s20] ss:$80 sps:$4 sm:$0xff]  }
  0x13   : > { %462 = vmatprep.subr.bf16.mxu0 %v1060_v4  ;;  %v1065_v7 = vld [vmem:[%s1171_s20 + $0x8] ss:$80 sps:$4 sm:$0xff]   ;;  %503 = vmatprep.subr.bf16.mxu1 %v1062_v5  ;;  %v1066_v9 = vld [vmem:[%s1171_s20 + $0xa4] ss:$80 sps:$4 sm:$0x1f]  }
  0x14   : > { %463 = vmatpush1.bf16.msra.mxu0 %v1064_v6  ;;  %504 = vmatpush1.bf16.msra.mxu1 %v1065_v7  ;;  %v1068_v10 = vld [vmem:[%s1171_s20 + $0xac] ss:$80 sps:$4 sm:$0x1f]   ;;  %v406_v11 = vand.u32 %v1066_v9, %v1177_v8  ;;  %v1070_v12 = vld [vmem:[%s1171_s20 + $0xa0] ss:$80 sps:$4 sm:$0x1f]  }
  0x15   : > { %v1071_v13 = vld [vmem:[%s1171_s20 + $0xa8] ss:$80 sps:$4 sm:$0x1f]   ;;  %v412_v14 = vand.u32 %v1068_v10, %v1177_v8  ;;  %v1074_v15 = vld [vmem:[%s1171_s20 + $0x14] ss:$80 sps:$4 sm:$0xff]   ;;  %v403_v16 = vand.u32 %v1070_v12, %v1177_v8 }
  0x16   : > { %464 = vmatprep.subr.bf16.mxu0 %v406_v11  ;;  %v409_v17 = vand.u32 %v1071_v13, %v1177_v8  ;;  %v1072_v19 = vld [vmem:[%s1171_s20 + $0x10] ss:$80 sps:$4 sm:$0xff]   ;;  %v1075_v20 = vld [vmem:[%s1171_s20 + $0x18] ss:$80 sps:$4 sm:$0xff]   ;;  %v1077_v21 = vld [vmem:[%s1171_s20 + $0x1c] ss:$80 sps:$4 sm:$0xff]  }
  0x17   : > { %505 = vmatprep.subr.bf16.mxu1 %v412_v14  ;;  %v1078_v22 = vld [vmem:[%s1171_s20 + $0xb0] ss:$80 sps:$4 sm:$0x1f]   ;;  %v1080_v23 = vld [vmem:[%s1171_s20 + $0xb4] ss:$80 sps:$4 sm:$0x1f]  }
  0x18   : > { %465 = vmatpush1.bf16.msra.mxu0 %v403_v16  ;;  %506 = vmatpush1.bf16.msra.mxu1 %v409_v17  ;;  %v1081_v24 = vld [vmem:[%s1171_s20 + $0xb8] ss:$80 sps:$4 sm:$0x1f]   ;;  %v418_v25 = vand.u32 %v1080_v23, %v1177_v8  ;;  %v1083_v26 = vld [vmem:[%s1171_s20 + $0xbc] ss:$80 sps:$4 sm:$0x1f]   ;;  %v415_v28 = vand.u32 %v1078_v22, %v1177_v8 }
  0x19   : > { %544 = vmatprep.subr.bf16.mxu0 %v1074_v15  ;;  %585 = vmatprep.subr.bf16.mxu1 %v1077_v21  ;;  %v424_v27 = vand.u32 %v1083_v26, %v1177_v8  ;;  %v421_v29 = vand.u32 %v1081_v24, %v1177_v8  ;;  %v1086_v30 = vld [vmem:[%s1171_s20 + $0x24] ss:$80 sps:$4 sm:$0xff]   ;;  %v1089_v31 = vld [vmem:[%s1171_s20 + $0x2c] ss:$80 sps:$4 sm:$0xff]   ;;  %v1084_v32 = vld [vmem:[%s1171_s20 + $0x20] ss:$80 sps:$4 sm:$0xff]  }
  0x1a   : > { %v1087_v33 = vld [vmem:[%s1171_s20 + $0x28] ss:$80 sps:$4 sm:$0xff]   ;;  %v1092_v34 = vld [vmem:[%s1171_s20 + $0xc4] ss:$80 sps:$4 sm:$0x1f]  }
  0x1b   : > { %1030 = vmatmul.mubr.msk.bf16.vlgmr.msra.gmra.mrb[0].mxu0 %vm394_vm2, %v1191_v18  ;;  %1031 = vmatmul.mubr.msk.bf16.vlgmr.msra.gmra.mrb[0].mxu1 %vm394_vm2, %v1191_v18  ;;  %v1090_v35 = vld [vmem:[%s1171_s20 + $0xc0] ss:$80 sps:$4 sm:$0x1f]   ;;  %v1095_v36 = vld [vmem:[%s1171_s20 + $0xcc] ss:$80 sps:$4 sm:$0x1f]   ;;  %v430_v38 = vand.u32 %v1092_v34, %v1177_v8 }
  0x1c   : > { %545 = vmatpush1.bf16.msra.mxu0 %v1072_v19  ;;  %586 = vmatpush1.bf16.msra.mxu1 %v1075_v20  ;;  %v1093_v37 = vld [vmem:[%s1171_s20 + $0xc8] ss:$80 sps:$4 sm:$0x1f]   ;;  %v436_v39 = vand.u32 %v1095_v36, %v1177_v8  ;;  %v1098_v40 = vld [vmem:[%s1171_s20 + $0x34] ss:$80 sps:$4 sm:$0xff]   ;;  %v427_v41 = vand.u32 %v1090_v35, %v1177_v8 }
  0x1d   : > { %546 = vmatprep.subr.bf16.mxu0 %v418_v25  ;;  %576 = vmatprep.mubr.bf16.mxu0 %v1128_v1  ;;  %v433_v42 = vand.u32 %v1093_v37, %v1177_v8  ;;  %v1101_v43 = vld [vmem:[%s1171_s20 + $0x3c] ss:$80 sps:$4 sm:$0xff]   ;;  %v1104_v44 = vld [vmem:[%s1171_s20 + $0xd4] ss:$80 sps:$4 sm:$0x1f]  }
  0x1e   : > { %587 = vmatprep.subr.bf16.mxu1 %v424_v27  ;;  %617 = vmatprep.mubr.bf16.mxu1 %v1128_v1  ;;  %v1107_v45 = vld [vmem:[%s1171_s20 + $0xdc] ss:$80 sps:$4 sm:$0x1f]   ;;  %v1096_v46 = vld [vmem:[%s1171_s20 + $0x30] ss:$80 sps:$4 sm:$0xff]   ;;  %v442_v50 = vand.u32 %v1104_v44, %v1177_v8 }
  0x1f   : > { %v1099_v47 = vld [vmem:[%s1171_s20 + $0x38] ss:$80 sps:$4 sm:$0xff]   ;;  %v1102_v48 = vld [vmem:[%s1171_s20 + $0xd0] ss:$80 sps:$4 sm:$0x1f]   ;;  %v448_v51 = vand.u32 %v1107_v45, %v1177_v8 }
  0x20   : > { %547 = vmatpush1.bf16.msra.mxu0 %v415_v28  ;;  %588 = vmatpush1.bf16.msra.mxu1 %v421_v29  ;;  %v1105_v49 = vld [vmem:[%s1171_s20 + $0xd8] ss:$80 sps:$4 sm:$0x1f]   ;;  %v439_v52 = vand.u32 %v1102_v48, %v1177_v8  ;;  %v1110_v54 = vld [vmem:[%s1171_s20 + $0x44] ss:$80 sps:$4 sm:$0xff]  }
  0x21   : > { %626 = vmatprep.subr.bf16.mxu0 %v1086_v30  ;;  %667 = vmatprep.subr.bf16.mxu1 %v1089_v31  ;;  %v445_v53 = vand.u32 %v1105_v49, %v1177_v8  ;;  %v1113_v55 = vld [vmem:[%s1171_s20 + $0x4c] ss:$80 sps:$4 sm:$0xff]   ;;  %v1116_v56 = vld [vmem:[%s1171_s20 + $0xe4] ss:$80 sps:$4 sm:$0x1f]  }
  0x22   : > { %v1119_v57 = vld [vmem:[%s1171_s20 + $0xec] ss:$80 sps:$4 sm:$0x1f]   ;;  %v1108_v58 = vld [vmem:[%s1171_s20 + $0x40] ss:$80 sps:$4 sm:$0xff]   ;;  %v454_v62 = vand.u32 %v1116_v56, %v1177_v8 }
  0x23   : > { %1032 = vmatmul.mubr.msk.bf16.vlgmr.msra.gmra.mrb[4].mxu0 %vm394_vm2, %v1191_v18  ;;  %1033 = vmatmul.mubr.msk.bf16.vlgmr.msra.gmra.mrb[4].mxu1 %vm394_vm2, %v1191_v18  ;;  %v1111_v59 = vld [vmem:[%s1171_s20 + $0x48] ss:$80 sps:$4 sm:$0xff]   ;;  %v1114_v60 = vld [vmem:[%s1171_s20 + $0xe0] ss:$80 sps:$4 sm:$0x1f]   ;;  %v460_v63 = vand.u32 %v1119_v57, %v1177_v8 }
  0x24   : > { %627 = vmatpush1.bf16.msra.mxu0 %v1084_v32  ;;  %668 = vmatpush1.bf16.msra.mxu1 %v1087_v33  ;;  %v1117_v61 = vld [vmem:[%s1171_s20 + $0xe8] ss:$80 sps:$4 sm:$0x1f]   ;;  %v451_v0 = vand.u32 %v1114_v60, %v1177_v8 }
  0x25   : > { %628 = vmatprep.subr.bf16.mxu0 %v430_v38  ;;  %669 = vmatprep.subr.bf16.mxu1 %v436_v39  ;;  %v457_v2 = vand.u32 %v1117_v61, %v1177_v8 }
  0x26   : > { %658 = vmatprep.mubr.bf16.mxu0 %v1128_v1  ;;  %699 = vmatprep.mubr.bf16.mxu1 %v1128_v1 }
  0x28   : > { %629 = vmatpush1.bf16.msra.mxu0 %v427_v41  ;;  %670 = vmatpush1.bf16.msra.mxu1 %v433_v42 }
  0x29   : > { %708 = vmatprep.subr.bf16.mxu0 %v1098_v40  ;;  %749 = vmatprep.subr.bf16.mxu1 %v1101_v43 }
  0x2b   : > { %1034 = vmatmul.mubr.msk.bf16.vlgmr.msra.gmra.mrb[8].mxu0 %vm394_vm2, %v1191_v18  ;;  %1035 = vmatmul.mubr.msk.bf16.vlgmr.msra.gmra.mrb[8].mxu1 %vm394_vm2, %v1191_v18 }
  0x2c   : > { %709 = vmatpush1.bf16.msra.mxu0 %v1096_v46  ;;  %750 = vmatpush1.bf16.msra.mxu1 %v1099_v47 }
  0x2d   : > { %710 = vmatprep.subr.bf16.mxu0 %v442_v50  ;;  %751 = vmatprep.subr.bf16.mxu1 %v448_v51 }
  0x2e   : > { %740 = vmatprep.mubr.bf16.mxu0 %v1128_v1  ;;  %781 = vmatprep.mubr.bf16.mxu1 %v1128_v1 }
  0x30   : > { %711 = vmatpush1.bf16.msra.mxu0 %v439_v52  ;;  %752 = vmatpush1.bf16.msra.mxu1 %v445_v53 }
  0x31   : > { %790 = vmatprep.subr.bf16.mxu0 %v1110_v54  ;;  %831 = vmatprep.subr.bf16.mxu1 %v1113_v55 }
  0x33   : > { %1036 = vmatmul.mubr.msk.bf16.vlgmr.msra.gmra.mrb[12].mxu0 %vm394_vm2, %v1191_v18  ;;  %1037 = vmatmul.mubr.msk.bf16.vlgmr.msra.gmra.mrb[12].mxu1 %vm394_vm2, %v1191_v18 }
  0x34   : > { %791 = vmatpush1.bf16.msra.mxu0 %v1108_v58  ;;  %832 = vmatpush1.bf16.msra.mxu1 %v1111_v59 }
  0x35   : > { %792 = vmatprep.subr.bf16.mxu0 %v454_v62  ;;  %833 = vmatprep.subr.bf16.mxu1 %v460_v63 }
  0x36   : > { %822 = vmatprep.mubr.bf16.mxu0 %v1128_v1  ;;  %863 = vmatprep.mubr.bf16.mxu1 %v1128_v1 }
  0x38   : > { %793 = vmatpush1.bf16.msra.mxu0 %v451_v0  ;;  %834 = vmatpush1.bf16.msra.mxu1 %v457_v2 }
  0x3b   : > { %1038 = vmatmul.mubr.msk.bf16.vlgmr.msra.gmra.mrb[16].mxu0 %vm394_vm2, %v1191_v18  ;;  %1039 = vmatmul.mubr.msk.bf16.vlgmr.msra.gmra.mrb[16].mxu1 %vm394_vm2, %v1191_v18 }
  0x87   : > { %v891_v41 = vpop.permute.xlu0 %890 }
  0xee   : > { %v496_v3 = vpop.f32.mrb[0].mxu0  ;;  %v537_v4 = vpop.f32.mrb[0].mxu1 }
  0xef   : > { %v498_v5 = vpop.f32.mrb[1].mxu0  ;;  %v539_v6 = vpop.f32.mrb[1].mxu1 }
  0xf0   : > { %v500_v7 = vpop.f32.mrb[2].mxu0  ;;  %v541_v8 = vpop.f32.mrb[2].mxu1 }
  0xf1   : > { %v501_v9 = vpop.f32.mrb[3].mxu0  ;;  %v542_v10 = vpop.f32.mrb[3].mxu1 }
  0xf6   : > { %v578_v11 = vpop.f32.mrb[4].mxu0  ;;  %v619_v12 = vpop.f32.mrb[4].mxu1 }
  0xf7   : > { %v873_v13 = vmax.f32 %v498_v5, %v619_v12  ;;  %v580_v1 = vpop.f32.mrb[5].mxu0  ;;  %v621_v14 = vpop.f32.mrb[5].mxu1 }
  0xf8   : > { %v872_v15 = vmax.f32 %v496_v3, %v580_v1  ;;  %v874_v16 = vmax.f32 %v537_v4, %v621_v14  ;;  %v582_v17 = vpop.f32.mrb[6].mxu0  ;;  %v623_v19 = vpop.f32.mrb[6].mxu1 }
  0xf9   : > { %v583_v20 = vpop.f32.mrb[7].mxu0  ;;  %v624_v18 = vpop.f32.mrb[7].mxu1 }
  0xfe   : > { %v660_v21 = vpop.f32.mrb[8].mxu0  ;;  %v701_v22 = vpop.f32.mrb[8].mxu1 }
  0xff   : > { %v875_v23 = vmax.f32 %v539_v6, %v660_v21  ;;  %v662_v24 = vpop.f32.mrb[9].mxu0  ;;  %v703_v25 = vpop.f32.mrb[9].mxu1 }
 0x100   : > { %v876_v26 = vmax.f32 %v578_v11, %v662_v24  ;;  %v664_v27 = vpop.f32.mrb[10].mxu0  ;;  %v705_v28 = vpop.f32.mrb[10].mxu1 }
 0x101   : > { %v665_v29 = vpop.f32.mrb[11].mxu0  ;;  %v706_v30 = vpop.f32.mrb[11].mxu1 }
 0x106   : > { %v742_v31 = vpop.f32.mrb[12].mxu0  ;;  %v783_v32 = vpop.f32.mrb[12].mxu1 }
 0x107   : > { %v744_v33 = vpop.f32.mrb[13].mxu0  ;;  %v785_v34 = vpop.f32.mrb[13].mxu1 }
 0x108   : > { %v877_v35 = vmax.f32 %v701_v22, %v785_v34  ;;  %v746_v36 = vpop.f32.mrb[14].mxu0  ;;  %v787_v37 = vpop.f32.mrb[14].mxu1 }
 0x109   : > { %v747_v38 = vpop.f32.mrb[15].mxu0  ;;  %v788_v39 = vpop.f32.mrb[15].mxu1 }
 0x10a   : > { %v882_v40 = vmax.f32 %v872_v15, %v877_v35 }
 0x10c   : > { %v893_v52 = vadd.f32 %v891_v41, %v882_v40 }
 0x10e   : > { %v824_v42 = vpop.f32.mrb[16].mxu0  ;;  %v865_v43 = vpop.f32.mrb[16].mxu1  ;;  %v898_v63 = vmax.f32 %v893_v52, 0.0 }
 0x10f   : > { %v878_v44 = vmax.f32 %v703_v25, %v824_v42  ;;  %v880_v45 = vmax.f32 %v744_v33, %v865_v43  ;;  %v826_v46 = vpop.f32.mrb[17].mxu0  ;;  %v867_v47 = vpop.f32.mrb[17].mxu1 }
 0x110   : > { %v879_v48 = vmax.f32 %v742_v31, %v826_v46  ;;  %v881_v49 = vmax.f32 %v783_v32, %v867_v47  ;;  %v828_v50 = vpop.f32.mrb[18].mxu0  ;;  %v869_v51 = vpop.f32.mrb[18].mxu1 }
 0x111   : > { %v883_v53 = vmax.f32 %v873_v13, %v878_v44  ;;  %v885_v54 = vmax.f32 %v875_v23, %v880_v45  ;;  %v829_v55 = vpop.f32.mrb[19].mxu0  ;;  %v870_v56 = vpop.f32.mrb[19].mxu1 }
 0x112   : > { %v884_v57 = vmax.f32 %v874_v16, %v879_v48  ;;  %v886_v58 = vmax.f32 %v876_v26, %v881_v49 }
 0x113   : > { %v894_v59 = vadd.f32 %v891_v41, %v883_v53  ;;  %v896_v60 = vadd.f32 %v891_v41, %v885_v54 }
 0x114   : > { %v895_v61 = vadd.f32 %v891_v41, %v884_v57  ;;  %v897_v62 = vadd.f32 %v891_v41, %v886_v58 }
 0x115   : > { %v899_v0 = vmax.f32 %v894_v59, 0.0  ;;  %v901_v2 = vmax.f32 %v896_v60, 0.0 }
 0x116   : > { %v900_v3 = vmax.f32 %v895_v61, 0.0  ;;  %v902_v4 = vmax.f32 %v897_v62, 0.0 }
 0x117   : > { %v1045_v5 = vpack.c.bf16 %v899_v0, %v898_v63 }
 0x118   : > { %v1046_v6 = vpack.c.bf16 %v901_v2, %v900_v3  ;;  %v1047_v7 = vpack.c.bf16 %v902_v4, %v902_v4 }
 0x119   : > { %924 = vst [vmem:[%s170_s27] sm:$0xff] %v1045_v5 }
 0x11a   : > { %925 = vst [vmem:[%s170_s27 + $0x8] sm:$0xff] %v1046_v6  ;;  %926 = vst [vmem:[%s170_s27 + $0x10] sm:$0xf] %v1047_v7 }
 0x11b PF: > { %s13_s12 = sadd.s32 1, %s1126_s12  }
 0x11c   : > { %p10_p5 = scmp.ge.s32.totalorder %s13_s12, 7  }
 0x11e   :  { %12 = sbr.rel (!%p10_p5) target bundleno = 1 (0x1), region = 62 }

// kernel: qnetwork_forward.5
= control target key start
LH: loop header
LB: loop body
LE: loop exit
PB: predicated region body
PF: predicated region fallthrough
CT: control target
= control target key end

     0   :  { %s2035_s12 = smov 0   ;;  %s2037_s13 = smov 0   ;;  %s2284_s0 = inlined_call_operand.vmem [shape: bf16[2,200,1536], index: 0, kind: input, shape index: {}]   ;;  %s2285_s1 = inlined_call_operand.vmem [shape: bf16[16,200], index: 1, kind: input, shape index: {}]   ;;  %s2286_s2 = inlined_call_operand.vmem [shape: f32[16,1], index: 2, kind: input, shape index: {}]   ;;  %s2287_s3 = inlined_call_operand.vmem [shape: bf16[16,768], index: 3, kind: output, shape index: {}]  }
   0x1   :  { %s2039_s14 = smov 0  }
   0x2 LB: > { %s2048_s15 = sadd.s32 4294967295, %s2012_s14   ;;  %s2050_s16 = sadd.s32 1, %s2012_s14   ;;  %s2012_s14 = sphi %s2039_s14, %s2291_s14   ;;  %s2008_s13 = sphi %s2037_s13, %s2290_s13   ;;  %s2004_s12 = sphi %s2035_s12, %s2289_s12  }
   0x3   : > { %s85_s17 = ssub.s32 %s2012_s14, %s2050_s16  ;;  %s88_s18 = sadd.s32 1, %s2008_s13 }
   0x4   : > { %p86_p0 = scmp.eq.s32.totalorder %s85_s17, 0  ;;  %p98_p1 = scmp.ne.s32.totalorder %s2008_s13, %s2004_s12 }
   0x5   : > { %p99_p2 = scmp.eq.s32.totalorder %s2048_s15, 1  ;;  %p1543_p3 = scmp.ge.s32.totalorder %s2012_s14, 1 }
   0x6   : > { %s2058_s19 = scalar_select %p86_p0, %s2008_s13, %s88_s18  }
   0x7   : > { %p2060_p4 = por %p99_p2, %p98_p1  ;;  %p137_p5 = scmp.lt.s32.totalorder %s2012_s14, 3 }
   0x9   : > { %p138_p6 = pnand %p1543_p3, %p137_p5 }
   0xa   : > { %p160_p7 = scmp.lt.s32.totalorder (!%p138_p6), %s2048_s15, 1  ;;  %v2068_v0 = vld [vmem:[%s2285_s1 + $0x4] ss:$8 sps:$4 sm:$0xff] (!%p138_p6)   ;;  %vm1078_vm0 = vcmask (!%p138_p6), 588800   ;;  %v2014_v39 = vmov (!%p138_p6), 0   ;;  %vm1082_vm1 = vcmask (!%p138_p6), 1043456  }
   0xb   : > { %141 = sbr.rel (%p138_p6) target bundleno = 414 (0x19e), region = 32  ;;  %1704 = vmatprep.mubr.msk.bf16.mxu0 (!%p138_p6), %vm1078_vm0, %v2068_v0  ;;  %1706 = vmatprep.mubr.msk.bf16.mxu1 (!%p138_p6), %vm1078_vm0, %v2068_v0  ;;  %v2139_v60 = vld [vmem:[%s2285_s1] ss:$8 sps:$4 sm:$0xff] (!%p138_p6)   ;;  %s157_s7 = sand.u32 (!%p138_p6), 1, %s2004_s12  }
   0xc   : > { %1758 = vset.pattern.permute.xlu0 (!%p138_p6), %v2014_v39  ;;  %s1731_s8 = smul.u32 (!%p138_p6), 24, %s157_s7 }
   0xe   : > { %s159_s9 = scalar_lea.vmem (!%p138_p6), [#allocation2], %s1731_s8 }
  0x12   : > { %s161_s23 = scalar_select %p160_p7, %s2048_s15, 1 }
  0x13   : > { %s1730_s10 = smul.u32 (%p2060_p4), 12, %s2048_s15 }
  0x14   : > { %s1732_s24 = smul.u32 1200, %s161_s23 }
  0x15   : > { %s1452_s14 = scalar_lea.vmem (%p2060_p4), %s2287_s3, %s1730_s10 }
  0x16   : > { %s2078_s27 = scalar_lea.vmem %s2284_s0, %s1732_s24 }
  0x17   : > { %v1759_v1 = vld [vmem:[%s2078_s27 + $0x4] ss:$48 sps:$4 sm:$0xff]   ;;  %v1761_v2 = vld [vmem:[%s2078_s27 + $0xc] ss:$48 sps:$4 sm:$0xff]   ;;  %v1763_v3 = vld [vmem:[%s2078_s27] ss:$48 sps:$4 sm:$0xff]  }
  0x18   : > { %1119 = vmatprep.subr.bf16.mxu0 %v1759_v1  ;;  %v1764_v4 = vld [vmem:[%s2078_s27 + $0x8] ss:$48 sps:$4 sm:$0xff]   ;;  %1162 = vmatprep.subr.bf16.mxu1 %v1761_v2  ;;  %v1765_v5 = vld [vmem:[%s2078_s27 + $0x64] ss:$48 sps:$4 sm:$0xff]   ;;  %v1767_v6 = vld [vmem:[%s2078_s27 + $0x6c] ss:$48 sps:$4 sm:$0xff]  }
  0x19   : > { %1120 = vmatpush1.bf16.msra.mxu0 %v1763_v3  ;;  %1163 = vmatpush1.bf16.msra.mxu1 %v1764_v4  ;;  %v1769_v7 = vld [vmem:[%s2078_s27 + $0x60] ss:$48 sps:$4 sm:$0xff]   ;;  %v1770_v8 = vld [vmem:[%s2078_s27 + $0x68] ss:$48 sps:$4 sm:$0xff]   ;;  %v1771_v9 = vld [vmem:[%s2078_s27 + $0xc4] ss:$48 sps:$4 sm:$0xff]  }
  0x1a   : > { %1121 = vmatprep.subr.bf16.mxu0 %v1765_v5  ;;  %1164 = vmatprep.subr.bf16.mxu1 %v1767_v6  ;;  %v1773_v10 = vld [vmem:[%s2078_s27 + $0xcc] ss:$48 sps:$4 sm:$0xff]   ;;  %v1775_v11 = vld [vmem:[%s2078_s27 + $0xc0] ss:$48 sps:$4 sm:$0xff]   ;;  %v1776_v12 = vld [vmem:[%s2078_s27 + $0xc8] ss:$48 sps:$4 sm:$0xff]  }
  0x1b   : > { %v1777_v13 = vld [vmem:[%s2078_s27 + $0x124] ss:$48 sps:$4 sm:$0xff]   ;;  %v1779_v14 = vld [vmem:[%s2078_s27 + $0x12c] ss:$48 sps:$4 sm:$0xff]   ;;  %v1781_v15 = vld [vmem:[%s2078_s27 + $0x120] ss:$48 sps:$4 sm:$0xff]  }
  0x1c   : > { %v1782_v16 = vld [vmem:[%s2078_s27 + $0x128] ss:$48 sps:$4 sm:$0xff]   ;;  %v1783_v17 = vld [vmem:[%s2078_s27 + $0x184] ss:$48 sps:$4 sm:$0xff]   ;;  %v1785_v18 = vld [vmem:[%s2078_s27 + $0x18c] ss:$48 sps:$4 sm:$0xff]  }
  0x1d   : > { %1122 = vmatpush1.bf16.msra.mxu0 %v1769_v7  ;;  %1165 = vmatpush1.bf16.msra.mxu1 %v1770_v8  ;;  %v1787_v19 = vld [vmem:[%s2078_s27 + $0x180] ss:$48 sps:$4 sm:$0xff]   ;;  %v1788_v20 = vld [vmem:[%s2078_s27 + $0x188] ss:$48 sps:$4 sm:$0xff]   ;;  %v1789_v21 = vld [vmem:[%s2078_s27 + $0x1e4] ss:$48 sps:$4 sm:$0xff]  }
  0x1e   : > { %1123 = vmatprep.subr.bf16.mxu0 %v1771_v9  ;;  %1166 = vmatprep.subr.bf16.mxu1 %v1773_v10  ;;  %v1791_v22 = vld [vmem:[%s2078_s27 + $0x1ec] ss:$48 sps:$4 sm:$0xff]   ;;  %v1793_v23 = vld [vmem:[%s2078_s27 + $0x1e0] ss:$48 sps:$4 sm:$0xff]   ;;  %v1794_v24 = vld [vmem:[%s2078_s27 + $0x1e8] ss:$48 sps:$4 sm:$0xff]  }
  0x1f   : > { %v1795_v25 = vld [vmem:[%s2078_s27 + $0x244] ss:$48 sps:$4 sm:$0xff]   ;;  %v1797_v26 = vld [vmem:[%s2078_s27 + $0x24c] ss:$48 sps:$4 sm:$0xff]   ;;  %v1799_v27 = vld [vmem:[%s2078_s27 + $0x240] ss:$48 sps:$4 sm:$0xff]  }
  0x20   : > { %v1800_v28 = vld [vmem:[%s2078_s27 + $0x248] ss:$48 sps:$4 sm:$0xff]   ;;  %v1801_v29 = vld [vmem:[%s2078_s27 + $0x2a4] ss:$48 sps:$4 sm:$0xff]   ;;  %v1803_v30 = vld [vmem:[%s2078_s27 + $0x2ac] ss:$48 sps:$4 sm:$0xff]  }
  0x21   : > { %1124 = vmatpush1.bf16.msra.mxu0 %v1775_v11  ;;  %1167 = vmatpush1.bf16.msra.mxu1 %v1776_v12  ;;  %v1805_v31 = vld [vmem:[%s2078_s27 + $0x2a0] ss:$48 sps:$4 sm:$0xff]   ;;  %v1806_v32 = vld [vmem:[%s2078_s27 + $0x2a8] ss:$48 sps:$4 sm:$0xff]   ;;  %v1807_v33 = vld [vmem:[%s2078_s27 + $0x304] ss:$48 sps:$4 sm:$0xff]  }
  0x22   : > { %1125 = vmatprep.subr.bf16.mxu0 %v1777_v13  ;;  %1168 = vmatprep.subr.bf16.mxu1 %v1779_v14  ;;  %v1809_v34 = vld [vmem:[%s2078_s27 + $0x30c] ss:$48 sps:$4 sm:$0xff]   ;;  %v1811_v35 = vld [vmem:[%s2078_s27 + $0x300] ss:$48 sps:$4 sm:$0xff]   ;;  %v1812_v36 = vld [vmem:[%s2078_s27 + $0x308] ss:$48 sps:$4 sm:$0xff]  }
  0x23   : > { %v1813_v37 = vld [vmem:[%s2078_s27 + $0x364] ss:$48 sps:$4 sm:$0xff]   ;;  %v1815_v38 = vld [vmem:[%s2078_s27 + $0x36c] ss:$48 sps:$4 sm:$0xff]   ;;  %v1817_v40 = vld [vmem:[%s2078_s27 + $0x360] ss:$48 sps:$4 sm:$0xff]  }
  0x24   : > { %v1818_v41 = vld [vmem:[%s2078_s27 + $0x368] ss:$48 sps:$4 sm:$0xff]   ;;  %v1819_v42 = vld [vmem:[%s2078_s27 + $0x3c4] ss:$48 sps:$4 sm:$0xff]   ;;  %v1821_v43 = vld [vmem:[%s2078_s27 + $0x3cc] ss:$48 sps:$4 sm:$0xff]  }
  0x25   : > { %1126 = vmatpush1.bf16.msra.mxu0 %v1781_v15  ;;  %1169 = vmatpush1.bf16.msra.mxu1 %v1782_v16  ;;  %v1823_v44 = vld [vmem:[%s2078_s27 + $0x3c0] ss:$48 sps:$4 sm:$0xff]   ;;  %v1824_v45 = vld [vmem:[%s2078_s27 + $0x3c8] ss:$48 sps:$4 sm:$0xff]   ;;  %v1825_v46 = vld [vmem:[%s2078_s27 + $0x424] ss:$48 sps:$4 sm:$0xff]  }
  0x26   : > { %1127 = vmatprep.subr.bf16.mxu0 %v1783_v17  ;;  %1170 = vmatprep.subr.bf16.mxu1 %v1785_v18  ;;  %v1827_v47 = vld [vmem:[%s2078_s27 + $0x42c] ss:$48 sps:$4 sm:$0xff]   ;;  %v313_v48 = vld [vmem:[%s2078_s27 + $0x480] sm:$0xff]  ;;  %v1830_v51 = vld [vmem:[%s2078_s27 + $0x428] ss:$48 sps:$4 sm:$0xff]  }
  0x27   : > { %v314_v49 = vld [vmem:[%s2078_s27 + $0x488] sm:$0xff]  ;;  %v1829_v50 = vld [vmem:[%s2078_s27 + $0x420] ss:$48 sps:$4 sm:$0xff]   ;;  %v1692_v52 = vcombine.high %v313_v48, %v313_v48  ;;  %v1691_v54 = vcombine.low %v313_v48, %v313_v48  ;;  %v1840_v56 = vld [vmem:[%s2078_s27 + $0x14] ss:$48 sps:$4 sm:$0xff]  }
  0x28   : > { %v1694_v53 = vcombine.high %v314_v49, %v314_v49  ;;  %v1693_v55 = vcombine.low %v314_v49, %v314_v49  ;;  %v1843_v59 = vld [vmem:[%s2078_s27 + $0x1c] ss:$48 sps:$4 sm:$0xff]   ;;  %v1838_v61 = vld [vmem:[%s2078_s27 + $0x10] ss:$48 sps:$4 sm:$0xff]   ;;  %v1841_v62 = vld [vmem:[%s2078_s27 + $0x18] ss:$48 sps:$4 sm:$0xff]  }
  0x29   : > { %1128 = vmatpush1.bf16.msra.mxu0 %v1787_v19  ;;  %1171 = vmatpush1.bf16.msra.mxu1 %v1788_v20  ;;  %v1084_v57 = vsel %vm1082_vm1, %v1691_v54, 0  ;;  %v1846_v63 = vld [vmem:[%s2078_s27 + $0x74] ss:$48 sps:$4 sm:$0xff]   ;;  %v1849_v1 = vld [vmem:[%s2078_s27 + $0x7c] ss:$48 sps:$4 sm:$0xff]  }
  0x2a   : > { %1129 = vmatprep.subr.bf16.mxu0 %v1789_v21  ;;  %1172 = vmatprep.subr.bf16.mxu1 %v1791_v22  ;;  %v1090_v58 = vsel %vm1082_vm1, %v1693_v55, 0  ;;  %v1844_v2 = vld [vmem:[%s2078_s27 + $0x70] ss:$48 sps:$4 sm:$0xff]   ;;  %v1847_v3 = vld [vmem:[%s2078_s27 + $0x78] ss:$48 sps:$4 sm:$0xff]  }
  0x2b   : > { %v1852_v4 = vld [vmem:[%s2078_s27 + $0xd4] ss:$48 sps:$4 sm:$0xff]   ;;  %v1855_v5 = vld [vmem:[%s2078_s27 + $0xdc] ss:$48 sps:$4 sm:$0xff]   ;;  %v1850_v6 = vld [vmem:[%s2078_s27 + $0xd0] ss:$48 sps:$4 sm:$0xff]  }
  0x2c   : > { %v1853_v7 = vld [vmem:[%s2078_s27 + $0xd8] ss:$48 sps:$4 sm:$0xff]   ;;  %v1858_v8 = vld [vmem:[%s2078_s27 + $0x134] ss:$48 sps:$4 sm:$0xff]   ;;  %v1861_v9 = vld [vmem:[%s2078_s27 + $0x13c] ss:$48 sps:$4 sm:$0xff]  }
  0x2d   : > { %1130 = vmatpush1.bf16.msra.mxu0 %v1793_v23  ;;  %1173 = vmatpush1.bf16.msra.mxu1 %v1794_v24  ;;  %v1856_v10 = vld [vmem:[%s2078_s27 + $0x130] ss:$48 sps:$4 sm:$0xff]   ;;  %v1859_v11 = vld [vmem:[%s2078_s27 + $0x138] ss:$48 sps:$4 sm:$0xff]   ;;  %v1864_v12 = vld [vmem:[%s2078_s27 + $0x194] ss:$48 sps:$4 sm:$0xff]  }
  0x2e   : > { %1131 = vmatprep.subr.bf16.mxu0 %v1795_v25  ;;  %1174 = vmatprep.subr.bf16.mxu1 %v1797_v26  ;;  %v1867_v13 = vld [vmem:[%s2078_s27 + $0x19c] ss:$48 sps:$4 sm:$0xff]   ;;  %v1862_v14 = vld [vmem:[%s2078_s27 + $0x190] ss:$48 sps:$4 sm:$0xff]   ;;  %v1865_v15 = vld [vmem:[%s2078_s27 + $0x198] ss:$48 sps:$4 sm:$0xff]  }
  0x2f   : > { %v1870_v16 = vld [vmem:[%s2078_s27 + $0x1f4] ss:$48 sps:$4 sm:$0xff]   ;;  %v1873_v17 = vld [vmem:[%s2078_s27 + $0x1fc] ss:$48 sps:$4 sm:$0xff]   ;;  %v1868_v18 = vld [vmem:[%s2078_s27 + $0x1f0] ss:$48 sps:$4 sm:$0xff]  }
  0x30   : > { %v1871_v19 = vld [vmem:[%s2078_s27 + $0x1f8] ss:$48 sps:$4 sm:$0xff]   ;;  %v1876_v20 = vld [vmem:[%s2078_s27 + $0x254] ss:$48 sps:$4 sm:$0xff]   ;;  %v1879_v21 = vld [vmem:[%s2078_s27 + $0x25c] ss:$48 sps:$4 sm:$0xff]  }
  0x31   : > { %1132 = vmatpush1.bf16.msra.mxu0 %v1799_v27  ;;  %1175 = vmatpush1.bf16.msra.mxu1 %v1800_v28  ;;  %v1874_v22 = vld [vmem:[%s2078_s27 + $0x250] ss:$48 sps:$4 sm:$0xff]   ;;  %v1877_v23 = vld [vmem:[%s2078_s27 + $0x258] ss:$48 sps:$4 sm:$0xff]   ;;  %v1882_v24 = vld [vmem:[%s2078_s27 + $0x2b4] ss:$48 sps:$4 sm:$0xff]  }
  0x32   : > { %1133 = vmatprep.subr.bf16.mxu0 %v1801_v29  ;;  %1176 = vmatprep.subr.bf16.mxu1 %v1803_v30  ;;  %v1885_v25 = vld [vmem:[%s2078_s27 + $0x2bc] ss:$48 sps:$4 sm:$0xff]   ;;  %v1880_v26 = vld [vmem:[%s2078_s27 + $0x2b0] ss:$48 sps:$4 sm:$0xff]   ;;  %v1883_v27 = vld [vmem:[%s2078_s27 + $0x2b8] ss:$48 sps:$4 sm:$0xff]  }
  0x33   : > { %v1888_v28 = vld [vmem:[%s2078_s27 + $0x314] ss:$48 sps:$4 sm:$0xff]   ;;  %v1891_v29 = vld [vmem:[%s2078_s27 + $0x31c] ss:$48 sps:$4 sm:$0xff]   ;;  %v1886_v30 = vld [vmem:[%s2078_s27 + $0x310] ss:$48 sps:$4 sm:$0xff]  }
  0x34   : > { %v1901_v39 = vld [vmem:[%s2078_s27 + $0x3d8] ss:$48 sps:$4 sm:$0xff]   ;;  %v1916_v54 = vld [vmem:[%s2078_s27 + $0x24] ss:$48 sps:$4 sm:$0xff]   ;;  %v1919_v55 = vld [vmem:[%s2078_s27 + $0x2c] ss:$48 sps:$4 sm:$0xff]  }
  0x35   : > { %1134 = vmatpush1.bf16.msra.mxu0 %v1805_v31  ;;  %1177 = vmatpush1.bf16.msra.mxu1 %v1806_v32  ;;  %v1889_v31 = vld [vmem:[%s2078_s27 + $0x318] ss:$48 sps:$4 sm:$0xff]   ;;  %v1894_v32 = vld [vmem:[%s2078_s27 + $0x374] ss:$48 sps:$4 sm:$0xff]  }
  0x36   : > { %1135 = vmatprep.subr.bf16.mxu0 %v1807_v33  ;;  %1178 = vmatprep.subr.bf16.mxu1 %v1809_v34  ;;  %v1897_v33 = vld [vmem:[%s2078_s27 + $0x37c] ss:$48 sps:$4 sm:$0xff]   ;;  %v1892_v34 = vld [vmem:[%s2078_s27 + $0x370] ss:$48 sps:$4 sm:$0xff]  }
  0x39   : > { %1136 = vmatpush1.bf16.msra.mxu0 %v1811_v35  ;;  %1179 = vmatpush1.bf16.msra.mxu1 %v1812_v36  ;;  %v1895_v35 = vld [vmem:[%s2078_s27 + $0x378] ss:$48 sps:$4 sm:$0xff]   ;;  %v1900_v36 = vld [vmem:[%s2078_s27 + $0x3d4] ss:$48 sps:$4 sm:$0xff]  }
  0x3a   : > { %1137 = vmatprep.subr.bf16.mxu0 %v1813_v37  ;;  %1180 = vmatprep.subr.bf16.mxu1 %v1815_v38  ;;  %v1903_v37 = vld [vmem:[%s2078_s27 + $0x3dc] ss:$48 sps:$4 sm:$0xff]   ;;  %v1898_v38 = vld [vmem:[%s2078_s27 + $0x3d0] ss:$48 sps:$4 sm:$0xff]  }
  0x3d   : > { %1138 = vmatpush1.bf16.msra.mxu0 %v1817_v40  ;;  %1181 = vmatpush1.bf16.msra.mxu1 %v1818_v41  ;;  %v1906_v40 = vld [vmem:[%s2078_s27 + $0x434] ss:$48 sps:$4 sm:$0xff]   ;;  %v1909_v41 = vld [vmem:[%s2078_s27 + $0x43c] ss:$48 sps:$4 sm:$0xff]  }
  0x3e   : > { %1139 = vmatprep.subr.bf16.mxu0 %v1819_v42  ;;  %1182 = vmatprep.subr.bf16.mxu1 %v1821_v43  ;;  %v315_v42 = vld [vmem:[%s2078_s27 + $0x490] sm:$0xff]  ;;  %v316_v43 = vld [vmem:[%s2078_s27 + $0x498] sm:$0xff] }
  0x3f   : > { %v1695_v48 = vcombine.low %v315_v42, %v315_v42  ;;  %v1697_v49 = vcombine.low %v316_v43, %v316_v43 }
  0x41   : > { %1140 = vmatpush1.bf16.msra.mxu0 %v1823_v44  ;;  %1183 = vmatpush1.bf16.msra.mxu1 %v1824_v45  ;;  %v1904_v44 = vld [vmem:[%s2078_s27 + $0x430] ss:$48 sps:$4 sm:$0xff]   ;;  %v1907_v45 = vld [vmem:[%s2078_s27 + $0x438] ss:$48 sps:$4 sm:$0xff]  }
  0x42   : > { %1141 = vmatprep.subr.bf16.mxu0 %v1825_v46  ;;  %1184 = vmatprep.subr.bf16.mxu1 %v1827_v47  ;;  %v1696_v46 = vcombine.high %v315_v42, %v315_v42  ;;  %v1698_v47 = vcombine.high %v316_v43, %v316_v43 }
  0x45   : > { %1142 = vmatpush1.bf16.msra.mxu0 %v1829_v50  ;;  %1185 = vmatpush1.bf16.msra.mxu1 %v1830_v51  ;;  %v1395_v50 = vld [vmem:[%s2286_s2] sm:$0xff]  ;;  %v1396_v51 = vld [vmem:[%s2286_s2 + $0x8] sm:$0xff] }
  0x46   : > { %1703 = vmatprep.subr.msk.bf16.mxu0 %vm1082_vm1, %v1692_v52  ;;  %1705 = vmatprep.subr.msk.bf16.mxu1 %vm1082_vm1, %v1694_v53  ;;  %v1096_v52 = vsel %vm1082_vm1, %v1695_v48, 0  ;;  %v1102_v53 = vsel %vm1082_vm1, %v1697_v49, 0 }
  0x47   : > { %1399 = vperm.xlu0 %1758, %v1395_v50  }
  0x49   : > { %1144 = vmatpush1.bf16.msra.mxu0 %v1084_v57  ;;  %1187 = vmatpush1.bf16.msra.mxu1 %v1090_v58  ;;  %v1917_v57 = vld [vmem:[%s2078_s27 + $0x28] ss:$48 sps:$4 sm:$0xff]   ;;  %v1922_v58 = vld [vmem:[%s2078_s27 + $0x84] ss:$48 sps:$4 sm:$0xff]  }
  0x4a   : > { %1205 = vmatprep.subr.bf16.mxu0 %v1840_v56  ;;  %1248 = vmatprep.subr.bf16.mxu1 %v1843_v59  ;;  %v1914_v56 = vld [vmem:[%s2078_s27 + $0x20] ss:$48 sps:$4 sm:$0xff]   ;;  %v1925_v59 = vld [vmem:[%s2078_s27 + $0x8c] ss:$48 sps:$4 sm:$0xff]  }
  0x4b   : > { %1404 = vperm.xlu0 %1758, %v1396_v51  }
  0x4c   : > { %1152 = vmatmul.mubr.bf16.vlgmr.msra.gmra.mrb[0].mxu0 %v2139_v60  ;;  %1195 = vmatmul.mubr.bf16.vlgmr.msra.gmra.mrb[0].mxu1 %v2139_v60 }
  0x4d   : > { %1206 = vmatpush1.bf16.msra.mxu0 %v1838_v61  ;;  %1249 = vmatpush1.bf16.msra.mxu1 %v1841_v62  ;;  %v1920_v61 = vld [vmem:[%s2078_s27 + $0x80] ss:$48 sps:$4 sm:$0xff]   ;;  %v1923_v62 = vld [vmem:[%s2078_s27 + $0x88] ss:$48 sps:$4 sm:$0xff]  }
  0x4e   : > { %1207 = vmatprep.subr.bf16.mxu0 %v1846_v63  ;;  %1250 = vmatprep.subr.bf16.mxu1 %v1849_v1  ;;  %v1928_v63 = vld [vmem:[%s2078_s27 + $0xe4] ss:$48 sps:$4 sm:$0xff]   ;;  %v1931_v1 = vld [vmem:[%s2078_s27 + $0xec] ss:$48 sps:$4 sm:$0xff]  }
  0x4f   : > { %1708 = vmatprep.mubr.msk.bf16.mxu0 %vm1078_vm0, %v2068_v0  ;;  %1710 = vmatprep.mubr.msk.bf16.mxu1 %vm1078_vm0, %v2068_v0 }
  0x51   : > { %1208 = vmatpush1.bf16.msra.mxu0 %v1844_v2  ;;  %1251 = vmatpush1.bf16.msra.mxu1 %v1847_v3  ;;  %v1926_v2 = vld [vmem:[%s2078_s27 + $0xe0] ss:$48 sps:$4 sm:$0xff]   ;;  %v1929_v3 = vld [vmem:[%s2078_s27 + $0xe8] ss:$48 sps:$4 sm:$0xff]  }
  0x52   : > { %1209 = vmatprep.subr.bf16.mxu0 %v1852_v4  ;;  %1252 = vmatprep.subr.bf16.mxu1 %v1855_v5  ;;  %v1934_v4 = vld [vmem:[%s2078_s27 + $0x144] ss:$48 sps:$4 sm:$0xff]   ;;  %v1937_v5 = vld [vmem:[%s2078_s27 + $0x14c] ss:$48 sps:$4 sm:$0xff]  }
  0x55   : > { %1210 = vmatpush1.bf16.msra.mxu0 %v1850_v6  ;;  %1253 = vmatpush1.bf16.msra.mxu1 %v1853_v7  ;;  %v1932_v6 = vld [vmem:[%s2078_s27 + $0x140] ss:$48 sps:$4 sm:$0xff]   ;;  %v1935_v7 = vld [vmem:[%s2078_s27 + $0x148] ss:$48 sps:$4 sm:$0xff]  }
  0x56   : > { %1211 = vmatprep.subr.bf16.mxu0 %v1858_v8  ;;  %1254 = vmatprep.subr.bf16.mxu1 %v1861_v9  ;;  %v1943_v8 = vld [vmem:[%s2078_s27 + $0x1ac] ss:$48 sps:$4 sm:$0xff]   ;;  %v1938_v9 = vld [vmem:[%s2078_s27 + $0x1a0] ss:$48 sps:$4 sm:$0xff]  }
  0x59   : > { %1212 = vmatpush1.bf16.msra.mxu0 %v1856_v10  ;;  %1255 = vmatpush1.bf16.msra.mxu1 %v1859_v11  ;;  %v1941_v10 = vld [vmem:[%s2078_s27 + $0x1a8] ss:$48 sps:$4 sm:$0xff]   ;;  %v1946_v11 = vld [vmem:[%s2078_s27 + $0x204] ss:$48 sps:$4 sm:$0xff]  }
  0x5a   : > { %1213 = vmatprep.subr.bf16.mxu0 %v1864_v12  ;;  %1256 = vmatprep.subr.bf16.mxu1 %v1867_v13  ;;  %v1949_v12 = vld [vmem:[%s2078_s27 + $0x20c] ss:$48 sps:$4 sm:$0xff]   ;;  %v1944_v13 = vld [vmem:[%s2078_s27 + $0x200] ss:$48 sps:$4 sm:$0xff]  }
  0x5d   : > { %1214 = vmatpush1.bf16.msra.mxu0 %v1862_v14  ;;  %1257 = vmatpush1.bf16.msra.mxu1 %v1865_v15  ;;  %v1947_v14 = vld [vmem:[%s2078_s27 + $0x208] ss:$48 sps:$4 sm:$0xff]   ;;  %v1952_v15 = vld [vmem:[%s2078_s27 + $0x264] ss:$48 sps:$4 sm:$0xff]  }
  0x5e   : > { %1215 = vmatprep.subr.bf16.mxu0 %v1870_v16  ;;  %1258 = vmatprep.subr.bf16.mxu1 %v1873_v17  ;;  %v1955_v16 = vld [vmem:[%s2078_s27 + $0x26c] ss:$48 sps:$4 sm:$0xff]   ;;  %v1950_v17 = vld [vmem:[%s2078_s27 + $0x260] ss:$48 sps:$4 sm:$0xff]  }
  0x61   : > { %1216 = vmatpush1.bf16.msra.mxu0 %v1868_v18  ;;  %1259 = vmatpush1.bf16.msra.mxu1 %v1871_v19  ;;  %v1953_v18 = vld [vmem:[%s2078_s27 + $0x268] ss:$48 sps:$4 sm:$0xff]   ;;  %v1958_v19 = vld [vmem:[%s2078_s27 + $0x2c4] ss:$48 sps:$4 sm:$0xff]  }
  0x62   : > { %1217 = vmatprep.subr.bf16.mxu0 %v1876_v20  ;;  %1260 = vmatprep.subr.bf16.mxu1 %v1879_v21  ;;  %v1961_v20 = vld [vmem:[%s2078_s27 + $0x2cc] ss:$48 sps:$4 sm:$0xff]   ;;  %v1956_v21 = vld [vmem:[%s2078_s27 + $0x2c0] ss:$48 sps:$4 sm:$0xff]  }
  0x65   : > { %1218 = vmatpush1.bf16.msra.mxu0 %v1874_v22  ;;  %1261 = vmatpush1.bf16.msra.mxu1 %v1877_v23  ;;  %v1959_v22 = vld [vmem:[%s2078_s27 + $0x2c8] ss:$48 sps:$4 sm:$0xff]   ;;  %v1964_v23 = vld [vmem:[%s2078_s27 + $0x324] ss:$48 sps:$4 sm:$0xff]  }
  0x66   : > { %1219 = vmatprep.subr.bf16.mxu0 %v1882_v24  ;;  %1262 = vmatprep.subr.bf16.mxu1 %v1885_v25  ;;  %v1967_v24 = vld [vmem:[%s2078_s27 + $0x32c] ss:$48 sps:$4 sm:$0xff]   ;;  %v1962_v25 = vld [vmem:[%s2078_s27 + $0x320] ss:$48 sps:$4 sm:$0xff]  }
  0x69   : > { %1220 = vmatpush1.bf16.msra.mxu0 %v1880_v26  ;;  %1263 = vmatpush1.bf16.msra.mxu1 %v1883_v27  ;;  %v1965_v26 = vld [vmem:[%s2078_s27 + $0x328] ss:$48 sps:$4 sm:$0xff]   ;;  %v1970_v27 = vld [vmem:[%s2078_s27 + $0x384] ss:$48 sps:$4 sm:$0xff]  }
  0x6a   : > { %1221 = vmatprep.subr.bf16.mxu0 %v1888_v28  ;;  %1264 = vmatprep.subr.bf16.mxu1 %v1891_v29  ;;  %v1973_v28 = vld [vmem:[%s2078_s27 + $0x38c] ss:$48 sps:$4 sm:$0xff]   ;;  %v1968_v29 = vld [vmem:[%s2078_s27 + $0x380] ss:$48 sps:$4 sm:$0xff]  }
  0x6d   : > { %1222 = vmatpush1.bf16.msra.mxu0 %v1886_v30  ;;  %1265 = vmatpush1.bf16.msra.mxu1 %v1889_v31  ;;  %v1971_v30 = vld [vmem:[%s2078_s27 + $0x388] ss:$48 sps:$4 sm:$0xff]   ;;  %v1976_v31 = vld [vmem:[%s2078_s27 + $0x3e4] ss:$48 sps:$4 sm:$0xff]  }
  0x6e   : > { %1223 = vmatprep.subr.bf16.mxu0 %v1894_v32  ;;  %1266 = vmatprep.subr.bf16.mxu1 %v1897_v33  ;;  %v1979_v32 = vld [vmem:[%s2078_s27 + $0x3ec] ss:$48 sps:$4 sm:$0xff]   ;;  %v1974_v33 = vld [vmem:[%s2078_s27 + $0x3e0] ss:$48 sps:$4 sm:$0xff]  }
  0x71   : > { %1224 = vmatpush1.bf16.msra.mxu0 %v1892_v34  ;;  %1267 = vmatpush1.bf16.msra.mxu1 %v1895_v35  ;;  %v1977_v34 = vld [vmem:[%s2078_s27 + $0x3e8] ss:$48 sps:$4 sm:$0xff]   ;;  %v1982_v35 = vld [vmem:[%s2078_s27 + $0x444] ss:$48 sps:$4 sm:$0xff]  }
  0x72   : > { %1225 = vmatprep.subr.bf16.mxu0 %v1900_v36  ;;  %1268 = vmatprep.subr.bf16.mxu1 %v1903_v37  ;;  %v1985_v36 = vld [vmem:[%s2078_s27 + $0x44c] ss:$48 sps:$4 sm:$0xff]   ;;  %v317_v37 = vld [vmem:[%s2078_s27 + $0x4a0] sm:$0xff] }
  0x73   : > { %v1699_v43 = vcombine.low %v317_v37, %v317_v37 }
  0x75   : > { %1226 = vmatpush1.bf16.msra.mxu0 %v1898_v38  ;;  %1269 = vmatpush1.bf16.msra.mxu1 %v1901_v39  ;;  %v318_v38 = vld [vmem:[%s2078_s27 + $0x4a8] sm:$0xff]  ;;  %v1980_v39 = vld [vmem:[%s2078_s27 + $0x440] ss:$48 sps:$4 sm:$0xff]  }
  0x76   : > { %1227 = vmatprep.subr.bf16.mxu0 %v1906_v40  ;;  %1270 = vmatprep.subr.bf16.mxu1 %v1909_v41  ;;  %v1983_v40 = vld [vmem:[%s2078_s27 + $0x448] ss:$48 sps:$4 sm:$0xff]   ;;  %v1700_v41 = vcombine.high %v317_v37, %v317_v37  ;;  %v1702_v42 = vcombine.high %v318_v38, %v318_v38 }
  0x79   : > { %1228 = vmatpush1.bf16.msra.mxu0 %v1904_v44  ;;  %1271 = vmatpush1.bf16.msra.mxu1 %v1907_v45  ;;  %v1701_v44 = vcombine.low %v318_v38, %v318_v38  ;;  %v1108_v45 = vsel %vm1082_vm1, %v1699_v43, 0 }
  0x7a   : > { %1707 = vmatprep.subr.msk.bf16.mxu0 %vm1082_vm1, %v1696_v46  ;;  %1709 = vmatprep.subr.msk.bf16.mxu1 %vm1082_vm1, %v1698_v47 }
  0x7b   : > { %v1114_v46 = vsel %vm1082_vm1, %v1701_v44, 0 }
  0x7d   : > { %1230 = vmatpush1.bf16.msra.mxu0 %v1096_v52  ;;  %1273 = vmatpush1.bf16.msra.mxu1 %v1102_v53 }
  0x7e   : > { %1291 = vmatprep.subr.bf16.mxu0 %v1916_v54  ;;  %1334 = vmatprep.subr.bf16.mxu1 %v1919_v55 }
  0x80   : > { %1238 = vmatmul.mubr.bf16.vlgmr.msra.gmra.mrb[4].mxu0 %v2139_v60  ;;  %1281 = vmatmul.mubr.bf16.vlgmr.msra.gmra.mrb[4].mxu1 %v2139_v60 }
  0x81   : > { %1292 = vmatpush1.bf16.msra.mxu0 %v1914_v56  ;;  %1335 = vmatpush1.bf16.msra.mxu1 %v1917_v57 }
  0x82   : > { %1293 = vmatprep.subr.bf16.mxu0 %v1922_v58  ;;  %1336 = vmatprep.subr.bf16.mxu1 %v1925_v59 }
  0x83   : > { %1712 = vmatprep.mubr.msk.bf16.mxu0 %vm1078_vm0, %v2068_v0  ;;  %1714 = vmatprep.mubr.msk.bf16.mxu1 %vm1078_vm0, %v2068_v0  ;;  %v1940_v0 = vld [vmem:[%s2078_s27 + $0x1a4] ss:$48 sps:$4 sm:$0xff]  }
  0x85   : > { %1294 = vmatpush1.bf16.msra.mxu0 %v1920_v61  ;;  %1337 = vmatpush1.bf16.msra.mxu1 %v1923_v62 }
  0x86   : > { %1295 = vmatprep.subr.bf16.mxu0 %v1928_v63  ;;  %1338 = vmatprep.subr.bf16.mxu1 %v1931_v1 }
  0x89   : > { %1296 = vmatpush1.bf16.msra.mxu0 %v1926_v2  ;;  %1339 = vmatpush1.bf16.msra.mxu1 %v1929_v3 }
  0x8a   : > { %1297 = vmatprep.subr.bf16.mxu0 %v1934_v4  ;;  %1340 = vmatprep.subr.bf16.mxu1 %v1937_v5 }
  0x8d   : > { %1298 = vmatpush1.bf16.msra.mxu0 %v1932_v6  ;;  %1341 = vmatpush1.bf16.msra.mxu1 %v1935_v7 }
  0x8e   : > { %1299 = vmatprep.subr.bf16.mxu0 %v1940_v0  ;;  %1342 = vmatprep.subr.bf16.mxu1 %v1943_v8 }
  0x91   : > { %1300 = vmatpush1.bf16.msra.mxu0 %v1938_v9  ;;  %1343 = vmatpush1.bf16.msra.mxu1 %v1941_v10 }
  0x92   : > { %1301 = vmatprep.subr.bf16.mxu0 %v1946_v11  ;;  %1344 = vmatprep.subr.bf16.mxu1 %v1949_v12 }
  0x95   : > { %1302 = vmatpush1.bf16.msra.mxu0 %v1944_v13  ;;  %1345 = vmatpush1.bf16.msra.mxu1 %v1947_v14 }
  0x96   : > { %1303 = vmatprep.subr.bf16.mxu0 %v1952_v15  ;;  %1346 = vmatprep.subr.bf16.mxu1 %v1955_v16 }
  0x99   : > { %1304 = vmatpush1.bf16.msra.mxu0 %v1950_v17  ;;  %1347 = vmatpush1.bf16.msra.mxu1 %v1953_v18 }
  0x9a   : > { %1305 = vmatprep.subr.bf16.mxu0 %v1958_v19  ;;  %1348 = vmatprep.subr.bf16.mxu1 %v1961_v20 }
  0x9d   : > { %1306 = vmatpush1.bf16.msra.mxu0 %v1956_v21  ;;  %1349 = vmatpush1.bf16.msra.mxu1 %v1959_v22 }
  0x9e   : > { %1307 = vmatprep.subr.bf16.mxu0 %v1964_v23  ;;  %1350 = vmatprep.subr.bf16.mxu1 %v1967_v24 }
  0xa1   : > { %1308 = vmatpush1.bf16.msra.mxu0 %v1962_v25  ;;  %1351 = vmatpush1.bf16.msra.mxu1 %v1965_v26 }
  0xa2   : > { %1309 = vmatprep.subr.bf16.mxu0 %v1970_v27  ;;  %1352 = vmatprep.subr.bf16.mxu1 %v1973_v28 }
  0xa5   : > { %1310 = vmatpush1.bf16.msra.mxu0 %v1968_v29  ;;  %1353 = vmatpush1.bf16.msra.mxu1 %v1971_v30 }
  0xa6   : > { %1311 = vmatprep.subr.bf16.mxu0 %v1976_v31  ;;  %1354 = vmatprep.subr.bf16.mxu1 %v1979_v32 }
  0xa9   : > { %1312 = vmatpush1.bf16.msra.mxu0 %v1974_v33  ;;  %1355 = vmatpush1.bf16.msra.mxu1 %v1977_v34 }
  0xaa   : > { %1313 = vmatprep.subr.bf16.mxu0 %v1982_v35  ;;  %1356 = vmatprep.subr.bf16.mxu1 %v1985_v36 }
  0xad   : > { %1314 = vmatpush1.bf16.msra.mxu0 %v1980_v39  ;;  %1357 = vmatpush1.bf16.msra.mxu1 %v1983_v40 }
  0xae   : > { %1711 = vmatprep.subr.msk.bf16.mxu0 %vm1082_vm1, %v1700_v41  ;;  %1713 = vmatprep.subr.msk.bf16.mxu1 %vm1082_vm1, %v1702_v42 }
  0xb1   : > { %1316 = vmatpush1.bf16.msra.mxu0 %v1108_v45  ;;  %1359 = vmatpush1.bf16.msra.mxu1 %v1114_v46 }
  0xb4   : > { %1324 = vmatmul.mubr.bf16.vlgmr.msra.gmra.mrb[8].mxu0 %v2139_v60  ;;  %1367 = vmatmul.mubr.bf16.vlgmr.msra.gmra.mrb[8].mxu1 %v2139_v60 }
  0xc6   : > { %v1400_v6 = vpop.permute.xlu0 %1399 }
  0xca   : > { %v1405_v27 = vpop.permute.xlu0 %1404 }
 0x11f   : > { %v1153_v47 = vpop.f32.mrb[0].mxu0  ;;  %v1196_v48 = vpop.f32.mrb[0].mxu1 }
 0x120   : > { %v1155_v49 = vpop.f32.mrb[1].mxu0  ;;  %v1198_v50 = vpop.f32.mrb[1].mxu1 }
 0x121   : > { %v1377_v51 = vmax.f32 %v1153_v47, %v1198_v50  ;;  %v1157_v52 = vpop.f32.mrb[2].mxu0  ;;  %v1200_v53 = vpop.f32.mrb[2].mxu1 }
 0x122   : > { %v1159_v54 = vpop.f32.mrb[3].mxu0  ;;  %v1202_v55 = vpop.f32.mrb[3].mxu1 }
 0x123   : > { %v1380_v56 = vmax.f32 %v1157_v52, %v1202_v55 }
 0x153   : > { %v1239_v57 = vpop.f32.mrb[4].mxu0  ;;  %v1282_v58 = vpop.f32.mrb[4].mxu1 }
 0x154   : > { %v1378_v59 = vmax.f32 %v1155_v49, %v1239_v57  ;;  %v1241_v61 = vpop.f32.mrb[5].mxu0  ;;  %v1284_v62 = vpop.f32.mrb[5].mxu1 }
 0x155   : > { %v1379_v63 = vmax.f32 %v1196_v48, %v1241_v61  ;;  %v1243_v1 = vpop.f32.mrb[6].mxu0  ;;  %v1286_v2 = vpop.f32.mrb[6].mxu1 }
 0x156   : > { %v1381_v60 = vmax.f32 %v1159_v54, %v1243_v1  ;;  %v1245_v3 = vpop.f32.mrb[7].mxu0  ;;  %v1288_v4 = vpop.f32.mrb[7].mxu1 }
 0x157   : > { %v1382_v5 = vmax.f32 %v1200_v53, %v1245_v3 }
 0x187   : > { %v1325_v7 = vpop.f32.mrb[8].mxu0  ;;  %v1368_v0 = vpop.f32.mrb[8].mxu1 }
 0x188   : > { %v1384_v8 = vmax.f32 %v1284_v62, %v1368_v0  ;;  %v1327_v9 = vpop.f32.mrb[9].mxu0  ;;  %v1370_v10 = vpop.f32.mrb[9].mxu1 }
 0x189   : > { %v1383_v11 = vmax.f32 %v1282_v58, %v1327_v9  ;;  %v1385_v12 = vmax.f32 %v1325_v7, %v1370_v10  ;;  %v1329_v13 = vpop.f32.mrb[10].mxu0  ;;  %v1372_v14 = vpop.f32.mrb[10].mxu1 }
 0x18a   : > { %v1390_v15 = vmax.f32 %v1378_v59, %v1384_v8  ;;  %v1387_v16 = vmax.f32 %v1288_v4, %v1372_v14  ;;  %v1331_v17 = vpop.f32.mrb[11].mxu0  ;;  %v1374_v18 = vpop.f32.mrb[11].mxu1 }
 0x18b   : > { %v1389_v19 = vmax.f32 %v1377_v51, %v1383_v11  ;;  %v1391_v20 = vmax.f32 %v1379_v63, %v1385_v12  ;;  %v1386_v21 = vmax.f32 %v1286_v2, %v1331_v17  ;;  %v1388_v22 = vmax.f32 %v1329_v13, %v1374_v18 }
 0x18c   : > { %v1408_v23 = vadd.f32 %v1400_v6, %v1390_v15  ;;  %v1393_v24 = vmax.f32 %v1381_v60, %v1387_v16 }
 0x18d   : > { %v1407_v25 = vadd.f32 %v1400_v6, %v1389_v19  ;;  %v1409_v26 = vadd.f32 %v1400_v6, %v1391_v20  ;;  %v1392_v28 = vmax.f32 %v1380_v56, %v1386_v21  ;;  %v1394_v29 = vmax.f32 %v1382_v5, %v1388_v22 }
 0x18e   : > { %v1414_v30 = vmax.f32 %v1408_v23, 0.0  ;;  %v1411_v31 = vadd.f32 %v1405_v27, %v1393_v24 }
 0x18f   : > { %v1413_v32 = vmax.f32 %v1407_v25, 0.0  ;;  %v1415_v33 = vmax.f32 %v1409_v26, 0.0  ;;  %v1410_v34 = vadd.f32 %v1405_v27, %v1392_v28  ;;  %v1412_v35 = vadd.f32 %v1405_v27, %v1394_v29  ;;  %1449 = sbr.rel (!%p2060_p4) target bundleno = 414 (0x19e), region = 36 }
 0x190   : > { %v1417_v36 = vmax.f32 %v1411_v31, 0.0 }
 0x191   : > { %v1726_v37 = vpack.c.bf16 %v1414_v30, %v1413_v32  ;;  %v1727_v38 = vpack.c.bf16 %v1415_v33, %v1415_v33  ;;  %v1416_v39 = vmax.f32 %v1410_v34, 0.0  ;;  %v1418_v40 = vmax.f32 %v1412_v35, 0.0 }
 0x193   : > { %1439 = vst [vmem:[%s159_s9] sm:$0xff] %v1726_v37  ;;  %1440 = vst [vmem:[%s159_s9 + $0x8] sm:$0xf] %v1727_v38  ;;  %v1728_v41 = vpack.c.bf16 %v1417_v36, %v1416_v39  ;;  %v1729_v42 = vpack.c.bf16 %v1418_v40, %v1418_v40 }
 0x195   : > { %1441 = vst [vmem:[%s159_s9 + $0xc] sm:$0xff] %v1728_v41  ;;  %1442 = vst [vmem:[%s159_s9 + $0x14] sm:$0xf] %v1729_v42 }
 0x19a   : > { %v1467_v43 = vld [vmem:[%s159_s9] sm:$0xff]  ;;  %v1720_v45 = vld [vmem:[%s159_s9 + $0x8] sm:$0xf] }
 0x19b   : > { %1468 = vst [vmem:[%s1452_s14] sm:$0xff] %v1467_v43  ;;  %1721 = vst [vmem:[%s1452_s14 + $0x8] sm:$0xf] %v1720_v45 }
 0x19c   : > { %v1469_v44 = vld [vmem:[%s159_s9 + $0xc] sm:$0xff]  ;;  %v1722_v46 = vld [vmem:[%s159_s9 + $0x14] sm:$0xf] }
 0x19d   : > { %1470 = vst [vmem:[%s1452_s14 + $0x18] sm:$0xff] %v1469_v44  ;;  %1723 = vst [vmem:[%s1452_s14 + $0x20] sm:$0xf] %v1722_v46 }
 0x19e PF: > { %p10_p8 = scmp.ge.s32.totalorder %s2050_s16, 4   ;;  %s2289_s12 = smov %s2008_s13 }
 0x19f   : > { %s2290_s13 = smov %s2058_s19  ;;  %s2291_s14 = smov %s2050_s16 }
 0x1a0   :  { %12 = sbr.rel (!%p10_p8) target bundleno = 2 (0x2), region = 94 }

// kernel: qnetwork_forward.6
= control target key start
LH: loop header
LB: loop body
LE: loop exit
PB: predicated region body
PF: predicated region fallthrough
CT: control target
= control target key end

     0   :  { %v1260_v1 = vmov 0   ;;  %vm661_vm0 = vcmask 130048   ;;  %s1627_s0 = inlined_call_operand.vmem [shape: bf16[1,400,512], index: 0, kind: input, shape index: {}]   ;;  %s1628_s1 = inlined_call_operand.vmem [shape: bf16[32,400], index: 1, kind: input, shape index: {}]   ;;  %s1629_s2 = inlined_call_operand.vmem [shape: f32[32,1], index: 2, kind: input, shape index: {}]   ;;  %s1630_s3 = inlined_call_operand.vmem [shape: bf16[32,128], index: 3, kind: output, shape index: {}]  }
   0x1   :  { %v1098_v0 = vld [vmem:[%s1627_s0 + $0x4] ss:$16 sps:$4 sm:$0xff]   ;;  %1096 = vset.pattern.permute.xlu0 %v1260_v1  ;;  %1097 = vset.pattern.permute.xlu1 %v1260_v1  ;;  %v1100_v2 = vld [vmem:[%s1627_s0 + $0xc] ss:$16 sps:$4 sm:$0xff]   ;;  %v1102_v3 = vld [vmem:[%s1627_s0] ss:$16 sps:$4 sm:$0xff]  }
   0x2   :  { %668 = vmatprep.subr.bf16.mxu0 %v1098_v0  ;;  %v1103_v4 = vld [vmem:[%s1627_s0 + $0x8] ss:$16 sps:$4 sm:$0xff]   ;;  %774 = vmatprep.subr.bf16.mxu1 %v1100_v2  ;;  %v1104_v5 = vld [vmem:[%s1627_s0 + $0x24] ss:$16 sps:$4 sm:$0xff]   ;;  %v1106_v6 = vld [vmem:[%s1627_s0 + $0x2c] ss:$16 sps:$4 sm:$0xff]  }
   0x3   :  { %669 = vmatpush1.bf16.msra.mxu0 %v1102_v3  ;;  %775 = vmatpush1.bf16.msra.mxu1 %v1103_v4  ;;  %v1108_v7 = vld [vmem:[%s1627_s0 + $0x20] ss:$16 sps:$4 sm:$0xff]   ;;  %v1109_v8 = vld [vmem:[%s1627_s0 + $0x28] ss:$16 sps:$4 sm:$0xff]   ;;  %v1110_v9 = vld [vmem:[%s1627_s0 + $0x44] ss:$16 sps:$4 sm:$0xff]  }
   0x4   :  { %670 = vmatprep.subr.bf16.mxu0 %v1104_v5  ;;  %776 = vmatprep.subr.bf16.mxu1 %v1106_v6  ;;  %v1112_v10 = vld [vmem:[%s1627_s0 + $0x4c] ss:$16 sps:$4 sm:$0xff]   ;;  %v1114_v11 = vld [vmem:[%s1627_s0 + $0x40] ss:$16 sps:$4 sm:$0xff]   ;;  %v1115_v12 = vld [vmem:[%s1627_s0 + $0x48] ss:$16 sps:$4 sm:$0xff]  }
   0x5   :  { %v1116_v13 = vld [vmem:[%s1627_s0 + $0x64] ss:$16 sps:$4 sm:$0xff]   ;;  %v1118_v14 = vld [vmem:[%s1627_s0 + $0x6c] ss:$16 sps:$4 sm:$0xff]   ;;  %v1120_v15 = vld [vmem:[%s1627_s0 + $0x60] ss:$16 sps:$4 sm:$0xff]  }
   0x6   :  { %v1121_v16 = vld [vmem:[%s1627_s0 + $0x68] ss:$16 sps:$4 sm:$0xff]   ;;  %v1122_v17 = vld [vmem:[%s1627_s0 + $0x84] ss:$16 sps:$4 sm:$0xff]   ;;  %v1124_v18 = vld [vmem:[%s1627_s0 + $0x8c] ss:$16 sps:$4 sm:$0xff]  }
   0x7   :  { %671 = vmatpush1.bf16.msra.mxu0 %v1108_v7  ;;  %777 = vmatpush1.bf16.msra.mxu1 %v1109_v8  ;;  %v1126_v19 = vld [vmem:[%s1627_s0 + $0x80] ss:$16 sps:$4 sm:$0xff]   ;;  %v1127_v20 = vld [vmem:[%s1627_s0 + $0x88] ss:$16 sps:$4 sm:$0xff]   ;;  %v1128_v21 = vld [vmem:[%s1627_s0 + $0xa4] ss:$16 sps:$4 sm:$0xff]  }
   0x8   :  { %672 = vmatprep.subr.bf16.mxu0 %v1110_v9  ;;  %778 = vmatprep.subr.bf16.mxu1 %v1112_v10  ;;  %v1130_v22 = vld [vmem:[%s1627_s0 + $0xac] ss:$16 sps:$4 sm:$0xff]   ;;  %v1132_v23 = vld [vmem:[%s1627_s0 + $0xa0] ss:$16 sps:$4 sm:$0xff]   ;;  %v1133_v24 = vld [vmem:[%s1627_s0 + $0xa8] ss:$16 sps:$4 sm:$0xff]  }
   0x9   :  { %v1134_v25 = vld [vmem:[%s1627_s0 + $0xc4] ss:$16 sps:$4 sm:$0xff]   ;;  %v1136_v26 = vld [vmem:[%s1627_s0 + $0xcc] ss:$16 sps:$4 sm:$0xff]   ;;  %v1138_v27 = vld [vmem:[%s1627_s0 + $0xc0] ss:$16 sps:$4 sm:$0xff]  }
   0xa   :  { %v1139_v28 = vld [vmem:[%s1627_s0 + $0xc8] ss:$16 sps:$4 sm:$0xff]   ;;  %v1140_v29 = vld [vmem:[%s1627_s0 + $0xe4] ss:$16 sps:$4 sm:$0xff]   ;;  %v1142_v30 = vld [vmem:[%s1627_s0 + $0xec] ss:$16 sps:$4 sm:$0xff]  }
   0xb   :  { %673 = vmatpush1.bf16.msra.mxu0 %v1114_v11  ;;  %779 = vmatpush1.bf16.msra.mxu1 %v1115_v12  ;;  %v1144_v31 = vld [vmem:[%s1627_s0 + $0xe0] ss:$16 sps:$4 sm:$0xff]   ;;  %v1145_v32 = vld [vmem:[%s1627_s0 + $0xe8] ss:$16 sps:$4 sm:$0xff]   ;;  %v1146_v33 = vld [vmem:[%s1627_s0 + $0x104] ss:$16 sps:$4 sm:$0xff]  }
   0xc   :  { %674 = vmatprep.subr.bf16.mxu0 %v1116_v13  ;;  %780 = vmatprep.subr.bf16.mxu1 %v1118_v14  ;;  %v1148_v34 = vld [vmem:[%s1627_s0 + $0x10c] ss:$16 sps:$4 sm:$0xff]   ;;  %v1150_v35 = vld [vmem:[%s1627_s0 + $0x100] ss:$16 sps:$4 sm:$0xff]   ;;  %v1151_v36 = vld [vmem:[%s1627_s0 + $0x108] ss:$16 sps:$4 sm:$0xff]  }
   0xd   :  { %v1152_v37 = vld [vmem:[%s1627_s0 + $0x124] ss:$16 sps:$4 sm:$0xff]   ;;  %v1154_v38 = vld [vmem:[%s1627_s0 + $0x12c] ss:$16 sps:$4 sm:$0xff]   ;;  %v1156_v39 = vld [vmem:[%s1627_s0 + $0x120] ss:$16 sps:$4 sm:$0xff]  }
   0xe   :  { %v1157_v40 = vld [vmem:[%s1627_s0 + $0x128] ss:$16 sps:$4 sm:$0xff]   ;;  %v1158_v41 = vld [vmem:[%s1627_s0 + $0x144] ss:$16 sps:$4 sm:$0xff]   ;;  %v1160_v42 = vld [vmem:[%s1627_s0 + $0x14c] ss:$16 sps:$4 sm:$0xff]  }
   0xf   :  { %675 = vmatpush1.bf16.msra.mxu0 %v1120_v15  ;;  %781 = vmatpush1.bf16.msra.mxu1 %v1121_v16  ;;  %v1162_v43 = vld [vmem:[%s1627_s0 + $0x140] ss:$16 sps:$4 sm:$0xff]   ;;  %v1163_v44 = vld [vmem:[%s1627_s0 + $0x148] ss:$16 sps:$4 sm:$0xff]   ;;  %v1164_v45 = vld [vmem:[%s1627_s0 + $0x164] ss:$16 sps:$4 sm:$0xff]  }
  0x10   :  { %676 = vmatprep.subr.bf16.mxu0 %v1122_v17  ;;  %782 = vmatprep.subr.bf16.mxu1 %v1124_v18  ;;  %v1166_v46 = vld [vmem:[%s1627_s0 + $0x16c] ss:$16 sps:$4 sm:$0xff]   ;;  %v1168_v47 = vld [vmem:[%s1627_s0 + $0x160] ss:$16 sps:$4 sm:$0xff]   ;;  %v1169_v48 = vld [vmem:[%s1627_s0 + $0x168] ss:$16 sps:$4 sm:$0xff]  }
  0x11   :  { %v1196_v49 = vld [vmem:[%s1628_s1 + $0x4] ss:$16 sps:$4 sm:$0xff]   ;;  %v1172_v51 = vld [vmem:[%s1627_s0 + $0x18c] ss:$16 sps:$4 sm:$0xff]   ;;  %v1174_v52 = vld [vmem:[%s1627_s0 + $0x180] ss:$16 sps:$4 sm:$0xff]  }
  0x12   :  { %v1170_v50 = vld [vmem:[%s1627_s0 + $0x184] ss:$16 sps:$4 sm:$0xff]   ;;  %700 = vmatprep.mubr.bf16.mxu0 %v1196_v49  ;;  %806 = vmatprep.mubr.bf16.mxu1 %v1196_v49  ;;  %v1175_v53 = vld [vmem:[%s1627_s0 + $0x188] ss:$16 sps:$4 sm:$0xff]   ;;  %v1178_v55 = vld [vmem:[%s1627_s0 + $0x1ac] ss:$16 sps:$4 sm:$0xff]  }
  0x13   :  { %677 = vmatpush1.bf16.msra.mxu0 %v1126_v19  ;;  %783 = vmatpush1.bf16.msra.mxu1 %v1127_v20  ;;  %v1176_v54 = vld [vmem:[%s1627_s0 + $0x1a4] ss:$16 sps:$4 sm:$0xff]   ;;  %v1180_v56 = vld [vmem:[%s1627_s0 + $0x1a0] ss:$16 sps:$4 sm:$0xff]   ;;  %v1181_v57 = vld [vmem:[%s1627_s0 + $0x1a8] ss:$16 sps:$4 sm:$0xff]  }
  0x14   :  { %678 = vmatprep.subr.bf16.mxu0 %v1128_v21  ;;  %784 = vmatprep.subr.bf16.mxu1 %v1130_v22  ;;  %v1182_v58 = vld [vmem:[%s1627_s0 + $0x1c4] ss:$16 sps:$4 sm:$0xff]   ;;  %v1184_v59 = vld [vmem:[%s1627_s0 + $0x1cc] ss:$16 sps:$4 sm:$0xff]   ;;  %v1186_v60 = vld [vmem:[%s1627_s0 + $0x1c0] ss:$16 sps:$4 sm:$0xff]  }
  0x15   :  { %v1187_v61 = vld [vmem:[%s1627_s0 + $0x1c8] ss:$16 sps:$4 sm:$0xff]   ;;  %v1188_v62 = vld [vmem:[%s1627_s0 + $0x1e4] ss:$16 sps:$4 sm:$0xff]   ;;  %v1190_v63 = vld [vmem:[%s1627_s0 + $0x1ec] ss:$16 sps:$4 sm:$0xff]  }
  0x16   :  { %v1192_v0 = vld [vmem:[%s1627_s0 + $0x1e0] ss:$16 sps:$4 sm:$0xff]   ;;  %v1193_v1 = vld [vmem:[%s1627_s0 + $0x1e8] ss:$16 sps:$4 sm:$0xff]   ;;  %v1199_v2 = vld [vmem:[%s1627_s0 + $0x204] ss:$16 sps:$4 sm:$0xff]  }
  0x17   :  { %679 = vmatpush1.bf16.msra.mxu0 %v1132_v23  ;;  %785 = vmatpush1.bf16.msra.mxu1 %v1133_v24  ;;  %v1202_v3 = vld [vmem:[%s1627_s0 + $0x20c] ss:$16 sps:$4 sm:$0xff]   ;;  %v1194_v4 = vld [vmem:[%s1628_s1] ss:$16 sps:$4 sm:$0xff]   ;;  %v1200_v6 = vld [vmem:[%s1627_s0 + $0x208] ss:$16 sps:$4 sm:$0xff]  }
  0x18   :  { %680 = vmatprep.subr.bf16.mxu0 %v1134_v25  ;;  %786 = vmatprep.subr.bf16.mxu1 %v1136_v26  ;;  %v1197_v5 = vld [vmem:[%s1627_s0 + $0x200] ss:$16 sps:$4 sm:$0xff]   ;;  %v1205_v7 = vld [vmem:[%s1627_s0 + $0x224] ss:$16 sps:$4 sm:$0xff]   ;;  %v1208_v8 = vld [vmem:[%s1627_s0 + $0x22c] ss:$16 sps:$4 sm:$0xff]  }
  0x19   :  { %v1239_v9 = vld [vmem:[%s1628_s1 + $0x24] ss:$16 sps:$4 sm:$0xff]   ;;  %v1203_v10 = vld [vmem:[%s1627_s0 + $0x220] ss:$16 sps:$4 sm:$0xff]   ;;  %v1206_v11 = vld [vmem:[%s1627_s0 + $0x228] ss:$16 sps:$4 sm:$0xff]  }
  0x1a   :  { %v1211_v12 = vld [vmem:[%s1627_s0 + $0x244] ss:$16 sps:$4 sm:$0xff]   ;;  %v1214_v13 = vld [vmem:[%s1627_s0 + $0x24c] ss:$16 sps:$4 sm:$0xff]   ;;  %v1209_v14 = vld [vmem:[%s1627_s0 + $0x240] ss:$16 sps:$4 sm:$0xff]  }
  0x1b   :  { %681 = vmatpush1.bf16.msra.mxu0 %v1138_v27  ;;  %787 = vmatpush1.bf16.msra.mxu1 %v1139_v28  ;;  %v1241_v15 = vld [vmem:[%s1628_s1 + $0x20] ss:$16 sps:$4 sm:$0xff]   ;;  %v1212_v16 = vld [vmem:[%s1627_s0 + $0x248] ss:$16 sps:$4 sm:$0xff]   ;;  %v1217_v19 = vld [vmem:[%s1627_s0 + $0x264] ss:$16 sps:$4 sm:$0xff]  }
  0x1c   :  { %682 = vmatprep.subr.bf16.mxu0 %v1140_v29  ;;  %788 = vmatprep.subr.bf16.mxu1 %v1142_v30  ;;  %v892_v17 = vld [vmem:[%s1629_s2] sm:$0xff]  ;;  %v894_v18 = vld [vmem:[%s1629_s2 + $0x10] sm:$0xff]  ;;  %v1220_v20 = vld [vmem:[%s1627_s0 + $0x26c] ss:$16 sps:$4 sm:$0xff]  }
  0x1d   :  { %v1256_v21 = vld [vmem:[%s1628_s1 + $0xc] ss:$16 sps:$4 sm:$0xff]   ;;  %898 = vperm.xlu0 %1096, %v892_v17   ;;  %908 = vperm.xlu1 %1097, %v894_v18   ;;  %v1215_v22 = vld [vmem:[%s1627_s0 + $0x260] ss:$16 sps:$4 sm:$0xff]   ;;  %v1218_v23 = vld [vmem:[%s1627_s0 + $0x268] ss:$16 sps:$4 sm:$0xff]  }
  0x1e   :  { %v893_v24 = vld [vmem:[%s1629_s2 + $0x8] sm:$0xff]  ;;  %v895_v25 = vld [vmem:[%s1629_s2 + $0x18] sm:$0xff]  ;;  %v1223_v26 = vld [vmem:[%s1627_s0 + $0x284] ss:$16 sps:$4 sm:$0xff]  }
  0x1f   :  { %683 = vmatpush1.bf16.msra.mxu0 %v1144_v31  ;;  %789 = vmatpush1.bf16.msra.mxu1 %v1145_v32  ;;  %v1226_v27 = vld [vmem:[%s1627_s0 + $0x28c] ss:$16 sps:$4 sm:$0xff]   ;;  %v1221_v28 = vld [vmem:[%s1627_s0 + $0x280] ss:$16 sps:$4 sm:$0xff]   ;;  %v1224_v29 = vld [vmem:[%s1627_s0 + $0x288] ss:$16 sps:$4 sm:$0xff]  }
  0x20   :  { %684 = vmatprep.subr.bf16.mxu0 %v1146_v33  ;;  %790 = vmatprep.subr.bf16.mxu1 %v1148_v34  ;;  %v1229_v30 = vld [vmem:[%s1627_s0 + $0x2a4] ss:$16 sps:$4 sm:$0xff]   ;;  %v1232_v31 = vld [vmem:[%s1627_s0 + $0x2ac] ss:$16 sps:$4 sm:$0xff]   ;;  %v1227_v32 = vld [vmem:[%s1627_s0 + $0x2a0] ss:$16 sps:$4 sm:$0xff]  }
  0x21   :  { %903 = vperm.xlu0 %1096, %v893_v24   ;;  %913 = vperm.xlu1 %1097, %v895_v25   ;;  %v1230_v33 = vld [vmem:[%s1627_s0 + $0x2a8] ss:$16 sps:$4 sm:$0xff]   ;;  %v1235_v34 = vld [vmem:[%s1627_s0 + $0x2c4] ss:$16 sps:$4 sm:$0xff]  }
  0x23   :  { %685 = vmatpush1.bf16.msra.mxu0 %v1150_v35  ;;  %791 = vmatpush1.bf16.msra.mxu1 %v1151_v36  ;;  %v1238_v35 = vld [vmem:[%s1627_s0 + $0x2cc] ss:$16 sps:$4 sm:$0xff]   ;;  %v1233_v36 = vld [vmem:[%s1627_s0 + $0x2c0] ss:$16 sps:$4 sm:$0xff]  }
  0x24   :  { %686 = vmatprep.subr.bf16.mxu0 %v1152_v37  ;;  %792 = vmatprep.subr.bf16.mxu1 %v1154_v38  ;;  %v1236_v37 = vld [vmem:[%s1627_s0 + $0x2c8] ss:$16 sps:$4 sm:$0xff]   ;;  %v1244_v38 = vld [vmem:[%s1627_s0 + $0x2e4] ss:$16 sps:$4 sm:$0xff]  }
  0x27   :  { %687 = vmatpush1.bf16.msra.mxu0 %v1156_v39  ;;  %793 = vmatpush1.bf16.msra.mxu1 %v1157_v40  ;;  %v1247_v39 = vld [vmem:[%s1627_s0 + $0x2ec] ss:$16 sps:$4 sm:$0xff]   ;;  %v1242_v40 = vld [vmem:[%s1627_s0 + $0x2e0] ss:$16 sps:$4 sm:$0xff]  }
  0x28   :  { %688 = vmatprep.subr.bf16.mxu0 %v1158_v41  ;;  %794 = vmatprep.subr.bf16.mxu1 %v1160_v42  ;;  %v1245_v41 = vld [vmem:[%s1627_s0 + $0x2e8] ss:$16 sps:$4 sm:$0xff]   ;;  %v1250_v42 = vld [vmem:[%s1627_s0 + $0x304] ss:$16 sps:$4 sm:$0xff]  }
  0x2b   :  { %689 = vmatpush1.bf16.msra.mxu0 %v1162_v43  ;;  %795 = vmatpush1.bf16.msra.mxu1 %v1163_v44  ;;  %v1253_v43 = vld [vmem:[%s1627_s0 + $0x30c] ss:$16 sps:$4 sm:$0xff]   ;;  %v1248_v44 = vld [vmem:[%s1627_s0 + $0x300] ss:$16 sps:$4 sm:$0xff]  }
  0x2c   :  { %690 = vmatprep.subr.bf16.mxu0 %v1164_v45  ;;  %796 = vmatprep.subr.bf16.mxu1 %v1166_v46  ;;  %v1251_v45 = vld [vmem:[%s1627_s0 + $0x308] ss:$16 sps:$4 sm:$0xff]  }
  0x2d   :  { %v1254_v46 = vld [vmem:[%s1628_s1 + $0x8] ss:$16 sps:$4 sm:$0xff]  }
  0x2f   :  { %691 = vmatpush1.bf16.msra.mxu0 %v1168_v47  ;;  %797 = vmatpush1.bf16.msra.mxu1 %v1169_v48  ;;  %v1257_v47 = vld [vmem:[%s1628_s1 + $0x2c] ss:$16 sps:$4 sm:$0xff]   ;;  %v1259_v48 = vld [vmem:[%s1628_s1 + $0x28] ss:$16 sps:$4 sm:$0xff]  }
  0x30   :  { %692 = vmatprep.subr.bf16.mxu0 %v1170_v50  ;;  %798 = vmatprep.subr.bf16.mxu1 %v1172_v51 }
  0x33   :  { %693 = vmatpush1.bf16.msra.mxu0 %v1174_v52  ;;  %799 = vmatpush1.bf16.msra.mxu1 %v1175_v53 }
  0x34   :  { %694 = vmatprep.subr.bf16.mxu0 %v1176_v54  ;;  %800 = vmatprep.subr.bf16.mxu1 %v1178_v55 }
  0x37   :  { %695 = vmatpush1.bf16.msra.mxu0 %v1180_v56  ;;  %801 = vmatpush1.bf16.msra.mxu1 %v1181_v57 }
  0x38   :  { %696 = vmatprep.subr.bf16.mxu0 %v1182_v58  ;;  %802 = vmatprep.subr.bf16.mxu1 %v1184_v59 }
  0x3b   :  { %697 = vmatpush1.bf16.msra.mxu0 %v1186_v60  ;;  %803 = vmatpush1.bf16.msra.mxu1 %v1187_v61 }
  0x3c   :  { %698 = vmatprep.subr.bf16.mxu0 %v1188_v62  ;;  %804 = vmatprep.subr.bf16.mxu1 %v1190_v63 }
  0x3f   :  { %699 = vmatpush1.bf16.msra.mxu0 %v1192_v0  ;;  %805 = vmatpush1.bf16.msra.mxu1 %v1193_v1 }
  0x40   :  { %721 = vmatprep.subr.bf16.mxu0 %v1199_v2  ;;  %827 = vmatprep.subr.bf16.mxu1 %v1202_v3 }
  0x42   :  { %701 = vmatmul.mubr.bf16.vlgmr.msra.gmra.mrb[0].mxu0 %v1194_v4  ;;  %807 = vmatmul.mubr.bf16.vlgmr.msra.gmra.mrb[0].mxu1 %v1194_v4 }
  0x43   :  { %722 = vmatpush1.bf16.msra.mxu0 %v1197_v5  ;;  %828 = vmatpush1.bf16.msra.mxu1 %v1200_v6 }
  0x44   :  { %723 = vmatprep.subr.bf16.mxu0 %v1205_v7  ;;  %829 = vmatprep.subr.bf16.mxu1 %v1208_v8 }
  0x45   :  { %710 = vmatprep.mubr.bf16.mxu0 %v1239_v9  ;;  %816 = vmatprep.mubr.bf16.mxu1 %v1239_v9 }
  0x47   :  { %724 = vmatpush1.bf16.msra.mxu0 %v1203_v10  ;;  %830 = vmatpush1.bf16.msra.mxu1 %v1206_v11 }
  0x48   :  { %725 = vmatprep.subr.bf16.mxu0 %v1211_v12  ;;  %831 = vmatprep.subr.bf16.mxu1 %v1214_v13 }
  0x4a   :  { %711 = vmatmul.mubr.bf16.gmra.mrb[4].mxu0 %v1241_v15  ;;  %817 = vmatmul.mubr.bf16.gmra.mrb[4].mxu1 %v1241_v15 }
  0x4b   :  { %726 = vmatpush1.bf16.msra.mxu0 %v1209_v14  ;;  %832 = vmatpush1.bf16.msra.mxu1 %v1212_v16 }
  0x4c   :  { %727 = vmatprep.subr.bf16.mxu0 %v1217_v19  ;;  %833 = vmatprep.subr.bf16.mxu1 %v1220_v20 }
  0x4d   :  { %1056 = vmatprep.mubr.msk.bf16.mxu0 %vm661_vm0, %v1256_v21  ;;  %1058 = vmatprep.mubr.msk.bf16.mxu1 %vm661_vm0, %v1256_v21 }
  0x4f   :  { %728 = vmatpush1.bf16.msra.mxu0 %v1215_v22  ;;  %834 = vmatpush1.bf16.msra.mxu1 %v1218_v23 }
  0x50   :  { %729 = vmatprep.subr.bf16.mxu0 %v1223_v26  ;;  %835 = vmatprep.subr.bf16.mxu1 %v1226_v27 }
  0x53   :  { %730 = vmatpush1.bf16.msra.mxu0 %v1221_v28  ;;  %836 = vmatpush1.bf16.msra.mxu1 %v1224_v29 }
  0x54   :  { %731 = vmatprep.subr.bf16.mxu0 %v1229_v30  ;;  %837 = vmatprep.subr.bf16.mxu1 %v1232_v31 }
  0x57   :  { %732 = vmatpush1.bf16.msra.mxu0 %v1227_v32  ;;  %838 = vmatpush1.bf16.msra.mxu1 %v1230_v33 }
  0x58   :  { %733 = vmatprep.subr.bf16.mxu0 %v1235_v34  ;;  %839 = vmatprep.subr.bf16.mxu1 %v1238_v35 }
  0x5b   :  { %734 = vmatpush1.bf16.msra.mxu0 %v1233_v36  ;;  %840 = vmatpush1.bf16.msra.mxu1 %v1236_v37 }
  0x5c   :  { %735 = vmatprep.subr.bf16.mxu0 %v1244_v38  ;;  %841 = vmatprep.subr.bf16.mxu1 %v1247_v39 }
  0x5f   :  { %736 = vmatpush1.bf16.msra.mxu0 %v1242_v40  ;;  %842 = vmatpush1.bf16.msra.mxu1 %v1245_v41 }
  0x60   :  { %737 = vmatprep.subr.bf16.mxu0 %v1250_v42  ;;  %843 = vmatprep.subr.bf16.mxu1 %v1253_v43 }
  0x63   :  { %738 = vmatpush1.bf16.msra.mxu0 %v1248_v44  ;;  %844 = vmatpush1.bf16.msra.mxu1 %v1251_v45 }
  0x66   :  { %754 = vmatmul.mubr.bf16.vlgmr.msra.gmra.mrb[0].mxu0 %v1254_v46  ;;  %860 = vmatmul.mubr.bf16.vlgmr.msra.gmra.mrb[0].mxu1 %v1254_v46 }
  0x67   :  { %1057 = vmatprep.mubr.msk.bf16.mxu0 %vm661_vm0, %v1257_v47  ;;  %1059 = vmatprep.mubr.msk.bf16.mxu1 %vm661_vm0, %v1257_v47 }
  0x6e   :  { %764 = vmatmul.mubr.bf16.gmra.mrb[4].mxu0 %v1259_v48  ;;  %870 = vmatmul.mubr.bf16.gmra.mrb[4].mxu1 %v1259_v48 }
  0x9c   :  { %v899_v49 = vpop.permute.xlu0 %898  ;;  %v909_v2 = vpop.permute.xlu1 %908 }
  0xa0   :  { %v904_v63 = vpop.permute.xlu0 %903  ;;  %v914_v22 = vpop.permute.xlu1 %913 }
 0x139   :  { %v755_v50 = vpop.f32.mrb[0].mxu0  ;;  %v861_v51 = vpop.f32.mrb[0].mxu1 }
 0x13a   :  { %v757_v52 = vpop.f32.mrb[1].mxu0  ;;  %v863_v53 = vpop.f32.mrb[1].mxu1 }
 0x13b   :  { %v880_v54 = vmax.f32 %v755_v50, %v757_v52  ;;  %v884_v55 = vmax.f32 %v861_v51, %v863_v53  ;;  %v759_v56 = vpop.f32.mrb[2].mxu0  ;;  %v865_v57 = vpop.f32.mrb[2].mxu1 }
 0x13c   :  { %v761_v58 = vpop.f32.mrb[3].mxu0  ;;  %v867_v59 = vpop.f32.mrb[3].mxu1 }
 0x13d   :  { %v888_v60 = vmax.f32 %v880_v54, %v884_v55  ;;  %v881_v61 = vmax.f32 %v759_v56, %v761_v58  ;;  %v885_v62 = vmax.f32 %v865_v57, %v867_v59 }
 0x13f   :  { %v916_v0 = vadd.f32 %v899_v49, %v888_v60  ;;  %v889_v1 = vmax.f32 %v881_v61, %v885_v62 }
 0x141   :  { %v917_v3 = vadd.f32 %v904_v63, %v889_v1  ;;  %v765_v4 = vpop.f32.mrb[4].mxu0  ;;  %v871_v5 = vpop.f32.mrb[4].mxu1  ;;  %v920_v8 = vmax.f32 %v916_v0, 0.0 }
 0x142   :  { %v767_v6 = vpop.f32.mrb[5].mxu0  ;;  %v873_v7 = vpop.f32.mrb[5].mxu1 }
 0x143   :  { %v921_v9 = vmax.f32 %v917_v3, 0.0  ;;  %v882_v10 = vmax.f32 %v765_v4, %v767_v6  ;;  %v886_v11 = vmax.f32 %v871_v5, %v873_v7  ;;  %v769_v12 = vpop.f32.mrb[6].mxu0  ;;  %v875_v13 = vpop.f32.mrb[6].mxu1 }
 0x144   :  { %v771_v14 = vpop.f32.mrb[7].mxu0  ;;  %v877_v15 = vpop.f32.mrb[7].mxu1 }
 0x145   :  { %v1071_v16 = vpack.c.bf16 %v921_v9, %v920_v8  ;;  %v890_v17 = vmax.f32 %v882_v10, %v886_v11  ;;  %v883_v18 = vmax.f32 %v769_v12, %v771_v14  ;;  %v887_v19 = vmax.f32 %v875_v13, %v877_v15 }
 0x147   :  { %1072 = vst [vmem:[%s1630_s3] sm:$0xff] %v1071_v16   ;;  %v918_v20 = vadd.f32 %v909_v2, %v890_v17  ;;  %v891_v21 = vmax.f32 %v883_v18, %v887_v19 }
 0x149   :  { %v919_v23 = vadd.f32 %v914_v22, %v891_v21  ;;  %v922_v24 = vmax.f32 %v918_v20, 0.0 }
 0x14b   :  { %v923_v25 = vmax.f32 %v919_v23, 0.0 }
 0x14d   :  { %v1076_v26 = vpack.c.bf16 %v923_v25, %v922_v24 }
 0x14f   :  { %1078 = vst [vmem:[%s1630_s3 + $0x8] sm:$0xff] %v1076_v26  }

// kernel: qnetwork_forward.7
= control target key start
LH: loop header
LB: loop body
LE: loop exit
PB: predicated region body
PF: predicated region fallthrough
CT: control target
= control target key end

     0   :  { %v6165_v38 = vmov 0.0   ;;  %vm6166_vm0 = vmmov 0   ;;  %vm634_vm1 = vcmask 261120   ;;  %vm1179_vm2 = vcmask 523264   ;;  %s7806_s1 = inlined_call_operand.vmem [shape: bf16[800,64], index: 1, kind: input, shape index: {}]   ;;  %s7807_s0 = inlined_call_operand.vmem [shape: bf16[72,800], index: 0, kind: input, shape index: {}]   ;;  %s7808_s3 = inlined_call_operand.vmem [shape: bf16[9,64,1024], index: 3, kind: input, shape index: {}]   ;;  %s7809_s2 = inlined_call_operand.vmem [shape: f32[1,64], index: 2, kind: input, shape index: {}]   ;;  %s7810_s5 = inlined_call_operand.vmem [shape: bf16[1024,4], index: 5, kind: input, shape index: {}]   ;;  %s7811_s4 = inlined_call_operand.vmem [shape: f32[1,1024], index: 4, kind: input, shape index: {}]   ;;  %s7812_s6 = inlined_call_operand.vmem [shape: f32[1,4], index: 6, kind: input, shape index: {}]   ;;  %s7813_s7 = inlined_call_operand.vmem [shape: f32[8,4], index: 7, kind: output, shape index: {}]  }
   0x1   :  { %v6004_v0 = vld [vmem:[%s7806_s1 + $0x40] sm:$0xff]   ;;  %v6008_v4 = vld [vmem:[%s7806_s1 + $0x48] sm:$0xff]   ;;  %v6012_v8 = vld [vmem:[%s7806_s1 + $0x50] sm:$0xff]   ;;  %vm5002_vm3 = vcmask 31744  }
   0x2   :  { %v6005_v1 = vld [vmem:[%s7806_s1] sm:$0xff]   ;;  %5744 = vmatprep.subr.bf16.mxu0 %v6004_v0  ;;  %v6009_v5 = vld [vmem:[%s7806_s1 + $0x8] sm:$0xff]   ;;  %v6013_v9 = vld [vmem:[%s7806_s1 + $0x10] sm:$0xff]  }
   0x3   :  { %v6006_v2 = vld [vmem:[%s7806_s1 + $0xc0] sm:$0xff]   ;;  %5745 = vmatpush3.bf16.msra.mxu0 %v6005_v1  ;;  %v6010_v6 = vld [vmem:[%s7806_s1 + $0xc8] sm:$0xff]   ;;  %v6014_v10 = vld [vmem:[%s7806_s1 + $0xd0] sm:$0xff]  }
   0x4   :  { %v6007_v3 = vld [vmem:[%s7806_s1 + $0x80] sm:$0xff]   ;;  %5790 = vmatprep.subr.bf16.mxu1 %v6006_v2  ;;  %5746 = vmatprep.subr.bf16.mxu0 %v6008_v4  ;;  %v6011_v7 = vld [vmem:[%s7806_s1 + $0x88] sm:$0xff]   ;;  %v6015_v11 = vld [vmem:[%s7806_s1 + $0x90] sm:$0xff]  }
   0x5   :  { %5791 = vmatpush3.bf16.msra.mxu1 %v6007_v3  ;;  %v6016_v12 = vld [vmem:[%s7806_s1 + $0x58] sm:$0xff]   ;;  %v6020_v16 = vld [vmem:[%s7806_s1 + $0x60] sm:$0xff]   ;;  %v6024_v20 = vld [vmem:[%s7806_s1 + $0x68] sm:$0xff]  }
   0x6   :  { %5792 = vmatprep.subr.bf16.mxu1 %v6010_v6  ;;  %v6017_v13 = vld [vmem:[%s7806_s1 + $0x18] sm:$0xff]   ;;  %v6021_v17 = vld [vmem:[%s7806_s1 + $0x20] sm:$0xff]   ;;  %v6025_v21 = vld [vmem:[%s7806_s1 + $0x28] sm:$0xff]  }
   0x7   :  { %5747 = vmatpush3.bf16.msra.mxu0 %v6009_v5  ;;  %v6018_v14 = vld [vmem:[%s7806_s1 + $0xd8] sm:$0xff]   ;;  %v6022_v18 = vld [vmem:[%s7806_s1 + $0xe0] sm:$0xff]   ;;  %v6026_v22 = vld [vmem:[%s7806_s1 + $0xe8] sm:$0xff]  }
   0x8   :  { %5748 = vmatprep.subr.bf16.mxu0 %v6012_v8  ;;  %v6019_v15 = vld [vmem:[%s7806_s1 + $0x98] sm:$0xff]   ;;  %v6023_v19 = vld [vmem:[%s7806_s1 + $0xa0] sm:$0xff]   ;;  %v6027_v23 = vld [vmem:[%s7806_s1 + $0xa8] sm:$0xff]  }
   0x9   :  { %5793 = vmatpush3.bf16.msra.mxu1 %v6011_v7  ;;  %v6028_v24 = vld [vmem:[%s7806_s1 + $0x70] sm:$0xff]   ;;  %v6032_v28 = vld [vmem:[%s7806_s1 + $0x78] sm:$0xff]   ;;  %v6037_v32 = vld [vmem:[%s7807_s0 + $0x4] ss:$28 sps:$4 sm:$0xff]  }
   0xa   :  { %5794 = vmatprep.subr.bf16.mxu1 %v6014_v10  ;;  %v6029_v25 = vld [vmem:[%s7806_s1 + $0x30] sm:$0xff]   ;;  %v6033_v29 = vld [vmem:[%s7806_s1 + $0x38] sm:$0xff]   ;;  %682 = vmatprep.mubr.bf16.mxu0 %v6037_v32  ;;  %v6039_v34 = vld [vmem:[%s7806_s1 + $0x140] sm:$0xff]  }
   0xb   :  { %5749 = vmatpush3.bf16.msra.mxu0 %v6013_v9  ;;  %v6030_v26 = vld [vmem:[%s7806_s1 + $0xf0] sm:$0xff]   ;;  %v6034_v30 = vld [vmem:[%s7806_s1 + $0xf8] sm:$0xff]   ;;  %v6040_v35 = vld [vmem:[%s7807_s0 + $0x8] ss:$28 sps:$4 sm:$0xff]  }
   0xc   :  { %5750 = vmatprep.subr.bf16.mxu0 %v6016_v12  ;;  %v6031_v27 = vld [vmem:[%s7806_s1 + $0xb0] sm:$0xff]   ;;  %v6035_v31 = vld [vmem:[%s7807_s0] ss:$28 sps:$4 sm:$0xff]   ;;  %v6042_v36 = vld [vmem:[%s7807_s0 + $0xc] ss:$28 sps:$4 sm:$0xff]  }
   0xd   :  { %5795 = vmatpush3.bf16.msra.mxu1 %v6015_v11  ;;  %v6038_v33 = vld [vmem:[%s7806_s1 + $0xb8] sm:$0xff]   ;;  %v6043_v37 = vld [vmem:[%s7806_s1 + $0x100] sm:$0xff]   ;;  %754 = vmatprep.mubr.bf16.mxu1 %v6042_v36  ;;  %v6044_v39 = vld [vmem:[%s7806_s1 + $0x148] sm:$0xff]  }
   0xe   :  { %5796 = vmatprep.subr.bf16.mxu1 %v6018_v14  ;;  %v6045_v40 = vld [vmem:[%s7806_s1 + $0x108] sm:$0xff]   ;;  %v6046_v41 = vld [vmem:[%s7806_s1 + $0x180] sm:$0xff]   ;;  %v6047_v42 = vld [vmem:[%s7807_s0 + $0x3c] ss:$28 sps:$4 sm:$0xff]  }
   0xf   :  { %5751 = vmatpush3.bf16.msra.mxu0 %v6017_v13  ;;  %v6049_v43 = vld [vmem:[%s7807_s0 + $0x38] ss:$28 sps:$4 sm:$0xff]   ;;  %v6050_v44 = vld [vmem:[%s7807_s0 + $0x44] ss:$28 sps:$4 sm:$0xff]   ;;  %v6058_v50 = vld [vmem:[%s7807_s0 + $0x70] ss:$28 sps:$4 sm:$0xff]  }
  0x10   :  { %5752 = vmatprep.subr.bf16.mxu0 %v6020_v16  ;;  %v6052_v45 = vld [vmem:[%s7807_s0 + $0x40] ss:$28 sps:$4 sm:$0xff]   ;;  %v6053_v46 = vld [vmem:[%s7806_s1 + $0x150] sm:$0xff]   ;;  %v6065_v56 = vld [vmem:[%s7807_s0 + $0xac] ss:$28 sps:$4 sm:$0xff]  }
  0x11   :  { %5797 = vmatpush3.bf16.msra.mxu1 %v6019_v15  ;;  %v6054_v47 = vld [vmem:[%s7806_s1 + $0x110] sm:$0xff]   ;;  %v6057_v49 = vld [vmem:[%s7806_s1 + $0x158] sm:$0xff]   ;;  %v6063_v54 = vld [vmem:[%s7806_s1 + $0x160] sm:$0xff]  }
  0x12   :  { %5798 = vmatprep.subr.bf16.mxu1 %v6022_v18  ;;  %v6055_v48 = vld [vmem:[%s7807_s0 + $0x74] ss:$28 sps:$4 sm:$0xff]   ;;  %v6059_v51 = vld [vmem:[%s7806_s1 + $0x118] sm:$0xff]   ;;  %v6064_v55 = vld [vmem:[%s7806_s1 + $0x120] sm:$0xff]  }
  0x13   :  { %5753 = vmatpush3.bf16.msra.mxu0 %v6021_v17  ;;  %v6060_v52 = vld [vmem:[%s7807_s0 + $0x7c] ss:$28 sps:$4 sm:$0xff]   ;;  %v6068_v57 = vld [vmem:[%s7807_s0 + $0xb4] ss:$28 sps:$4 sm:$0xff]   ;;  %v6067_v58 = vld [vmem:[%s7807_s0 + $0xa8] ss:$28 sps:$4 sm:$0xff]  }
  0x14   :  { %5754 = vmatprep.subr.bf16.mxu0 %v6024_v20  ;;  %v6062_v53 = vld [vmem:[%s7807_s0 + $0x78] ss:$28 sps:$4 sm:$0xff]   ;;  %v6070_v59 = vld [vmem:[%s7806_s1 + $0x168] sm:$0xff]   ;;  %v59_v0 = vld [vmem:[%s7807_s0 + $0xe0] sm:$0xff] }
  0x15   :  { %5799 = vmatpush3.bf16.msra.mxu1 %v6023_v19  ;;  %v6072_v60 = vld [vmem:[%s7806_s1 + $0x128] sm:$0xff]   ;;  %v6074_v63 = vld [vmem:[%s7806_s1 + $0x170] sm:$0xff]   ;;  %v5038_v1 = vcombine.high %v59_v0, %v59_v0  ;;  %v6080_v5 = vld [vmem:[%s7806_s1 + $0x178] sm:$0xff]   ;;  %v5037_v7 = vcombine.low %v59_v0, %v59_v0 }
  0x16   :  { %5800 = vmatprep.subr.bf16.mxu1 %v6026_v22  ;;  %v6071_v61 = vld [vmem:[%s7807_s0 + $0xb0] ss:$28 sps:$4 sm:$0xff]   ;;  %v6081_v6 = vld [vmem:[%s7806_s1 + $0x138] sm:$0xff]   ;;  %v6088_v13 = vld [vmem:[%s7807_s0 + $0x48] ss:$28 sps:$4 sm:$0xff]  }
  0x17   :  { %5755 = vmatpush3.bf16.msra.mxu0 %v6025_v21  ;;  %v6073_v62 = vld [vmem:[%s7806_s1 + $0x188] sm:$0xff]   ;;  %v6076_v2 = vld [vmem:[%s7806_s1 + $0x130] sm:$0xff]   ;;  %v6090_v14 = vld [vmem:[%s7807_s0 + $0x84] ss:$28 sps:$4 sm:$0xff]  }
  0x18   :  { %5756 = vmatprep.subr.bf16.mxu0 %v6028_v24  ;;  %v60_v3 = vld [vmem:[%s7807_s0 + $0xe8] sm:$0xff]  ;;  %v6084_v8 = vld [vmem:[%s7807_s0 + $0x14] ss:$28 sps:$4 sm:$0xff]   ;;  %v6092_v16 = vld [vmem:[%s7807_s0 + $0x80] ss:$28 sps:$4 sm:$0xff]  }
  0x19   :  { %5801 = vmatpush3.bf16.msra.mxu1 %v6027_v23  ;;  %v5040_v4 = vcombine.high %v60_v3, %v60_v3  ;;  %v5039_v9 = vcombine.low %v60_v3, %v60_v3  ;;  %v6082_v10 = vld [vmem:[%s7807_s0 + $0x10] ss:$28 sps:$4 sm:$0xff]   ;;  %v6085_v12 = vld [vmem:[%s7807_s0 + $0x18] ss:$28 sps:$4 sm:$0xff]   ;;  %v6093_v18 = vld [vmem:[%s7807_s0 + $0x88] ss:$28 sps:$4 sm:$0xff]  }
  0x1a   :  { %5802 = vmatprep.subr.bf16.mxu1 %v6030_v26  ;;  %v6086_v11 = vld [vmem:[%s7807_s0 + $0x4c] ss:$28 sps:$4 sm:$0xff]   ;;  %v6094_v17 = vld [vmem:[%s7807_s0 + $0xbc] ss:$28 sps:$4 sm:$0xff]   ;;  %v61_v19 = vld [vmem:[%s7807_s0 + $0xf0] sm:$0xff] }
  0x1b   :  { %5757 = vmatpush3.bf16.msra.mxu0 %v6029_v25  ;;  %v6089_v15 = vld [vmem:[%s7807_s0 + $0x50] ss:$28 sps:$4 sm:$0xff]   ;;  %v6096_v20 = vld [vmem:[%s7807_s0 + $0xb8] ss:$28 sps:$4 sm:$0xff]   ;;  %v5042_v21 = vcombine.high %v61_v19, %v61_v19  ;;  %v6097_v22 = vld [vmem:[%s7807_s0 + $0xc0] ss:$28 sps:$4 sm:$0xff]   ;;  %v5041_v23 = vcombine.low %v61_v19, %v61_v19 }
  0x1c   :  { %5758 = vmatprep.subr.bf16.mxu0 %v6032_v28  ;;  %v6100_v24 = vld [vmem:[%s7807_s0 + $0xf8] ss:$0 sps:$4 sm:$0xff]   ;;  %v5099_v25 = vld [vmem:[%s7808_s3 + $0x100] sm:$0xff] }
  0x1d   :  { %5803 = vmatpush3.bf16.msra.mxu1 %v6031_v27  ;;  %v5103_v26 = vld [vmem:[%s7808_s3 + $0x120] sm:$0xff] }
  0x1e   :  { %5804 = vmatprep.subr.bf16.mxu1 %v6034_v30  ;;  %v5131_v27 = vcombine.low %v5099_v25, %v5103_v26  ;;  %v5132_v28 = vcombine.high %v5099_v25, %v5103_v26  ;;  %v5104_v30 = vld [vmem:[%s7808_s3 + $0x128] sm:$0xff]  ;;  %v6552_v3 = vld [vmem:[%s7809_s2] ss:$0 sm:$0xff] }
  0x1f   :  { %5759 = vmatpush3.bf16.msra.mxu0 %v6033_v29  ;;  %v5100_v29 = vld [vmem:[%s7808_s3 + $0x108] sm:$0xff] }
  0x20   :  { %5836 = vmatprep.subr.bf16.mxu0 %v6039_v34  ;;  %v5134_v32 = vcombine.high %v5100_v29, %v5104_v30  ;;  %v5111_v34 = vld [vmem:[%s7808_s3 + $0x160] sm:$0xff] }
  0x21   :  { %5805 = vmatpush3.bf16.msra.mxu1 %v6038_v33  ;;  %v5107_v33 = vld [vmem:[%s7808_s3 + $0x140] sm:$0xff] }
  0x22   :  { %683 = vmatmul.mubr.bf16.vlgmr.msra.gmra.mrb[0].mxu0 %v6035_v31  ;;  %5977 = vmatprep.subr.bf16.mxu1 %v6165_v38  ;;  %v5133_v31 = vcombine.low %v5100_v29, %v5104_v30  ;;  %v5140_v36 = vcombine.high %v5107_v33, %v5111_v34 }
  0x23   :  { %5837 = vmatpush3.bf16.msra.mxu0 %v6043_v37  ;;  %690 = vmatprep.mubr.bf16.mxu0 %v6047_v42  ;;  %v5108_v37 = vld [vmem:[%s7808_s3 + $0x148] sm:$0xff]  ;;  %v5119_v42 = vld [vmem:[%s7808_s3 + $0x1a0] sm:$0xff] }
  0x24   :  { %755 = vmatmul.mubr.bf16.vlgmr.msra.gmra.mrb[0].mxu1 %v6040_v35  ;;  %5838 = vmatprep.subr.bf16.mxu0 %v6044_v39  ;;  %v5139_v35 = vcombine.low %v5107_v33, %v5111_v34 }
  0x25   :  { %5978 = vmatpush3.bf16.msra.mxu1 %v6046_v41  ;;  %762 = vmatprep.mubr.bf16.mxu1 %v6050_v44  ;;  %v5115_v41 = vld [vmem:[%s7808_s3 + $0x180] sm:$0xff] }
  0x26   :  { %5979 = vmatprep.subr.bf16.mxu1 %v6165_v38  ;;  %v5147_v44 = vcombine.low %v5115_v41, %v5119_v42 }
  0x27   :  { %5839 = vmatpush3.bf16.msra.mxu0 %v6045_v40 }
  0x28   :  { %5840 = vmatprep.subr.bf16.mxu0 %v6053_v46  ;;  %v5120_v46 = vld [vmem:[%s7808_s3 + $0x1a8] sm:$0xff] }
  0x29   :  { %5980 = vmatpush3.bf16.msra.mxu1 %v6073_v62 }
  0x2a   :  { %691 = vmatmul.mubr.bf16.gmra.mrb[4].mxu0 %v6049_v43  ;;  %1224 = vmatprep.subr.bf16.mxu1 %v5134_v32  ;;  %v5116_v43 = vld [vmem:[%s7808_s3 + $0x188] sm:$0xff] }
  0x2b   :  { %5841 = vmatpush3.bf16.msra.mxu0 %v6054_v47  ;;  %698 = vmatprep.mubr.bf16.mxu0 %v6055_v48  ;;  %v5149_v47 = vcombine.low %v5116_v43, %v5120_v46  ;;  %v5150_v48 = vcombine.high %v5116_v43, %v5120_v46 }
  0x2c   :  { %763 = vmatmul.mubr.bf16.gmra.mrb[4].mxu1 %v6052_v45  ;;  %5842 = vmatprep.subr.bf16.mxu0 %v6057_v49  ;;  %v5148_v45 = vcombine.high %v5115_v41, %v5119_v42  ;;  %v5123_v49 = vld [vmem:[%s7808_s3 + $0x1c0] sm:$0xff] }
  0x2d   :  { %770 = vmatprep.mubr.bf16.mxu1 %v6060_v52 }
  0x2f   :  { %5843 = vmatpush3.bf16.msra.mxu0 %v6059_v51  ;;  %v5124_v51 = vld [vmem:[%s7808_s3 + $0x1c8] sm:$0xff] }
  0x30   :  { %5844 = vmatprep.subr.bf16.mxu0 %v6063_v54 }
  0x32   :  { %699 = vmatmul.mubr.bf16.gmra.mrb[8].mxu0 %v6058_v50  ;;  %v5127_v50 = vld [vmem:[%s7808_s3 + $0x1e0] sm:$0xff] }
  0x33   :  { %706 = vmatprep.mubr.bf16.mxu0 %v6065_v56  ;;  %5845 = vmatpush3.bf16.msra.mxu0 %v6064_v55  ;;  %v5156_v52 = vcombine.high %v5123_v49, %v5127_v50  ;;  %v5155_v54 = vcombine.low %v5123_v49, %v5127_v50 }
  0x34   :  { %771 = vmatmul.mubr.bf16.gmra.mrb[8].mxu1 %v6062_v53  ;;  %5846 = vmatprep.subr.bf16.mxu0 %v6070_v59  ;;  %v5128_v53 = vld [vmem:[%s7808_s3 + $0x1e8] sm:$0xff]  ;;  %v6532_v59 = vld [vmem:[%s7808_s3 + $0x118] sm:$0xff] }
  0x35   :  { %778 = vmatprep.mubr.bf16.mxu1 %v6068_v57  ;;  %v5157_v55 = vcombine.low %v5124_v51, %v5128_v53  ;;  %v5158_v56 = vcombine.high %v5124_v51, %v5128_v53  ;;  %v6522_v57 = vld [vmem:[%s7808_s3 + $0x110] sm:$0xff] }
  0x37   :  { %5847 = vmatpush3.bf16.msra.mxu0 %v6072_v60 }
  0x38   :  { %5848 = vmatprep.subr.bf16.mxu0 %v6074_v63 }
  0x3a   :  { %707 = vmatmul.mubr.bf16.gmra.mrb[12].mxu0 %v6067_v58  ;;  %v6527_v58 = vld [vmem:[%s7808_s3 + $0x130] sm:$0xff] }
  0x3b   :  { %714 = vmatprep.mubr.bf16.mxu0 %v5038_v1  ;;  %5849 = vmatpush3.bf16.msra.mxu0 %v6076_v2  ;;  %v5136_v60 = vcombine.high %v6522_v57, %v6527_v58  ;;  %v5135_v62 = vcombine.low %v6522_v57, %v6527_v58  ;;  %v6167_v1 = vmov 0   ;;  %v5125_v57 = vld [vmem:[%s7808_s3 + $0x1d0] sm:$0xff] }
  0x3c   :  { %779 = vmatmul.mubr.bf16.gmra.mrb[12].mxu1 %v6071_v61  ;;  %5850 = vmatprep.subr.bf16.mxu0 %v6080_v5  ;;  %v6539_v61 = vld [vmem:[%s7808_s3 + $0x138] sm:$0xff]  ;;  %v5129_v58 = vld [vmem:[%s7808_s3 + $0x1f0] sm:$0xff] }
  0x3d   :  { %786 = vmatprep.mubr.bf16.mxu1 %v5040_v4  ;;  %v5137_v63 = vcombine.low %v6532_v59, %v6539_v61  ;;  %v5138_v0 = vcombine.high %v6532_v59, %v6539_v61 }
  0x3f   :  { %5851 = vmatpush3.bf16.msra.mxu0 %v6081_v6 }
  0x40   :  { %1183 = vmatprep.subr.bf16.mxu0 %v5132_v28 }
  0x42   :  { %715 = vmatmul.mubr.bf16.gmra.mrb[16].mxu0 %v5037_v7 }
  0x43   :  { %826 = vmatprep.mubr.bf16.mxu0 %v6084_v8 }
  0x44   :  { %787 = vmatmul.mubr.bf16.gmra.mrb[16].mxu1 %v5039_v9 }
  0x45   :  { %5981 = vmatprep.mubr.msk.bf16.mxu1 %vm6166_vm0, %v6165_v38 }
  0x4a   :  { %827 = vmatmul.mubr.bf16.vlgmr.msra.gmra.mrb[20].mxu0 %v6082_v10 }
  0x4b   :  { %834 = vmatprep.mubr.bf16.mxu0 %v6086_v11  ;;  %1184 = vmatpush1.bf16.msra.mxu0 %v5131_v27 }
  0x4c   :  { %5982 = vmatmul.mubr.msk.bf16.vlgmr.msra.gmra.mrb[20].mxu1 %vm634_vm1, %v6085_v12  ;;  %1185 = vmatprep.subr.bf16.mxu0 %v5140_v36 }
  0x4d   :  { %5985 = vmatprep.mubr.msk.bf16.mxu1 %vm6166_vm0, %v6165_v38  ;;  %1225 = vmatpush1.bf16.msra.mxu1 %v5133_v31 }
  0x4f   :  { %1186 = vmatpush1.bf16.msra.mxu0 %v5139_v35 }
  0x50   :  { %1187 = vmatprep.subr.bf16.mxu0 %v5148_v45 }
  0x52   :  { %835 = vmatmul.mubr.bf16.gmra.mrb[24].mxu0 %v6088_v13 }
  0x53   :  { %842 = vmatprep.mubr.bf16.mxu0 %v6090_v14  ;;  %1188 = vmatpush1.bf16.msra.mxu0 %v5147_v44 }
  0x54   :  { %5986 = vmatmul.mubr.msk.bf16.gmra.mrb[24].mxu1 %vm634_vm1, %v6089_v15  ;;  %1189 = vmatprep.subr.bf16.mxu0 %v5156_v52 }
  0x55   :  { %5989 = vmatprep.mubr.msk.bf16.mxu1 %vm6166_vm0, %v6165_v38 }
  0x57   :  { %1190 = vmatpush1.bf16.msra.mxu0 %v5155_v54 }
  0x58   :  { %1265 = vmatprep.subr.bf16.mxu0 %v5136_v60 }
  0x5a   :  { %843 = vmatmul.mubr.bf16.gmra.mrb[28].mxu0 %v6092_v16 }
  0x5b   :  { %850 = vmatprep.mubr.bf16.mxu0 %v6094_v17 }
  0x5c   :  { %5990 = vmatmul.mubr.msk.bf16.gmra.mrb[28].mxu1 %vm634_vm1, %v6093_v18 }
  0x5d   :  { %5993 = vmatprep.mubr.msk.bf16.mxu1 %vm6166_vm0, %v6165_v38 }
  0x62   :  { %851 = vmatmul.mubr.bf16.gmra.mrb[32].mxu0 %v6096_v20 }
  0x63   :  { %858 = vmatprep.mubr.bf16.mxu0 %v5042_v21 }
  0x64   :  { %5994 = vmatmul.mubr.msk.bf16.gmra.mrb[32].mxu1 %vm634_vm1, %v6097_v22 }
  0x65   :  { %5997 = vmatprep.mubr.msk.bf16.mxu1 %vm6166_vm0, %v6165_v38  ;;  %v5112_v38 = vld [vmem:[%s7808_s3 + $0x168] sm:$0xff] }
  0x66   :  { %v5141_v39 = vcombine.low %v5108_v37, %v5112_v38  ;;  %v5142_v40 = vcombine.high %v5108_v37, %v5112_v38 }
  0x68   :  { %1226 = vmatprep.subr.bf16.mxu1 %v5142_v40 }
  0x69   :  { %1227 = vmatpush1.bf16.msra.mxu1 %v5141_v39 }
  0x6a   :  { %859 = vmatmul.mubr.bf16.gmra.mrb[36].mxu0 %v5041_v23  ;;  %1228 = vmatprep.subr.bf16.mxu1 %v5150_v48 }
  0x6b   :  { %1215 = vmatprep.mubr.bf16.mxu0 %v6167_v1 }
  0x6c   :  { %5998 = vmatmul.mubr.msk.bf16.gmra.mrb[36].mxu1 %vm634_vm1, %v6100_v24 }
  0x6d   :  { %1229 = vmatpush1.bf16.msra.mxu1 %v5149_v47  ;;  %1256 = vmatprep.mubr.bf16.mxu1 %v6167_v1 }
  0x6e   :  { %1230 = vmatprep.subr.bf16.mxu1 %v5158_v56 }
  0x71   :  { %1231 = vmatpush1.bf16.msra.mxu1 %v5157_v55 }
  0x72   :  { %1306 = vmatprep.subr.bf16.mxu1 %v5138_v0 }
  0xf5   :  { %v5760_v2 = vpop.f32.mrb[0].mxu0 }
  0xf6   :  { %v5761_v4 = vpop.f32.mrb[1].mxu0 }
  0xf7   :  { %v5762_v5 = vadd.f32 %v5761_v4, %v5760_v2  ;;  %v5763_v6 = vpop.f32.mrb[2].mxu0  ;;  %v5806_v7 = vpop.f32.mrb[0].mxu1 }
  0xf8   :  { %v5764_v8 = vpop.f32.mrb[3].mxu0  ;;  %v5807_v11 = vpop.f32.mrb[1].mxu1 }
  0xf9   :  { %v685_v9 = vadd.f32 %v5762_v5, %v6552_v3  ;;  %v5765_v10 = vadd.f32 %v5764_v8, %v5763_v6  ;;  %v5808_v12 = vadd.f32 %v5807_v11, %v5806_v7  ;;  %v5809_v13 = vpop.f32.mrb[2].mxu1 }
  0xfa   :  { %v5810_v15 = vpop.f32.mrb[3].mxu1 }
  0xfb   :  { %v688_v14 = vadd.f32 %v5765_v10, %v6552_v3  ;;  %v6556_v16 = vadd.f32 %v5808_v12, %v685_v9  ;;  %v5811_v17 = vadd.f32 %v5810_v15, %v5809_v13 }
  0xfd   :  { %v5766_v18 = vpop.f32.mrb[4].mxu0  ;;  %v6558_v19 = vadd.f32 %v5811_v17, %v688_v14 }
  0xfe   :  { %v5767_v20 = vpop.f32.mrb[5].mxu0 }
  0xff   :  { %v5768_v21 = vadd.f32 %v5767_v20, %v5766_v18  ;;  %v5769_v22 = vpop.f32.mrb[6].mxu0  ;;  %v5812_v23 = vpop.f32.mrb[4].mxu1 }
 0x100   :  { %v5770_v24 = vpop.f32.mrb[7].mxu0  ;;  %v5813_v27 = vpop.f32.mrb[5].mxu1 }
 0x101   :  { %v693_v25 = vadd.f32 %v5768_v21, %v6552_v3  ;;  %v5771_v26 = vadd.f32 %v5770_v24, %v5769_v22  ;;  %v5814_v28 = vadd.f32 %v5813_v27, %v5812_v23  ;;  %v5815_v29 = vpop.f32.mrb[6].mxu1 }
 0x102   :  { %v5816_v31 = vpop.f32.mrb[7].mxu1 }
 0x103   :  { %v696_v30 = vadd.f32 %v5771_v26, %v6552_v3  ;;  %v6562_v32 = vadd.f32 %v5814_v28, %v693_v25  ;;  %v5817_v33 = vadd.f32 %v5816_v31, %v5815_v29 }
 0x105   :  { %v5772_v34 = vpop.f32.mrb[8].mxu0  ;;  %v6564_v35 = vadd.f32 %v5817_v33, %v696_v30 }
 0x106   :  { %v5773_v36 = vpop.f32.mrb[9].mxu0 }
 0x107   :  { %v5774_v37 = vadd.f32 %v5773_v36, %v5772_v34  ;;  %v5775_v38 = vpop.f32.mrb[10].mxu0  ;;  %v5818_v39 = vpop.f32.mrb[8].mxu1 }
 0x108   :  { %v5776_v40 = vpop.f32.mrb[11].mxu0  ;;  %v5819_v43 = vpop.f32.mrb[9].mxu1 }
 0x109   :  { %v701_v41 = vadd.f32 %v5774_v37, %v6552_v3  ;;  %v5777_v42 = vadd.f32 %v5776_v40, %v5775_v38  ;;  %v5820_v44 = vadd.f32 %v5819_v43, %v5818_v39  ;;  %v5821_v45 = vpop.f32.mrb[10].mxu1 }
 0x10a   :  { %v5822_v47 = vpop.f32.mrb[11].mxu1 }
 0x10b   :  { %v704_v46 = vadd.f32 %v5777_v42, %v6552_v3  ;;  %v6568_v48 = vadd.f32 %v5820_v44, %v701_v41  ;;  %v5823_v49 = vadd.f32 %v5822_v47, %v5821_v45 }
 0x10d   :  { %v5778_v50 = vpop.f32.mrb[12].mxu0  ;;  %v6570_v51 = vadd.f32 %v5823_v49, %v704_v46  ;;  %v5109_v46 = vld [vmem:[%s7808_s3 + $0x150] sm:$0xff] }
 0x10e   :  { %v5779_v52 = vpop.f32.mrb[13].mxu0 }
 0x10f   :  { %v5780_v53 = vadd.f32 %v5779_v52, %v5778_v50  ;;  %v5781_v54 = vpop.f32.mrb[14].mxu0  ;;  %v5824_v55 = vpop.f32.mrb[12].mxu1  ;;  %v5114_v50 = vld [vmem:[%s7808_s3 + $0x178] sm:$0xff] }
 0x110   :  { %v5782_v56 = vpop.f32.mrb[15].mxu0  ;;  %v5825_v2 = vpop.f32.mrb[13].mxu1 }
 0x111   :  { %v709_v60 = vadd.f32 %v5780_v53, %v6552_v3  ;;  %v5783_v0 = vadd.f32 %v5782_v56, %v5781_v54  ;;  %v5826_v4 = vadd.f32 %v5825_v2, %v5824_v55  ;;  %v5827_v5 = vpop.f32.mrb[14].mxu1 }
 0x112   :  { %v5828_v7 = vpop.f32.mrb[15].mxu1 }
 0x113   :  { %v712_v6 = vadd.f32 %v5783_v0, %v6552_v3  ;;  %v6574_v8 = vadd.f32 %v5826_v4, %v709_v60  ;;  %v5829_v9 = vadd.f32 %v5828_v7, %v5827_v5  ;;  %v5117_v7 = vld [vmem:[%s7808_s3 + $0x190] sm:$0xff] }
 0x115   :  { %v5784_v10 = vpop.f32.mrb[16].mxu0  ;;  %v6576_v11 = vadd.f32 %v5829_v9, %v712_v6  ;;  %v5118_v9 = vld [vmem:[%s7808_s3 + $0x198] sm:$0xff] }
 0x116   :  { %v5785_v12 = vpop.f32.mrb[17].mxu0 }
 0x117   :  { %v5786_v13 = vadd.f32 %v5785_v12, %v5784_v10  ;;  %v5787_v14 = vpop.f32.mrb[18].mxu0  ;;  %v5830_v15 = vpop.f32.mrb[16].mxu1  ;;  %v5122_v10 = vld [vmem:[%s7808_s3 + $0x1b8] sm:$0xff] }
 0x118   :  { %v5788_v17 = vpop.f32.mrb[19].mxu0  ;;  %v5831_v20 = vpop.f32.mrb[17].mxu1 }
 0x119   :  { %v717_v18 = vadd.f32 %v5786_v13, %v6552_v3  ;;  %v5832_v21 = vadd.f32 %v5831_v20, %v5830_v15  ;;  %v5833_v22 = vpop.f32.mrb[18].mxu1 }
 0x11a   :  { %v5834_v23 = vpop.f32.mrb[19].mxu1 }
 0x11b   :  { %v6579_v24 = vadd.f32 %v5832_v21, %v717_v18  ;;  %v5154_v23 = vcombine.high %v5118_v9, %v5122_v10 }
 0x11d   :  { %v5852_v25 = vpop.f32.mrb[20].mxu0 }
 0x11e   :  { %v5853_v26 = vpop.f32.mrb[21].mxu0 }
 0x11f   :  { %v5854_v27 = vadd.f32 %v5853_v26, %v5852_v25  ;;  %v5855_v28 = vpop.f32.mrb[22].mxu0  ;;  %v900_v30 = vpop.f32.mrb[20].mxu1 }
 0x120   :  { %v5856_v29 = vpop.f32.mrb[23].mxu0  ;;  %v5983_v34 = vpop.f32.mrb[21].mxu1 }
 0x121   :  { %v5857_v31 = vadd.f32 %v5856_v29, %v5855_v28  ;;  %v829_v33 = vadd.f32 %v5854_v27, %v6556_v16  ;;  %v903_v36 = vpop.f32.mrb[22].mxu1  ;;  %v5113_v16 = vld [vmem:[%s7808_s3 + $0x170] sm:$0xff] }
 0x122   :  { %v5984_v38 = vpop.f32.mrb[23].mxu1  ;;  %v5144_v60 = vcombine.high %v5109_v46, %v5113_v16  ;;  %v5143_v14 = vcombine.low %v5109_v46, %v5113_v16 }
 0x123   :  { %v901_v37 = vadd.f32 %v900_v30, %v829_v33  ;;  %v832_v3 = vadd.f32 %v5857_v31, %v6558_v19  ;;  %v5110_v19 = vld [vmem:[%s7808_s3 + $0x158] sm:$0xff]  ;;  %v5153_v31 = vcombine.low %v5118_v9, %v5122_v10  ;;  %v5160_v33 = vcombine.high %v5125_v57, %v5129_v58  ;;  %v952_v38 = vld [vmem:[%s7808_s3] sm:$0xff] }
 0x124   :  { %v5146_v5 = vcombine.high %v5110_v19, %v5114_v50  ;;  %v5145_v15 = vcombine.low %v5110_v19, %v5114_v50  ;;  %v960_v50 = vld [vmem:[%s7808_s3 + $0x40] sm:$0xff] }
 0x125   :  { %v904_v39 = vadd.f32 %v903_v36, %v832_v3  ;;  %v5858_v40 = vpop.f32.mrb[24].mxu0  ;;  %v938_v42 = vmax.f32 %v901_v37, 0.0 }
 0x126   :  { %v5859_v41 = vpop.f32.mrb[25].mxu0 }
 0x127   :  { %v939_v43 = vmax.f32 %v904_v39, 0.0  ;;  %v5860_v44 = vadd.f32 %v5859_v41, %v5858_v40  ;;  %v5861_v45 = vpop.f32.mrb[26].mxu0  ;;  %v908_v49 = vpop.f32.mrb[24].mxu1  ;;  %v953_v39 = vld [vmem:[%s7808_s3 + $0x8] sm:$0xff] }
 0x128   :  { %v5862_v47 = vpop.f32.mrb[27].mxu0  ;;  %v5987_v55 = vpop.f32.mrb[25].mxu1 }
 0x129   :  { %v6595_v52 = vpack.c.bf16 %v939_v43, %v938_v42  ;;  %v5863_v53 = vadd.f32 %v5862_v47, %v5861_v45  ;;  %v837_v54 = vadd.f32 %v5860_v44, %v6562_v32  ;;  %v911_v56 = vpop.f32.mrb[26].mxu1  ;;  %v5121_v32 = vld [vmem:[%s7808_s3 + $0x1b0] sm:$0xff]  ;;  %v5159_v43 = vcombine.low %v5125_v57, %v5129_v58 }
 0x12a   :  { %v5988_v6 = vpop.f32.mrb[27].mxu1  ;;  %v5152_v17 = vcombine.high %v5117_v7, %v5121_v32  ;;  %v5151_v30 = vcombine.low %v5117_v7, %v5121_v32 }
 0x12b   :  { %v6599_v0 = vrot.slane %v6595_v52, 4  ;;  %v909_v2 = vadd.f32 %v908_v49, %v837_v54  ;;  %v840_v4 = vadd.f32 %v5863_v53, %v6564_v35  ;;  %v964_v53 = vld [vmem:[%s7808_s3 + $0x60] sm:$0xff] }
 0x12c   :  { %v5176_v10 = vcombine.high %v960_v50, %v964_v53 }
 0x12d   :  { %v912_v12 = vadd.f32 %v911_v56, %v840_v4  ;;  %v5864_v35 = vpop.f32.mrb[28].mxu0  ;;  %5163 = vmatmul.mubr.msk.bf16.vlgmr.msra.gmra.mrb[40].mxu0 %vm1179_vm2, %v6599_v0  ;;  %5164 = vmatmul.mubr.msk.bf16.vlgmr.msra.gmra.mrb[40].mxu1 %vm1179_vm2, %v6599_v0  ;;  %v940_v18 = vmax.f32 %v909_v2, 0.0  ;;  %v961_v56 = vld [vmem:[%s7808_s3 + $0x48] sm:$0xff] }
 0x12e   :  { %1266 = vmatpush1.bf16.msra.mxu0 %v5135_v62  ;;  %1307 = vmatpush1.bf16.msra.mxu1 %v5137_v63  ;;  %v5865_v13 = vpop.f32.mrb[29].mxu0  ;;  %v5126_v62 = vld [vmem:[%s7808_s3 + $0x1d8] sm:$0xff] }
 0x12f   :  { %v941_v20 = vmax.f32 %v912_v12, 0.0  ;;  %v5866_v21 = vadd.f32 %v5865_v13, %v5864_v35  ;;  %v5867_v22 = vpop.f32.mrb[30].mxu0  ;;  %1267 = vmatprep.subr.bf16.mxu0 %v5144_v60  ;;  %1308 = vmatprep.subr.bf16.mxu1 %v5146_v5  ;;  %v916_v61 = vpop.f32.mrb[28].mxu1  ;;  %v5130_v63 = vld [vmem:[%s7808_s3 + $0x1f8] sm:$0xff]  ;;  %v965_v60 = vld [vmem:[%s7808_s3 + $0x68] sm:$0xff] }
 0x130   :  { %v5868_v59 = vpop.f32.mrb[31].mxu0  ;;  %1297 = vmatprep.mubr.bf16.mxu0 %v6167_v1  ;;  %1338 = vmatprep.mubr.bf16.mxu1 %v6167_v1  ;;  %v5991_v28 = vpop.f32.mrb[29].mxu1  ;;  %v5162_v37 = vcombine.high %v5126_v62, %v5130_v63  ;;  %v5161_v44 = vcombine.low %v5126_v62, %v5130_v63  ;;  %v5178_v13 = vcombine.high %v961_v56, %v965_v60  ;;  %v976_v63 = vld [vmem:[%s7808_s3 + $0xc0] sm:$0xff] }
 0x131   :  { %v6638_v25 = vpack.c.bf16 %v941_v20, %v940_v18  ;;  %v5869_v26 = vadd.f32 %v5868_v59, %v5867_v22  ;;  %v845_v27 = vadd.f32 %v5866_v21, %v6568_v48  ;;  %v919_v29 = vpop.f32.mrb[30].mxu1  ;;  %v956_v48 = vld [vmem:[%s7808_s3 + $0x20] sm:$0xff]  ;;  %v5175_v22 = vcombine.low %v960_v50, %v964_v53  ;;  %v977_v28 = vld [vmem:[%s7808_s3 + $0xc8] sm:$0xff] }
 0x132   :  { %1268 = vmatpush1.bf16.msra.mxu0 %v5143_v14  ;;  %1309 = vmatpush1.bf16.msra.mxu1 %v5145_v15  ;;  %v5992_v3 = vpop.f32.mrb[31].mxu1  ;;  %v5168_v45 = vcombine.high %v952_v38, %v956_v48  ;;  %v5167_v32 = vcombine.low %v952_v38, %v956_v48  ;;  %v968_v15 = vld [vmem:[%s7808_s3 + $0x80] sm:$0xff] }
 0x133   :  { %v917_v34 = vadd.f32 %v916_v61, %v845_v27  ;;  %v848_v36 = vadd.f32 %v5869_v26, %v6570_v51  ;;  %1269 = vmatprep.subr.bf16.mxu0 %v5152_v17  ;;  %1310 = vmatprep.subr.bf16.mxu1 %v5154_v23  ;;  %v957_v51 = vld [vmem:[%s7808_s3 + $0x28] sm:$0xff]  ;;  %v5177_v23 = vcombine.low %v961_v56, %v965_v60  ;;  %v970_v56 = vld [vmem:[%s7808_s3 + $0x90] sm:$0xff] }
 0x134   :  { %v5170_v19 = vcombine.high %v953_v39, %v957_v51  ;;  %v5169_v9 = vcombine.low %v953_v39, %v957_v51  ;;  %v969_v17 = vld [vmem:[%s7808_s3 + $0x88] sm:$0xff]  ;;  %v954_v51 = vld [vmem:[%s7808_s3 + $0x10] sm:$0xff] }
 0x135   :  { %v920_v40 = vadd.f32 %v919_v29, %v848_v36  ;;  %v5870_v41 = vpop.f32.mrb[32].mxu0  ;;  %v942_v46 = vmax.f32 %v917_v34, 0.0  ;;  %v981_v29 = vld [vmem:[%s7808_s3 + $0xe8] sm:$0xff]  ;;  %v974_v60 = vld [vmem:[%s7808_s3 + $0xb0] sm:$0xff] }
 0x136   :  { %1270 = vmatpush1.bf16.msra.mxu0 %v5151_v30  ;;  %1311 = vmatpush1.bf16.msra.mxu1 %v5153_v31  ;;  %v5871_v42 = vpop.f32.mrb[33].mxu0  ;;  %v5194_v39 = vcombine.high %v977_v28, %v981_v29 }
 0x137   :  { %v943_v16 = vmax.f32 %v920_v40, 0.0  ;;  %v5872_v47 = vadd.f32 %v5871_v42, %v5870_v41  ;;  %v5873_v49 = vpop.f32.mrb[34].mxu0  ;;  %1271 = vmatprep.subr.bf16.mxu0 %v5160_v33  ;;  %1312 = vmatprep.subr.bf16.mxu1 %v5162_v37  ;;  %v924_v55 = vpop.f32.mrb[32].mxu1  ;;  %v955_v41 = vld [vmem:[%s7808_s3 + $0x18] sm:$0xff] }
 0x138   :  { %v5874_v54 = vpop.f32.mrb[35].mxu0  ;;  %v5995_v6 = vpop.f32.mrb[33].mxu1  ;;  %v959_v42 = vld [vmem:[%s7808_s3 + $0x38] sm:$0xff] }
 0x139   :  { %v6666_v2 = vpack.c.bf16 %v943_v16, %v942_v46  ;;  %v5875_v4 = vadd.f32 %v5874_v54, %v5873_v49  ;;  %v853_v5 = vadd.f32 %v5872_v47, %v6574_v8  ;;  %v927_v7 = vpop.f32.mrb[34].mxu1  ;;  %v972_v8 = vld [vmem:[%s7808_s3 + $0xa0] sm:$0xff]  ;;  %v5174_v46 = vcombine.high %v955_v41, %v959_v42  ;;  %v962_v16 = vld [vmem:[%s7808_s3 + $0x50] sm:$0xff]  ;;  %v963_v49 = vld [vmem:[%s7808_s3 + $0x58] sm:$0xff] }
 0x13a   :  { %1272 = vmatpush1.bf16.msra.mxu0 %v5159_v43  ;;  %1313 = vmatpush1.bf16.msra.mxu1 %v5161_v44  ;;  %v5996_v14 = vpop.f32.mrb[35].mxu1  ;;  %v5184_v57 = vcombine.high %v968_v15, %v972_v8  ;;  %v5183_v36 = vcombine.low %v968_v15, %v972_v8  ;;  %v5193_v44 = vcombine.low %v977_v28, %v981_v29  ;;  %v966_v47 = vld [vmem:[%s7808_s3 + $0x70] sm:$0xff]  ;;  %v5219_v29 = vld [vmem:[%s7808_s3 + $0x280] sm:$0xff] }
 0x13b   :  { %v925_v12 = vadd.f32 %v924_v55, %v853_v5  ;;  %v856_v35 = vadd.f32 %v5875_v4, %v6576_v11  ;;  %1510 = vmatprep.subr.bf16.mxu0 %v5168_v45  ;;  %1551 = vmatprep.subr.bf16.mxu1 %v5170_v19  ;;  %v973_v11 = vld [vmem:[%s7808_s3 + $0xa8] sm:$0xff]  ;;  %v967_v19 = vld [vmem:[%s7808_s3 + $0x78] sm:$0xff]  ;;  %v5173_v53 = vcombine.low %v955_v41, %v959_v42 }
 0x13c   :  { %v5186_v62 = vcombine.high %v969_v17, %v973_v11  ;;  %v5185_v37 = vcombine.low %v969_v17, %v973_v11  ;;  %v5180_v54 = vcombine.high %v962_v16, %v966_v47  ;;  %v5182_v55 = vcombine.high %v963_v49, %v967_v19  ;;  %v971_v4 = vld [vmem:[%s7808_s3 + $0x98] sm:$0xff]  ;;  %v5203_v11 = vld [vmem:[%s7808_s3 + $0x200] sm:$0xff] }
 0x13d   :  { %v928_v18 = vadd.f32 %v927_v7, %v856_v35  ;;  %5165 = vmatmul.mubr.msk.bf16.vlgmr.msra.gmra.mrb[44].mxu0 %vm1179_vm2, %v6599_v0  ;;  %5166 = vmatmul.mubr.msk.bf16.vlgmr.msra.gmra.mrb[44].mxu1 %vm1179_vm2, %v6599_v0  ;;  %v5876_v20 = vpop.f32.mrb[36].mxu0  ;;  %v944_v58 = vmax.f32 %v925_v12, 0.0  ;;  %v980_v0 = vld [vmem:[%s7808_s3 + $0xe0] sm:$0xff]  ;;  %v975_v5 = vld [vmem:[%s7808_s3 + $0xb8] sm:$0xff]  ;;  %v5179_v6 = vcombine.low %v962_v16, %v966_v47  ;;  %v5181_v7 = vcombine.low %v963_v49, %v967_v19  ;;  %v982_v12 = vld [vmem:[%s7808_s3 + $0xf0] sm:$0xff] }
 0x13e   :  { %1511 = vmatpush1.bf16.msra.mxu0 %v5167_v32  ;;  %1552 = vmatpush1.bf16.msra.mxu1 %v5169_v9  ;;  %v5877_v21 = vpop.f32.mrb[37].mxu0  ;;  %v5192_v48 = vcombine.high %v976_v63, %v980_v0  ;;  %v5191_v43 = vcombine.low %v976_v63, %v980_v0  ;;  %v5188_v32 = vcombine.high %v970_v56, %v974_v60  ;;  %v979_v35 = vld [vmem:[%s7808_s3 + $0xd8] sm:$0xff]  ;;  %v5216_v63 = vld [vmem:[%s7808_s3 + $0x268] sm:$0xff] }
 0x13f   :  { %v945_v59 = vmax.f32 %v928_v18, 0.0  ;;  %v5878_v61 = vadd.f32 %v5877_v21, %v5876_v20  ;;  %1512 = vmatprep.subr.bf16.mxu0 %v5176_v10  ;;  %1553 = vmatprep.subr.bf16.mxu1 %v5178_v13  ;;  %v5879_v26 = vpop.f32.mrb[38].mxu0  ;;  %v932_v27 = vpop.f32.mrb[36].mxu1  ;;  %v5190_v9 = vcombine.high %v971_v4, %v975_v5  ;;  %v978_v10 = vld [vmem:[%s7808_s3 + $0xd0] sm:$0xff]  ;;  %v983_v13 = vld [vmem:[%s7808_s3 + $0xf8] sm:$0xff]  ;;  %v5187_v14 = vcombine.low %v970_v56, %v974_v60  ;;  %v5207_v18 = vld [vmem:[%s7808_s3 + $0x220] sm:$0xff] }
 0x140   :  { %1542 = vmatprep.mubr.bf16.mxu0 %v6167_v1  ;;  %1583 = vmatprep.mubr.bf16.mxu1 %v6167_v1  ;;  %v5880_v30 = vpop.f32.mrb[39].mxu0  ;;  %v5999_v34 = vpop.f32.mrb[37].mxu1  ;;  %v5189_v15 = vcombine.low %v971_v4, %v975_v5  ;;  %v5196_v8 = vcombine.high %v978_v10, %v982_v12  ;;  %v5198_v17 = vcombine.high %v979_v35, %v983_v13  ;;  %v5204_v20 = vld [vmem:[%s7808_s3 + $0x208] sm:$0xff]  ;;  %v5210_v16 = vld [vmem:[%s7808_s3 + $0x238] sm:$0xff] }
 0x141   :  { %v6700_v31 = vpack.c.bf16 %v945_v59, %v944_v58  ;;  %v861_v33 = vadd.f32 %v5878_v61, %v6579_v24  ;;  %v935_v3 = vpop.f32.mrb[38].mxu1  ;;  %v958_v24 = vld [vmem:[%s7808_s3 + $0x30] sm:$0xff]  ;;  %v5208_v21 = vld [vmem:[%s7808_s3 + $0x228] sm:$0xff]  ;;  %v5211_v59 = vld [vmem:[%s7808_s3 + $0x240] sm:$0xff]  ;;  %v5235_v26 = vcombine.low %v5203_v11, %v5207_v18 }
 0x142   :  { %1513 = vmatpush1.bf16.msra.mxu0 %v5175_v22  ;;  %1554 = vmatpush1.bf16.msra.mxu1 %v5177_v23  ;;  %v6000_v40 = vpop.f32.mrb[39].mxu1  ;;  %v5172_v45 = vcombine.high %v954_v51, %v958_v24  ;;  %v5171_v50 = vcombine.low %v954_v51, %v958_v24  ;;  %v5195_v22 = vcombine.low %v978_v10, %v982_v12  ;;  %v5215_v61 = vld [vmem:[%s7808_s3 + $0x260] sm:$0xff]  ;;  %v5224_v34 = vld [vmem:[%s7808_s3 + $0x2a8] sm:$0xff]  ;;  %v5218_v56 = vld [vmem:[%s7808_s3 + $0x278] sm:$0xff] }
 0x143   :  { %v6703_v38 = vadd.f32 %v932_v27, %v861_v33  ;;  %1514 = vmatprep.subr.bf16.mxu0 %v5184_v57  ;;  %1555 = vmatprep.subr.bf16.mxu1 %v5186_v62  ;;  %v5197_v23 = vcombine.low %v979_v35, %v983_v13  ;;  %v5236_v57 = vcombine.high %v5203_v11, %v5207_v18  ;;  %v5212_v62 = vld [vmem:[%s7808_s3 + $0x248] sm:$0xff]  ;;  %v5223_v30 = vld [vmem:[%s7808_s3 + $0x2a0] sm:$0xff]  ;;  %v5226_v10 = vld [vmem:[%s7808_s3 + $0x2b8] sm:$0xff] }
 0x144   :  { %v5238_v58 = vcombine.high %v5204_v20, %v5208_v21  ;;  %v5237_v27 = vcombine.low %v5204_v20, %v5208_v21  ;;  %v5244_v0 = vcombine.high %v5211_v59, %v5215_v61  ;;  %v5246_v28 = vcombine.high %v5212_v62, %v5216_v63  ;;  %v5220_v33 = vld [vmem:[%s7808_s3 + $0x288] sm:$0xff]  ;;  %v5231_v51 = vld [vmem:[%s7808_s3 + $0x2e0] sm:$0xff]  ;;  %v5234_v11 = vld [vmem:[%s7808_s3 + $0x2f8] sm:$0xff] }
 0x145   :  { %v5252_v3 = vcombine.high %v5219_v29, %v5223_v30  ;;  %v5232_v40 = vld [vmem:[%s7808_s3 + $0x2e8] sm:$0xff]  ;;  %v5251_v24 = vcombine.low %v5219_v29, %v5223_v30  ;;  %v5253_v41 = vcombine.low %v5220_v33, %v5224_v34 }
 0x146   :  { %1515 = vmatpush1.bf16.msra.mxu0 %v5183_v36  ;;  %1556 = vmatpush1.bf16.msra.mxu1 %v5185_v37  ;;  %v5243_v36 = vcombine.low %v5211_v59, %v5215_v61  ;;  %v5245_v37 = vcombine.low %v5212_v62, %v5216_v63  ;;  %v5276_v59 = vld [vmem:[%s7808_s3 + $0x328] sm:$0xff] }
 0x147   :  { %1516 = vmatprep.subr.bf16.mxu0 %v5192_v48  ;;  %1557 = vmatprep.subr.bf16.mxu1 %v5194_v39  ;;  %v5254_v48 = vcombine.high %v5220_v33, %v5224_v34  ;;  %v5227_v39 = vld [vmem:[%s7808_s3 + $0x2c0] sm:$0xff]  ;;  %v5284_v29 = vld [vmem:[%s7808_s3 + $0x368] sm:$0xff] }
 0x148   :  { %v5260_v42 = vcombine.high %v5227_v39, %v5231_v51  ;;  %v5259_v47 = vcombine.low %v5227_v39, %v5231_v51  ;;  %v5292_v39 = vld [vmem:[%s7808_s3 + $0x3a8] sm:$0xff] }
 0x14a   :  { %1517 = vmatpush1.bf16.msra.mxu0 %v5191_v43  ;;  %1558 = vmatpush1.bf16.msra.mxu1 %v5193_v44  ;;  %v5205_v44 = vld [vmem:[%s7808_s3 + $0x210] sm:$0xff] }
 0x14b   :  { %1592 = vmatprep.subr.bf16.mxu0 %v5172_v45  ;;  %1633 = vmatprep.subr.bf16.mxu1 %v5174_v46  ;;  %v5209_v45 = vld [vmem:[%s7808_s3 + $0x230] sm:$0xff]  ;;  %v5206_v46 = vld [vmem:[%s7808_s3 + $0x218] sm:$0xff] }
 0x14c   :  { %v5240_v19 = vcombine.high %v5205_v44, %v5209_v45  ;;  %v5239_v60 = vcombine.low %v5205_v44, %v5209_v45  ;;  %v5241_v4 = vcombine.low %v5206_v46, %v5210_v16  ;;  %v5300_v44 = vld [vmem:[%s7808_s3 + $0x3e8] sm:$0xff] }
 0x14d   :  { %5199 = vmatmul.mubr.msk.bf16.vlgmr.msra.gmra.mrb[48].mxu0 %vm1179_vm2, %v6595_v52  ;;  %5200 = vmatmul.mubr.msk.bf16.vlgmr.msra.gmra.mrb[48].mxu1 %vm1179_vm2, %v6595_v52 }
 0x14e   :  { %1593 = vmatpush1.bf16.msra.mxu0 %v5171_v50  ;;  %1634 = vmatpush1.bf16.msra.mxu1 %v5173_v53  ;;  %v5242_v50 = vcombine.high %v5206_v46, %v5210_v16  ;;  %v5213_v53 = vld [vmem:[%s7808_s3 + $0x250] sm:$0xff] }
 0x14f   :  { %1594 = vmatprep.subr.bf16.mxu0 %v5180_v54  ;;  %1635 = vmatprep.subr.bf16.mxu1 %v5182_v55  ;;  %v5217_v54 = vld [vmem:[%s7808_s3 + $0x270] sm:$0xff]  ;;  %v5214_v55 = vld [vmem:[%s7808_s3 + $0x258] sm:$0xff] }
 0x150   :  { %1624 = vmatprep.mubr.bf16.mxu0 %v6167_v1  ;;  %1665 = vmatprep.mubr.bf16.mxu1 %v6167_v1  ;;  %v5248_v5 = vcombine.high %v5213_v53, %v5217_v54  ;;  %v5247_v12 = vcombine.low %v5213_v53, %v5217_v54  ;;  %v5249_v35 = vcombine.low %v5214_v55, %v5218_v56  ;;  %v5278_v53 = vld [vmem:[%s7808_s3 + $0x338] sm:$0xff] }
 0x152   :  { %1595 = vmatpush1.bf16.msra.mxu0 %v5179_v6  ;;  %1636 = vmatpush1.bf16.msra.mxu1 %v5181_v7  ;;  %v5250_v6 = vcombine.high %v5214_v55, %v5218_v56  ;;  %v5221_v7 = vld [vmem:[%s7808_s3 + $0x290] sm:$0xff] }
 0x153   :  { %1596 = vmatprep.subr.bf16.mxu0 %v5188_v32  ;;  %1637 = vmatprep.subr.bf16.mxu1 %v5190_v9  ;;  %v5225_v32 = vld [vmem:[%s7808_s3 + $0x2b0] sm:$0xff]  ;;  %v5222_v9 = vld [vmem:[%s7808_s3 + $0x298] sm:$0xff] }
 0x154   :  { %v5256_v13 = vcombine.high %v5221_v7, %v5225_v32  ;;  %v5255_v18 = vcombine.low %v5221_v7, %v5225_v32  ;;  %v5257_v20 = vcombine.low %v5222_v9, %v5226_v10  ;;  %v5286_v7 = vld [vmem:[%s7808_s3 + $0x378] sm:$0xff] }
 0x156   :  { %1597 = vmatpush1.bf16.msra.mxu0 %v5187_v14  ;;  %1638 = vmatpush1.bf16.msra.mxu1 %v5189_v15  ;;  %v5258_v14 = vcombine.high %v5222_v9, %v5226_v10  ;;  %v5229_v15 = vld [vmem:[%s7808_s3 + $0x2d0] sm:$0xff]  ;;  %v2076_v10 = vrot.slane %v6638_v25, 4 }
 0x157   :  { %1598 = vmatprep.subr.bf16.mxu0 %v5196_v8  ;;  %1639 = vmatprep.subr.bf16.mxu1 %v5198_v17  ;;  %v5233_v8 = vld [vmem:[%s7808_s3 + $0x2f0] sm:$0xff]  ;;  %v5230_v17 = vld [vmem:[%s7808_s3 + $0x2d8] sm:$0xff] }
 0x158   :  { %v5264_v21 = vcombine.high %v5229_v15, %v5233_v8  ;;  %v5263_v61 = vcombine.low %v5229_v15, %v5233_v8  ;;  %v5265_v62 = vcombine.low %v5230_v17, %v5234_v11  ;;  %v5290_v15 = vld [vmem:[%s7808_s3 + $0x398] sm:$0xff] }
 0x15a   :  { %1599 = vmatpush1.bf16.msra.mxu0 %v5195_v22  ;;  %1640 = vmatpush1.bf16.msra.mxu1 %v5197_v23  ;;  %v5266_v22 = vcombine.high %v5230_v17, %v5234_v11  ;;  %v5271_v23 = vld [vmem:[%s7808_s3 + $0x300] sm:$0xff] }
 0x15b   :  { %1870 = vmatprep.subr.bf16.mxu0 %v5236_v57  ;;  %1911 = vmatprep.subr.bf16.mxu1 %v5238_v58  ;;  %v5275_v57 = vld [vmem:[%s7808_s3 + $0x320] sm:$0xff]  ;;  %v5272_v58 = vld [vmem:[%s7808_s3 + $0x308] sm:$0xff] }
 0x15c   :  { %v5304_v63 = vcombine.high %v5271_v23, %v5275_v57  ;;  %v5303_v30 = vcombine.low %v5271_v23, %v5275_v57  ;;  %v5305_v33 = vcombine.low %v5272_v58, %v5276_v59  ;;  %v5302_v23 = vld [vmem:[%s7808_s3 + $0x3f8] sm:$0xff] }
 0x15d   :  { %5201 = vmatmul.mubr.msk.bf16.vlgmr.msra.gmra.mrb[52].mxu0 %vm1179_vm2, %v6595_v52  ;;  %5202 = vmatmul.mubr.msk.bf16.vlgmr.msra.gmra.mrb[52].mxu1 %vm1179_vm2, %v6595_v52  ;;  %v5228_v52 = vld [vmem:[%s7808_s3 + $0x2c8] sm:$0xff] }
 0x15e   :  { %1871 = vmatpush1.bf16.msra.mxu0 %v5235_v26  ;;  %1912 = vmatpush1.bf16.msra.mxu1 %v5237_v27  ;;  %v5262_v43 = vcombine.high %v5228_v52, %v5232_v40  ;;  %v5261_v49 = vcombine.low %v5228_v52, %v5232_v40  ;;  %v5306_v26 = vcombine.high %v5272_v58, %v5276_v59  ;;  %v5279_v27 = vld [vmem:[%s7808_s3 + $0x340] sm:$0xff] }
 0x15f   :  { %1872 = vmatprep.subr.bf16.mxu0 %v5244_v0  ;;  %1913 = vmatprep.subr.bf16.mxu1 %v5246_v28  ;;  %v5283_v0 = vld [vmem:[%s7808_s3 + $0x360] sm:$0xff]  ;;  %v5280_v28 = vld [vmem:[%s7808_s3 + $0x348] sm:$0xff] }
 0x160   :  { %1902 = vmatprep.mubr.bf16.mxu0 %v6167_v1  ;;  %1943 = vmatprep.mubr.bf16.mxu1 %v6167_v1  ;;  %v5312_v34 = vcombine.high %v5279_v27, %v5283_v0  ;;  %v5311_v51 = vcombine.low %v5279_v27, %v5283_v0  ;;  %v5313_v52 = vcombine.low %v5280_v28, %v5284_v29  ;;  %v5344_v27 = vld [vmem:[%s7808_s3 + $0x428] sm:$0xff] }
 0x162   :  { %1873 = vmatpush1.bf16.msra.mxu0 %v5243_v36  ;;  %1914 = vmatpush1.bf16.msra.mxu1 %v5245_v37  ;;  %v5314_v36 = vcombine.high %v5280_v28, %v5284_v29  ;;  %v5287_v37 = vld [vmem:[%s7808_s3 + $0x380] sm:$0xff] }
 0x163   :  { %1874 = vmatprep.subr.bf16.mxu0 %v5252_v3  ;;  %1915 = vmatprep.subr.bf16.mxu1 %v5254_v48  ;;  %v5291_v3 = vld [vmem:[%s7808_s3 + $0x3a0] sm:$0xff]  ;;  %v5288_v48 = vld [vmem:[%s7808_s3 + $0x388] sm:$0xff] }
 0x164   :  { %v5320_v40 = vcombine.high %v5287_v37, %v5291_v3  ;;  %v5319_v45 = vcombine.low %v5287_v37, %v5291_v3  ;;  %v5321_v46 = vcombine.low %v5288_v48, %v5292_v39  ;;  %v5352_v37 = vld [vmem:[%s7808_s3 + $0x468] sm:$0xff] }
 0x166   :  { %1875 = vmatpush1.bf16.msra.mxu0 %v5251_v24  ;;  %1916 = vmatpush1.bf16.msra.mxu1 %v5253_v41  ;;  %v5322_v24 = vcombine.high %v5288_v48, %v5292_v39  ;;  %v5295_v41 = vld [vmem:[%s7808_s3 + $0x3c0] sm:$0xff] }
 0x167   :  { %1876 = vmatprep.subr.bf16.mxu0 %v5260_v42  ;;  %1917 = vmatprep.subr.bf16.mxu1 %v5262_v43  ;;  %v5299_v42 = vld [vmem:[%s7808_s3 + $0x3e0] sm:$0xff]  ;;  %v5296_v43 = vld [vmem:[%s7808_s3 + $0x3c8] sm:$0xff] }
 0x168   :  { %v5328_v16 = vcombine.high %v5295_v41, %v5299_v42  ;;  %v5327_v54 = vcombine.low %v5295_v41, %v5299_v42  ;;  %v5329_v55 = vcombine.low %v5296_v43, %v5300_v44  ;;  %v5360_v41 = vld [vmem:[%s7808_s3 + $0x4a8] sm:$0xff] }
 0x16a   :  { %1877 = vmatpush1.bf16.msra.mxu0 %v5259_v47  ;;  %1918 = vmatpush1.bf16.msra.mxu1 %v5261_v49  ;;  %v5330_v47 = vcombine.high %v5296_v43, %v5300_v44  ;;  %v5273_v49 = vld [vmem:[%s7808_s3 + $0x310] sm:$0xff] }
 0x16b   :  { %1952 = vmatprep.subr.bf16.mxu0 %v5240_v19  ;;  %1993 = vmatprep.subr.bf16.mxu1 %v5242_v50  ;;  %v5277_v19 = vld [vmem:[%s7808_s3 + $0x330] sm:$0xff]  ;;  %v5274_v50 = vld [vmem:[%s7808_s3 + $0x318] sm:$0xff] }
 0x16c   :  { %v5308_v56 = vcombine.high %v5273_v49, %v5277_v19  ;;  %v5307_v32 = vcombine.low %v5273_v49, %v5277_v19  ;;  %v5309_v9 = vcombine.low %v5274_v50, %v5278_v53  ;;  %v5368_v49 = vld [vmem:[%s7808_s3 + $0x4e8] sm:$0xff] }
 0x16d   :  { %5267 = vmatmul.mubr.msk.bf16.vlgmr.msra.gmra.mrb[56].mxu0 %vm1179_vm2, %v6638_v25  ;;  %5268 = vmatmul.mubr.msk.bf16.vlgmr.msra.gmra.mrb[56].mxu1 %vm1179_vm2, %v6638_v25 }
 0x16e   :  { %1953 = vmatpush1.bf16.msra.mxu0 %v5239_v60  ;;  %1994 = vmatpush1.bf16.msra.mxu1 %v5241_v4  ;;  %v5310_v60 = vcombine.high %v5274_v50, %v5278_v53  ;;  %v5281_v4 = vld [vmem:[%s7808_s3 + $0x350] sm:$0xff] }
 0x16f   :  { %1954 = vmatprep.subr.bf16.mxu0 %v5248_v5  ;;  %1995 = vmatprep.subr.bf16.mxu1 %v5250_v6  ;;  %v5285_v5 = vld [vmem:[%s7808_s3 + $0x370] sm:$0xff]  ;;  %v5282_v6 = vld [vmem:[%s7808_s3 + $0x358] sm:$0xff] }
 0x170   :  { %1984 = vmatprep.mubr.bf16.mxu0 %v6167_v1  ;;  %2025 = vmatprep.mubr.bf16.mxu1 %v6167_v1  ;;  %v5315_v8 = vcombine.low %v5281_v4, %v5285_v5  ;;  %v5317_v17 = vcombine.low %v5282_v6, %v5286_v7 }
 0x172   :  { %1955 = vmatpush1.bf16.msra.mxu0 %v5247_v12  ;;  %1996 = vmatpush1.bf16.msra.mxu1 %v5249_v35  ;;  %v5316_v12 = vcombine.high %v5281_v4, %v5285_v5  ;;  %v5318_v35 = vcombine.high %v5282_v6, %v5286_v7  ;;  %v5346_v4 = vld [vmem:[%s7808_s3 + $0x438] sm:$0xff] }
 0x173   :  { %1956 = vmatprep.subr.bf16.mxu0 %v5256_v13  ;;  %1997 = vmatprep.subr.bf16.mxu1 %v5258_v14  ;;  %v5289_v13 = vld [vmem:[%s7808_s3 + $0x390] sm:$0xff] }
 0x174   :  { %v5293_v14 = vld [vmem:[%s7808_s3 + $0x3b0] sm:$0xff] }
 0x175   :  { %v5324_v11 = vcombine.high %v5289_v13, %v5293_v14  ;;  %v5323_v57 = vcombine.low %v5289_v13, %v5293_v14 }
 0x176   :  { %1957 = vmatpush1.bf16.msra.mxu0 %v5255_v18  ;;  %1998 = vmatpush1.bf16.msra.mxu1 %v5257_v20  ;;  %v5297_v20 = vld [vmem:[%s7808_s3 + $0x3d0] sm:$0xff] }
 0x177   :  { %1958 = vmatprep.subr.bf16.mxu0 %v5264_v21  ;;  %1999 = vmatprep.subr.bf16.mxu1 %v5266_v22  ;;  %v5301_v21 = vld [vmem:[%s7808_s3 + $0x3f0] sm:$0xff]  ;;  %v5298_v22 = vld [vmem:[%s7808_s3 + $0x3d8] sm:$0xff] }
 0x178   :  { %v5332_v59 = vcombine.high %v5297_v20, %v5301_v21  ;;  %v5331_v0 = vcombine.low %v5297_v20, %v5301_v21  ;;  %v5333_v28 = vcombine.low %v5298_v22, %v5302_v23 }
 0x17a   :  { %1959 = vmatpush1.bf16.msra.mxu0 %v5263_v61  ;;  %2000 = vmatpush1.bf16.msra.mxu1 %v5265_v62  ;;  %v5334_v61 = vcombine.high %v5298_v22, %v5302_v23  ;;  %v5339_v62 = vld [vmem:[%s7808_s3 + $0x400] sm:$0xff] }
 0x17b   :  { %2240 = vmatprep.subr.bf16.mxu0 %v5304_v63  ;;  %2281 = vmatprep.subr.bf16.mxu1 %v5306_v26  ;;  %v5343_v63 = vld [vmem:[%s7808_s3 + $0x420] sm:$0xff]  ;;  %v5340_v26 = vld [vmem:[%s7808_s3 + $0x408] sm:$0xff] }
 0x17c   :  { %v5372_v29 = vcombine.high %v5339_v62, %v5343_v63  ;;  %v5371_v3 = vcombine.low %v5339_v62, %v5343_v63  ;;  %v5373_v48 = vcombine.low %v5340_v26, %v5344_v27 }
 0x17d   :  { %5269 = vmatmul.mubr.msk.bf16.vlgmr.msra.gmra.mrb[60].mxu0 %vm1179_vm2, %v6638_v25  ;;  %5270 = vmatmul.mubr.msk.bf16.vlgmr.msra.gmra.mrb[60].mxu1 %vm1179_vm2, %v6638_v25  ;;  %v5294_v25 = vld [vmem:[%s7808_s3 + $0x3b8] sm:$0xff] }
 0x17e   :  { %2241 = vmatpush1.bf16.msra.mxu0 %v5303_v30  ;;  %2282 = vmatpush1.bf16.msra.mxu1 %v5305_v33  ;;  %v5326_v18 = vcombine.high %v5290_v15, %v5294_v25  ;;  %v5325_v58 = vcombine.low %v5290_v15, %v5294_v25  ;;  %v5374_v30 = vcombine.high %v5340_v26, %v5344_v27  ;;  %v5347_v33 = vld [vmem:[%s7808_s3 + $0x440] sm:$0xff] }
 0x17f   :  { %2242 = vmatprep.subr.bf16.mxu0 %v5312_v34  ;;  %2283 = vmatprep.subr.bf16.mxu1 %v5314_v36  ;;  %v5351_v34 = vld [vmem:[%s7808_s3 + $0x460] sm:$0xff]  ;;  %v5348_v36 = vld [vmem:[%s7808_s3 + $0x448] sm:$0xff] }
 0x180   :  { %2272 = vmatprep.mubr.bf16.mxu0 %v6167_v1  ;;  %2313 = vmatprep.mubr.bf16.mxu1 %v6167_v1  ;;  %v5380_v39 = vcombine.high %v5347_v33, %v5351_v34  ;;  %v5379_v42 = vcombine.low %v5347_v33, %v5351_v34  ;;  %v5381_v43 = vcombine.low %v5348_v36, %v5352_v37 }
 0x182   :  { %2243 = vmatpush1.bf16.msra.mxu0 %v5311_v51  ;;  %2284 = vmatpush1.bf16.msra.mxu1 %v5313_v52  ;;  %v5382_v51 = vcombine.high %v5348_v36, %v5352_v37  ;;  %v5355_v52 = vld [vmem:[%s7808_s3 + $0x480] sm:$0xff] }
 0x183   :  { %2244 = vmatprep.subr.bf16.mxu0 %v5320_v40  ;;  %2285 = vmatprep.subr.bf16.mxu1 %v5322_v24  ;;  %v5359_v40 = vld [vmem:[%s7808_s3 + $0x4a0] sm:$0xff]  ;;  %v5356_v24 = vld [vmem:[%s7808_s3 + $0x488] sm:$0xff] }
 0x184   :  { %v5388_v44 = vcombine.high %v5355_v52, %v5359_v40  ;;  %v5387_v19 = vcombine.low %v5355_v52, %v5359_v40  ;;  %v5389_v50 = vcombine.low %v5356_v24, %v5360_v41 }
 0x186   :  { %2245 = vmatpush1.bf16.msra.mxu0 %v5319_v45  ;;  %2286 = vmatpush1.bf16.msra.mxu1 %v5321_v46  ;;  %v5390_v45 = vcombine.high %v5356_v24, %v5360_v41  ;;  %v5363_v46 = vld [vmem:[%s7808_s3 + $0x4c0] sm:$0xff] }
 0x187   :  { %2246 = vmatprep.subr.bf16.mxu0 %v5328_v16  ;;  %2287 = vmatprep.subr.bf16.mxu1 %v5330_v47  ;;  %v5367_v16 = vld [vmem:[%s7808_s3 + $0x4e0] sm:$0xff]  ;;  %v5364_v47 = vld [vmem:[%s7808_s3 + $0x4c8] sm:$0xff] }
 0x188   :  { %v5396_v53 = vcombine.high %v5363_v46, %v5367_v16  ;;  %v5395_v5 = vcombine.low %v5363_v46, %v5367_v16  ;;  %v5397_v6 = vcombine.low %v5364_v47, %v5368_v49 }
 0x18a   :  { %2247 = vmatpush1.bf16.msra.mxu0 %v5327_v54  ;;  %2288 = vmatpush1.bf16.msra.mxu1 %v5329_v55  ;;  %v5398_v54 = vcombine.high %v5364_v47, %v5368_v49  ;;  %v5341_v55 = vld [vmem:[%s7808_s3 + $0x410] sm:$0xff] }
 0x18b   :  { %2322 = vmatprep.subr.bf16.mxu0 %v5308_v56  ;;  %2363 = vmatprep.subr.bf16.mxu1 %v5310_v60  ;;  %v5345_v56 = vld [vmem:[%s7808_s3 + $0x430] sm:$0xff]  ;;  %v5342_v60 = vld [vmem:[%s7808_s3 + $0x418] sm:$0xff] }
 0x18c   :  { %v5376_v7 = vcombine.high %v5341_v55, %v5345_v56  ;;  %v5375_v13 = vcombine.low %v5341_v55, %v5345_v56  ;;  %v5377_v14 = vcombine.low %v5342_v60, %v5346_v4 }
 0x18d   :  { %5335 = vmatmul.mubr.msk.bf16.vlgmr.msra.gmra.mrb[64].mxu0 %vm1179_vm2, %v2076_v10  ;;  %5336 = vmatmul.mubr.msk.bf16.vlgmr.msra.gmra.mrb[64].mxu1 %vm1179_vm2, %v2076_v10 }
 0x18e   :  { %2323 = vmatpush1.bf16.msra.mxu0 %v5307_v32  ;;  %2364 = vmatpush1.bf16.msra.mxu1 %v5309_v9  ;;  %v5378_v32 = vcombine.high %v5342_v60, %v5346_v4  ;;  %v5349_v9 = vld [vmem:[%s7808_s3 + $0x450] sm:$0xff] }
 0x18f   :  { %2324 = vmatprep.subr.bf16.mxu0 %v5316_v12  ;;  %2365 = vmatprep.subr.bf16.mxu1 %v5318_v35  ;;  %v5350_v12 = vld [vmem:[%s7808_s3 + $0x458] sm:$0xff] }
 0x190   :  { %2354 = vmatprep.mubr.bf16.mxu0 %v6167_v1  ;;  %2395 = vmatprep.mubr.bf16.mxu1 %v6167_v1  ;;  %v5354_v35 = vld [vmem:[%s7808_s3 + $0x478] sm:$0xff] }
 0x191   :  { %v5386_v25 = vcombine.high %v5350_v12, %v5354_v35  ;;  %v5385_v21 = vcombine.low %v5350_v12, %v5354_v35 }
 0x192   :  { %2325 = vmatpush1.bf16.msra.mxu0 %v5315_v8  ;;  %2366 = vmatpush1.bf16.msra.mxu1 %v5317_v17  ;;  %v5357_v8 = vld [vmem:[%s7808_s3 + $0x490] sm:$0xff] }
 0x193   :  { %2326 = vmatprep.subr.bf16.mxu0 %v5324_v11  ;;  %2367 = vmatprep.subr.bf16.mxu1 %v5326_v18  ;;  %v5361_v17 = vld [vmem:[%s7808_s3 + $0x4b0] sm:$0xff]  ;;  %v5358_v11 = vld [vmem:[%s7808_s3 + $0x498] sm:$0xff] }
 0x194   :  { %v5362_v18 = vld [vmem:[%s7808_s3 + $0x4b8] sm:$0xff]  ;;  %v5392_v22 = vcombine.high %v5357_v8, %v5361_v17  ;;  %v5391_v62 = vcombine.low %v5357_v8, %v5361_v17 }
 0x195   :  { %v5394_v23 = vcombine.high %v5358_v11, %v5362_v18  ;;  %v5393_v63 = vcombine.low %v5358_v11, %v5362_v18  ;;  %v2814_v11 = vrot.slane %v6666_v2, 4 }
 0x196   :  { %2327 = vmatpush1.bf16.msra.mxu0 %v5323_v57  ;;  %2368 = vmatpush1.bf16.msra.mxu1 %v5325_v58  ;;  %v5365_v57 = vld [vmem:[%s7808_s3 + $0x4d0] sm:$0xff] }
 0x197   :  { %2328 = vmatprep.subr.bf16.mxu0 %v5332_v59  ;;  %2369 = vmatprep.subr.bf16.mxu1 %v5334_v61  ;;  %v5369_v58 = vld [vmem:[%s7808_s3 + $0x4f0] sm:$0xff]  ;;  %v5366_v59 = vld [vmem:[%s7808_s3 + $0x4d8] sm:$0xff] }
 0x198   :  { %v5370_v61 = vld [vmem:[%s7808_s3 + $0x4f8] sm:$0xff]  ;;  %v5400_v26 = vcombine.high %v5365_v57, %v5369_v58  ;;  %v5399_v33 = vcombine.low %v5365_v57, %v5369_v58 }
 0x199   :  { %v5402_v27 = vcombine.high %v5366_v59, %v5370_v61  ;;  %v5401_v34 = vcombine.low %v5366_v59, %v5370_v61 }
 0x19a   :  { %2329 = vmatpush1.bf16.msra.mxu0 %v5331_v0  ;;  %2370 = vmatpush1.bf16.msra.mxu1 %v5333_v28  ;;  %v5407_v0 = vld [vmem:[%s7808_s3 + $0x500] sm:$0xff] }
 0x19b   :  { %2608 = vmatprep.subr.bf16.mxu0 %v5372_v29  ;;  %2649 = vmatprep.subr.bf16.mxu1 %v5374_v30  ;;  %v5411_v28 = vld [vmem:[%s7808_s3 + $0x520] sm:$0xff]  ;;  %v5408_v29 = vld [vmem:[%s7808_s3 + $0x508] sm:$0xff] }
 0x19c   :  { %v5412_v30 = vld [vmem:[%s7808_s3 + $0x528] sm:$0xff]  ;;  %v5440_v36 = vcombine.high %v5407_v0, %v5411_v28  ;;  %v5439_v52 = vcombine.low %v5407_v0, %v5411_v28 }
 0x19d   :  { %5337 = vmatmul.mubr.msk.bf16.vlgmr.msra.gmra.mrb[68].mxu0 %vm1179_vm2, %v2076_v10  ;;  %5338 = vmatmul.mubr.msk.bf16.vlgmr.msra.gmra.mrb[68].mxu1 %vm1179_vm2, %v2076_v10  ;;  %v5353_v10 = vld [vmem:[%s7808_s3 + $0x470] sm:$0xff]  ;;  %v5442_v37 = vcombine.high %v5408_v29, %v5412_v30  ;;  %v5441_v40 = vcombine.low %v5408_v29, %v5412_v30 }
 0x19e   :  { %2609 = vmatpush1.bf16.msra.mxu0 %v5371_v3  ;;  %2650 = vmatpush1.bf16.msra.mxu1 %v5373_v48  ;;  %v5384_v15 = vcombine.high %v5349_v9, %v5353_v10  ;;  %v5383_v20 = vcombine.low %v5349_v9, %v5353_v10  ;;  %v5415_v3 = vld [vmem:[%s7808_s3 + $0x540] sm:$0xff] }
 0x19f   :  { %2610 = vmatprep.subr.bf16.mxu0 %v5380_v39  ;;  %2651 = vmatprep.subr.bf16.mxu1 %v5382_v51  ;;  %v5419_v48 = vld [vmem:[%s7808_s3 + $0x560] sm:$0xff]  ;;  %v5416_v39 = vld [vmem:[%s7808_s3 + $0x548] sm:$0xff] }
 0x1a0   :  { %2640 = vmatprep.mubr.bf16.mxu0 %v6167_v1  ;;  %2681 = vmatprep.mubr.bf16.mxu1 %v6167_v1  ;;  %v5420_v51 = vld [vmem:[%s7808_s3 + $0x568] sm:$0xff]  ;;  %v5448_v24 = vcombine.high %v5415_v3, %v5419_v48  ;;  %v5447_v46 = vcombine.low %v5415_v3, %v5419_v48 }
 0x1a1   :  { %v5450_v41 = vcombine.high %v5416_v39, %v5420_v51  ;;  %v5449_v16 = vcombine.low %v5416_v39, %v5420_v51 }
 0x1a2   :  { %2611 = vmatpush1.bf16.msra.mxu0 %v5379_v42  ;;  %2652 = vmatpush1.bf16.msra.mxu1 %v5381_v43  ;;  %v5423_v42 = vld [vmem:[%s7808_s3 + $0x580] sm:$0xff] }
 0x1a3   :  { %2612 = vmatprep.subr.bf16.mxu0 %v5388_v44  ;;  %2653 = vmatprep.subr.bf16.mxu1 %v5390_v45  ;;  %v5427_v43 = vld [vmem:[%s7808_s3 + $0x5a0] sm:$0xff]  ;;  %v5424_v44 = vld [vmem:[%s7808_s3 + $0x588] sm:$0xff] }
 0x1a4   :  { %v5428_v45 = vld [vmem:[%s7808_s3 + $0x5a8] sm:$0xff]  ;;  %v5456_v47 = vcombine.high %v5423_v42, %v5427_v43  ;;  %v5455_v55 = vcombine.low %v5423_v42, %v5427_v43 }
 0x1a5   :  { %v5458_v49 = vcombine.high %v5424_v44, %v5428_v45  ;;  %v5457_v56 = vcombine.low %v5424_v44, %v5428_v45 }
 0x1a6   :  { %2613 = vmatpush1.bf16.msra.mxu0 %v5387_v19  ;;  %2654 = vmatpush1.bf16.msra.mxu1 %v5389_v50  ;;  %v5431_v19 = vld [vmem:[%s7808_s3 + $0x5c0] sm:$0xff] }
 0x1a7   :  { %2614 = vmatprep.subr.bf16.mxu0 %v5396_v53  ;;  %2655 = vmatprep.subr.bf16.mxu1 %v5398_v54  ;;  %v5435_v50 = vld [vmem:[%s7808_s3 + $0x5e0] sm:$0xff]  ;;  %v5432_v53 = vld [vmem:[%s7808_s3 + $0x5c8] sm:$0xff] }
 0x1a8   :  { %v5436_v54 = vld [vmem:[%s7808_s3 + $0x5e8] sm:$0xff]  ;;  %v5464_v60 = vcombine.high %v5431_v19, %v5435_v50  ;;  %v5463_v9 = vcombine.low %v5431_v19, %v5435_v50 }
 0x1a9   :  { %v5466_v4 = vcombine.high %v5432_v53, %v5436_v54  ;;  %v5465_v10 = vcombine.low %v5432_v53, %v5436_v54 }
 0x1aa   :  { %2615 = vmatpush1.bf16.msra.mxu0 %v5395_v5  ;;  %2656 = vmatpush1.bf16.msra.mxu1 %v5397_v6  ;;  %v5409_v5 = vld [vmem:[%s7808_s3 + $0x510] sm:$0xff] }
 0x1ab   :  { %2690 = vmatprep.subr.bf16.mxu0 %v5376_v7  ;;  %2731 = vmatprep.subr.bf16.mxu1 %v5378_v32  ;;  %v5413_v6 = vld [vmem:[%s7808_s3 + $0x530] sm:$0xff]  ;;  %v5410_v7 = vld [vmem:[%s7808_s3 + $0x518] sm:$0xff] }
 0x1ac   :  { %v5414_v32 = vld [vmem:[%s7808_s3 + $0x538] sm:$0xff]  ;;  %v5444_v12 = vcombine.high %v5409_v5, %v5413_v6  ;;  %v5443_v8 = vcombine.low %v5409_v5, %v5413_v6 }
 0x1ad   :  { %5403 = vmatmul.mubr.msk.bf16.vlgmr.msra.gmra.mrb[72].mxu0 %vm1179_vm2, %v6666_v2  ;;  %5404 = vmatmul.mubr.msk.bf16.vlgmr.msra.gmra.mrb[72].mxu1 %vm1179_vm2, %v6666_v2  ;;  %v5446_v35 = vcombine.high %v5410_v7, %v5414_v32  ;;  %v5445_v17 = vcombine.low %v5410_v7, %v5414_v32 }
 0x1ae   :  { %2691 = vmatpush1.bf16.msra.mxu0 %v5375_v13  ;;  %2732 = vmatpush1.bf16.msra.mxu1 %v5377_v14  ;;  %v5417_v13 = vld [vmem:[%s7808_s3 + $0x550] sm:$0xff] }
 0x1af   :  { %2692 = vmatprep.subr.bf16.mxu0 %v5384_v15  ;;  %2733 = vmatprep.subr.bf16.mxu1 %v5386_v25  ;;  %v5421_v14 = vld [vmem:[%s7808_s3 + $0x570] sm:$0xff]  ;;  %v5418_v15 = vld [vmem:[%s7808_s3 + $0x558] sm:$0xff] }
 0x1b0   :  { %2722 = vmatprep.mubr.bf16.mxu0 %v6167_v1  ;;  %2763 = vmatprep.mubr.bf16.mxu1 %v6167_v1  ;;  %v5422_v25 = vld [vmem:[%s7808_s3 + $0x578] sm:$0xff]  ;;  %v5452_v18 = vcombine.high %v5417_v13, %v5421_v14  ;;  %v5451_v57 = vcombine.low %v5417_v13, %v5421_v14 }
 0x1b1   :  { %v5453_v58 = vcombine.low %v5418_v15, %v5422_v25 }
 0x1b2   :  { %2693 = vmatpush1.bf16.msra.mxu0 %v5383_v20  ;;  %2734 = vmatpush1.bf16.msra.mxu1 %v5385_v21  ;;  %v5454_v20 = vcombine.high %v5418_v15, %v5422_v25  ;;  %v5425_v21 = vld [vmem:[%s7808_s3 + $0x590] sm:$0xff] }
 0x1b3   :  { %2694 = vmatprep.subr.bf16.mxu0 %v5392_v22  ;;  %2735 = vmatprep.subr.bf16.mxu1 %v5394_v23  ;;  %v5429_v22 = vld [vmem:[%s7808_s3 + $0x5b0] sm:$0xff]  ;;  %v5426_v23 = vld [vmem:[%s7808_s3 + $0x598] sm:$0xff] }
 0x1b4   :  { %v5460_v59 = vcombine.high %v5425_v21, %v5429_v22  ;;  %v5459_v0 = vcombine.low %v5425_v21, %v5429_v22 }
 0x1b6   :  { %2695 = vmatpush1.bf16.msra.mxu0 %v5391_v62  ;;  %2736 = vmatpush1.bf16.msra.mxu1 %v5393_v63  ;;  %v5433_v62 = vld [vmem:[%s7808_s3 + $0x5d0] sm:$0xff] }
 0x1b7   :  { %2696 = vmatprep.subr.bf16.mxu0 %v5400_v26  ;;  %2737 = vmatprep.subr.bf16.mxu1 %v5402_v27  ;;  %v5437_v63 = vld [vmem:[%s7808_s3 + $0x5f0] sm:$0xff]  ;;  %v5434_v26 = vld [vmem:[%s7808_s3 + $0x5d8] sm:$0xff] }
 0x1b8   :  { %v5438_v27 = vld [vmem:[%s7808_s3 + $0x5f8] sm:$0xff]  ;;  %v5468_v29 = vcombine.high %v5433_v62, %v5437_v63  ;;  %v5467_v3 = vcombine.low %v5433_v62, %v5437_v63 }
 0x1b9   :  { %v5470_v30 = vcombine.high %v5434_v26, %v5438_v27  ;;  %v5469_v48 = vcombine.low %v5434_v26, %v5438_v27  ;;  %v5501_v27 = vld [vmem:[%s7808_s3 + $0x6d0] sm:$0xff] }
 0x1ba   :  { %2697 = vmatpush1.bf16.msra.mxu0 %v5399_v33  ;;  %2738 = vmatpush1.bf16.msra.mxu1 %v5401_v34  ;;  %v5475_v33 = vld [vmem:[%s7808_s3 + $0x600] sm:$0xff] }
 0x1bb   :  { %2978 = vmatprep.subr.bf16.mxu0 %v5440_v36  ;;  %3019 = vmatprep.subr.bf16.mxu1 %v5442_v37  ;;  %v5479_v34 = vld [vmem:[%s7808_s3 + $0x620] sm:$0xff]  ;;  %v5476_v36 = vld [vmem:[%s7808_s3 + $0x608] sm:$0xff] }
 0x1bc   :  { %v5480_v37 = vld [vmem:[%s7808_s3 + $0x628] sm:$0xff]  ;;  %v5508_v39 = vcombine.high %v5475_v33, %v5479_v34  ;;  %v5507_v42 = vcombine.low %v5475_v33, %v5479_v34 }
 0x1bd   :  { %5405 = vmatmul.mubr.msk.bf16.vlgmr.msra.gmra.mrb[76].mxu0 %vm1179_vm2, %v6666_v2  ;;  %5406 = vmatmul.mubr.msk.bf16.vlgmr.msra.gmra.mrb[76].mxu1 %vm1179_vm2, %v6666_v2  ;;  %v5430_v2 = vld [vmem:[%s7808_s3 + $0x5b8] sm:$0xff]  ;;  %v5510_v51 = vcombine.high %v5476_v36, %v5480_v37  ;;  %v5509_v43 = vcombine.low %v5476_v36, %v5480_v37  ;;  %v5543_v37 = vld [vmem:[%s7808_s3 + $0x700] sm:$0xff] }
 0x1be   :  { %2979 = vmatpush1.bf16.msra.mxu0 %v5439_v52  ;;  %3020 = vmatpush1.bf16.msra.mxu1 %v5441_v40  ;;  %v5462_v61 = vcombine.high %v5426_v23, %v5430_v2  ;;  %v5461_v28 = vcombine.low %v5426_v23, %v5430_v2  ;;  %v5483_v52 = vld [vmem:[%s7808_s3 + $0x640] sm:$0xff]  ;;  %v5493_v2 = vld [vmem:[%s7808_s3 + $0x690] sm:$0xff] }
 0x1bf   :  { %2980 = vmatprep.subr.bf16.mxu0 %v5448_v24  ;;  %3021 = vmatprep.subr.bf16.mxu1 %v5450_v41  ;;  %v5487_v40 = vld [vmem:[%s7808_s3 + $0x660] sm:$0xff]  ;;  %v5484_v24 = vld [vmem:[%s7808_s3 + $0x648] sm:$0xff] }
 0x1c0   :  { %3010 = vmatprep.mubr.bf16.mxu0 %v6167_v1  ;;  %3051 = vmatprep.mubr.bf16.mxu1 %v6167_v1  ;;  %v5488_v41 = vld [vmem:[%s7808_s3 + $0x668] sm:$0xff]  ;;  %v5516_v44 = vcombine.high %v5483_v52, %v5487_v40  ;;  %v5515_v19 = vcombine.low %v5483_v52, %v5487_v40 }
 0x1c1   :  { %v5518_v45 = vcombine.high %v5484_v24, %v5488_v41  ;;  %v5517_v50 = vcombine.low %v5484_v24, %v5488_v41  ;;  %v5551_v41 = vld [vmem:[%s7808_s3 + $0x740] sm:$0xff] }
 0x1c2   :  { %2981 = vmatpush1.bf16.msra.mxu0 %v5447_v46  ;;  %3022 = vmatpush1.bf16.msra.mxu1 %v5449_v16  ;;  %v5491_v46 = vld [vmem:[%s7808_s3 + $0x680] sm:$0xff] }
 0x1c3   :  { %2982 = vmatprep.subr.bf16.mxu0 %v5456_v47  ;;  %3023 = vmatprep.subr.bf16.mxu1 %v5458_v49  ;;  %v5495_v16 = vld [vmem:[%s7808_s3 + $0x6a0] sm:$0xff]  ;;  %v5492_v47 = vld [vmem:[%s7808_s3 + $0x688] sm:$0xff] }
 0x1c4   :  { %v5496_v49 = vld [vmem:[%s7808_s3 + $0x6a8] sm:$0xff]  ;;  %v5524_v53 = vcombine.high %v5491_v46, %v5495_v16  ;;  %v5523_v5 = vcombine.low %v5491_v46, %v5495_v16 }
 0x1c5   :  { %v5526_v54 = vcombine.high %v5492_v47, %v5496_v49  ;;  %v5525_v6 = vcombine.low %v5492_v47, %v5496_v49  ;;  %v5559_v49 = vld [vmem:[%s7808_s3 + $0x780] sm:$0xff] }
 0x1c6   :  { %2983 = vmatpush1.bf16.msra.mxu0 %v5455_v55  ;;  %3024 = vmatpush1.bf16.msra.mxu1 %v5457_v56  ;;  %v5499_v55 = vld [vmem:[%s7808_s3 + $0x6c0] sm:$0xff] }
 0x1c7   :  { %2984 = vmatprep.subr.bf16.mxu0 %v5464_v60  ;;  %3025 = vmatprep.subr.bf16.mxu1 %v5466_v4  ;;  %v5503_v56 = vld [vmem:[%s7808_s3 + $0x6e0] sm:$0xff]  ;;  %v5500_v60 = vld [vmem:[%s7808_s3 + $0x6c8] sm:$0xff] }
 0x1c8   :  { %v5504_v4 = vld [vmem:[%s7808_s3 + $0x6e8] sm:$0xff]  ;;  %v5532_v7 = vcombine.high %v5499_v55, %v5503_v56  ;;  %v5531_v13 = vcombine.low %v5499_v55, %v5503_v56 }
 0x1c9   :  { %v5534_v32 = vcombine.high %v5500_v60, %v5504_v4  ;;  %v5533_v14 = vcombine.low %v5500_v60, %v5504_v4  ;;  %v5567_v4 = vld [vmem:[%s7808_s3 + $0x7c0] sm:$0xff] }
 0x1ca   :  { %2985 = vmatpush1.bf16.msra.mxu0 %v5463_v9  ;;  %3026 = vmatpush1.bf16.msra.mxu1 %v5465_v10  ;;  %v5477_v9 = vld [vmem:[%s7808_s3 + $0x610] sm:$0xff] }
 0x1cb   :  { %3060 = vmatprep.subr.bf16.mxu0 %v5444_v12  ;;  %3101 = vmatprep.subr.bf16.mxu1 %v5446_v35  ;;  %v5481_v10 = vld [vmem:[%s7808_s3 + $0x630] sm:$0xff]  ;;  %v5478_v12 = vld [vmem:[%s7808_s3 + $0x618] sm:$0xff] }
 0x1cc   :  { %v5482_v35 = vld [vmem:[%s7808_s3 + $0x638] sm:$0xff]  ;;  %v5512_v15 = vcombine.high %v5477_v9, %v5481_v10 }
 0x1cd   :  { %5471 = vmatmul.mubr.msk.bf16.vlgmr.msra.gmra.mrb[80].mxu0 %vm1179_vm2, %v2814_v11  ;;  %5472 = vmatmul.mubr.msk.bf16.vlgmr.msra.gmra.mrb[80].mxu1 %vm1179_vm2, %v2814_v11  ;;  %v5514_v25 = vcombine.high %v5478_v12, %v5482_v35  ;;  %v5513_v21 = vcombine.low %v5478_v12, %v5482_v35 }
 0x1ce   :  { %3061 = vmatpush1.bf16.msra.mxu0 %v5443_v8  ;;  %3102 = vmatpush1.bf16.msra.mxu1 %v5445_v17  ;;  %v5485_v8 = vld [vmem:[%s7808_s3 + $0x650] sm:$0xff] }
 0x1cf   :  { %3062 = vmatprep.subr.bf16.mxu0 %v5452_v18  ;;  %3103 = vmatprep.subr.bf16.mxu1 %v5454_v20  ;;  %v5489_v17 = vld [vmem:[%s7808_s3 + $0x670] sm:$0xff]  ;;  %v5490_v18 = vld [vmem:[%s7808_s3 + $0x678] sm:$0xff]  ;;  %v5511_v20 = vcombine.low %v5477_v9, %v5481_v10  ;;  %v5572_v9 = vld [vmem:[%s7808_s3 + $0x7e8] sm:$0xff] }
 0x1d0   :  { %3092 = vmatprep.mubr.bf16.mxu0 %v6167_v1  ;;  %3133 = vmatprep.mubr.bf16.mxu1 %v6167_v1  ;;  %v5520_v22 = vcombine.high %v5485_v8, %v5489_v17 }
 0x1d2   :  { %3063 = vmatpush1.bf16.msra.mxu0 %v5451_v57  ;;  %3104 = vmatpush1.bf16.msra.mxu1 %v5453_v58  ;;  %v5497_v57 = vld [vmem:[%s7808_s3 + $0x6b0] sm:$0xff]  ;;  %v5494_v58 = vld [vmem:[%s7808_s3 + $0x698] sm:$0xff] }
 0x1d3   :  { %3064 = vmatprep.subr.bf16.mxu0 %v5460_v59  ;;  %3105 = vmatprep.subr.bf16.mxu1 %v5462_v61  ;;  %v5498_v59 = vld [vmem:[%s7808_s3 + $0x6b8] sm:$0xff]  ;;  %v5519_v61 = vcombine.low %v5485_v8, %v5489_v17  ;;  %v5528_v63 = vcombine.high %v5493_v2, %v5497_v57 }
 0x1d4   :  { %v5530_v26 = vcombine.high %v5494_v58, %v5498_v59  ;;  %v5529_v33 = vcombine.low %v5494_v58, %v5498_v59  ;;  %v5553_v59 = vld [vmem:[%s7808_s3 + $0x750] sm:$0xff] }
 0x1d6   :  { %3065 = vmatpush1.bf16.msra.mxu0 %v5459_v0  ;;  %3106 = vmatpush1.bf16.msra.mxu1 %v5461_v28  ;;  %v5505_v0 = vld [vmem:[%s7808_s3 + $0x6f0] sm:$0xff]  ;;  %v5502_v28 = vld [vmem:[%s7808_s3 + $0x6d8] sm:$0xff] }
 0x1d7   :  { %3066 = vmatprep.subr.bf16.mxu0 %v5468_v29  ;;  %3107 = vmatprep.subr.bf16.mxu1 %v5470_v30  ;;  %v5506_v29 = vld [vmem:[%s7808_s3 + $0x6f8] sm:$0xff]  ;;  %v5527_v30 = vcombine.low %v5493_v2, %v5497_v57  ;;  %v5536_v34 = vcombine.high %v5501_v27, %v5505_v0 }
 0x1d8   :  { %v5538_v36 = vcombine.high %v5502_v28, %v5506_v29  ;;  %v5537_v52 = vcombine.low %v5502_v28, %v5506_v29 }
 0x1da   :  { %3067 = vmatpush1.bf16.msra.mxu0 %v5467_v3  ;;  %3108 = vmatpush1.bf16.msra.mxu1 %v5469_v48  ;;  %v5547_v3 = vld [vmem:[%s7808_s3 + $0x720] sm:$0xff]  ;;  %v5544_v48 = vld [vmem:[%s7808_s3 + $0x708] sm:$0xff] }
 0x1db   :  { %3346 = vmatprep.subr.bf16.mxu0 %v5508_v39  ;;  %3387 = vmatprep.subr.bf16.mxu1 %v5510_v51  ;;  %v5548_v39 = vld [vmem:[%s7808_s3 + $0x728] sm:$0xff]  ;;  %v5535_v51 = vcombine.low %v5501_v27, %v5505_v0  ;;  %v5576_v40 = vcombine.high %v5543_v37, %v5547_v3  ;;  %v7380_v0 = vrot.slane %v6700_v31, 4 }
 0x1dc   :  { %v5578_v24 = vcombine.high %v5544_v48, %v5548_v39  ;;  %v5577_v46 = vcombine.low %v5544_v48, %v5548_v39  ;;  %v5569_v39 = vld [vmem:[%s7808_s3 + $0x7d0] sm:$0xff] }
 0x1dd   :  { %5473 = vmatmul.mubr.msk.bf16.vlgmr.msra.gmra.mrb[84].mxu0 %vm1179_vm2, %v2814_v11  ;;  %5474 = vmatmul.mubr.msk.bf16.vlgmr.msra.gmra.mrb[84].mxu1 %vm1179_vm2, %v2814_v11  ;;  %v5486_v11 = vld [vmem:[%s7808_s3 + $0x658] sm:$0xff] }
 0x1de   :  { %3347 = vmatpush1.bf16.msra.mxu0 %v5507_v42  ;;  %3388 = vmatpush1.bf16.msra.mxu1 %v5509_v43  ;;  %v5522_v23 = vcombine.high %v5486_v11, %v5490_v18  ;;  %v5521_v62 = vcombine.low %v5486_v11, %v5490_v18  ;;  %v5555_v42 = vld [vmem:[%s7808_s3 + $0x760] sm:$0xff]  ;;  %v5552_v43 = vld [vmem:[%s7808_s3 + $0x748] sm:$0xff]  ;;  %v5545_v18 = vld [vmem:[%s7808_s3 + $0x710] sm:$0xff] }
 0x1df   :  { %3348 = vmatprep.subr.bf16.mxu0 %v5516_v44  ;;  %3389 = vmatprep.subr.bf16.mxu1 %v5518_v45  ;;  %v5556_v44 = vld [vmem:[%s7808_s3 + $0x768] sm:$0xff]  ;;  %v5575_v45 = vcombine.low %v5543_v37, %v5547_v3  ;;  %v5584_v16 = vcombine.high %v5551_v41, %v5555_v42 }
 0x1e0   :  { %3378 = vmatprep.mubr.bf16.mxu0 %v6167_v1  ;;  %3419 = vmatprep.mubr.bf16.mxu1 %v6167_v1  ;;  %v5586_v47 = vcombine.high %v5552_v43, %v5556_v44  ;;  %v5585_v55 = vcombine.low %v5552_v43, %v5556_v44 }
 0x1e2   :  { %3349 = vmatpush1.bf16.msra.mxu0 %v5515_v19  ;;  %3390 = vmatpush1.bf16.msra.mxu1 %v5517_v50  ;;  %v5563_v19 = vld [vmem:[%s7808_s3 + $0x7a0] sm:$0xff]  ;;  %v5560_v50 = vld [vmem:[%s7808_s3 + $0x788] sm:$0xff] }
 0x1e3   :  { %3350 = vmatprep.subr.bf16.mxu0 %v5524_v53  ;;  %3391 = vmatprep.subr.bf16.mxu1 %v5526_v54  ;;  %v5564_v53 = vld [vmem:[%s7808_s3 + $0x7a8] sm:$0xff]  ;;  %v5583_v54 = vcombine.low %v5551_v41, %v5555_v42  ;;  %v5592_v56 = vcombine.high %v5559_v49, %v5563_v19  ;;  %v5574_v41 = vld [vmem:[%s7808_s3 + $0x7f8] sm:$0xff] }
 0x1e4   :  { %v5594_v60 = vcombine.high %v5560_v50, %v5564_v53 }
 0x1e6   :  { %3351 = vmatpush1.bf16.msra.mxu0 %v5523_v5  ;;  %3392 = vmatpush1.bf16.msra.mxu1 %v5525_v6 }
 0x1e7   :  { %3352 = vmatprep.subr.bf16.mxu0 %v5532_v7  ;;  %3393 = vmatprep.subr.bf16.mxu1 %v5534_v32  ;;  %v5571_v7 = vld [vmem:[%s7808_s3 + $0x7e0] sm:$0xff]  ;;  %v5568_v32 = vld [vmem:[%s7808_s3 + $0x7c8] sm:$0xff] }
 0x1e8   :  { %v5600_v17 = vcombine.high %v5567_v4, %v5571_v7  ;;  %v5602_v11 = vcombine.high %v5568_v32, %v5572_v9  ;;  %v5601_v2 = vcombine.low %v5568_v32, %v5572_v9  ;;  %v5619_v9 = vld [vmem:[%s7808_s3 + $0x840] sm:$0xff] }
 0x1ea   :  { %3353 = vmatpush1.bf16.msra.mxu0 %v5531_v13  ;;  %3394 = vmatpush1.bf16.msra.mxu1 %v5533_v14  ;;  %v5591_v14 = vcombine.low %v5559_v49, %v5563_v19 }
 0x1eb   :  { %3428 = vmatprep.subr.bf16.mxu0 %v5512_v15  ;;  %3469 = vmatprep.subr.bf16.mxu1 %v5514_v25  ;;  %v5593_v15 = vcombine.low %v5560_v50, %v5564_v53  ;;  %v5611_v53 = vld [vmem:[%s7808_s3 + $0x800] sm:$0xff] }
 0x1ed   :  { %5539 = vmatmul.mubr.msk.bf16.vlgmr.msra.gmra.mrb[88].mxu0 %vm1179_vm2, %v6700_v31  ;;  %5540 = vmatmul.mubr.msk.bf16.vlgmr.msra.gmra.mrb[88].mxu1 %vm1179_vm2, %v6700_v31 }
 0x1ee   :  { %3429 = vmatpush1.bf16.msra.mxu0 %v5511_v20  ;;  %3470 = vmatpush1.bf16.msra.mxu1 %v5513_v21  ;;  %v5549_v20 = vld [vmem:[%s7808_s3 + $0x730] sm:$0xff]  ;;  %v5546_v21 = vld [vmem:[%s7808_s3 + $0x718] sm:$0xff] }
 0x1ef   :  { %3430 = vmatprep.subr.bf16.mxu0 %v5520_v22  ;;  %3471 = vmatprep.subr.bf16.mxu1 %v5522_v23  ;;  %v5550_v22 = vld [vmem:[%s7808_s3 + $0x738] sm:$0xff]  ;;  %v5599_v23 = vcombine.low %v5567_v4, %v5571_v7  ;;  %v5580_v57 = vcombine.high %v5545_v18, %v5549_v20 }
 0x1f0   :  { %3460 = vmatprep.mubr.bf16.mxu0 %v6167_v1  ;;  %3501 = vmatprep.mubr.bf16.mxu1 %v6167_v1  ;;  %v5582_v58 = vcombine.high %v5546_v21, %v5550_v22  ;;  %v5581_v27 = vcombine.low %v5546_v21, %v5550_v22  ;;  %v5632_v21 = vld [vmem:[%s7808_s3 + $0x8a8] sm:$0xff] }
 0x1f2   :  { %3431 = vmatpush1.bf16.msra.mxu0 %v5519_v61  ;;  %3472 = vmatpush1.bf16.msra.mxu1 %v5521_v62  ;;  %v5557_v61 = vld [vmem:[%s7808_s3 + $0x770] sm:$0xff]  ;;  %v5554_v62 = vld [vmem:[%s7808_s3 + $0x758] sm:$0xff] }
 0x1f3   :  { %3432 = vmatprep.subr.bf16.mxu0 %v5528_v63  ;;  %3473 = vmatprep.subr.bf16.mxu1 %v5530_v26  ;;  %v5558_v63 = vld [vmem:[%s7808_s3 + $0x778] sm:$0xff]  ;;  %v5579_v26 = vcombine.low %v5545_v18, %v5549_v20  ;;  %v5588_v28 = vcombine.high %v5553_v59, %v5557_v61  ;;  %v5631_v18 = vld [vmem:[%s7808_s3 + $0x8a0] sm:$0xff]  ;;  %v5628_v20 = vld [vmem:[%s7808_s3 + $0x888] sm:$0xff] }
 0x1f4   :  { %v5590_v29 = vcombine.high %v5554_v62, %v5558_v63  ;;  %v5589_v37 = vcombine.low %v5554_v62, %v5558_v63  ;;  %v5639_v62 = vld [vmem:[%s7808_s3 + $0x8e0] sm:$0xff]  ;;  %v5636_v63 = vld [vmem:[%s7808_s3 + $0x8c8] sm:$0xff] }
 0x1f6   :  { %3433 = vmatpush1.bf16.msra.mxu0 %v5527_v30  ;;  %3474 = vmatpush1.bf16.msra.mxu1 %v5529_v33  ;;  %v5561_v30 = vld [vmem:[%s7808_s3 + $0x790] sm:$0xff] }
 0x1f7   :  { %3434 = vmatprep.subr.bf16.mxu0 %v5536_v34  ;;  %3475 = vmatprep.subr.bf16.mxu1 %v5538_v36  ;;  %v5565_v33 = vld [vmem:[%s7808_s3 + $0x7b0] sm:$0xff]  ;;  %v5562_v34 = vld [vmem:[%s7808_s3 + $0x798] sm:$0xff]  ;;  %v5587_v36 = vcombine.low %v5553_v59, %v5557_v61 }
 0x1f8   :  { %v5596_v3 = vcombine.high %v5561_v30, %v5565_v33 }
 0x1fa   :  { %3435 = vmatpush1.bf16.msra.mxu0 %v5535_v51  ;;  %3476 = vmatpush1.bf16.msra.mxu1 %v5537_v52 }
 0x1fb   :  { %3716 = vmatprep.subr.bf16.mxu0 %v5576_v40  ;;  %3757 = vmatprep.subr.bf16.mxu1 %v5578_v24  ;;  %v5573_v40 = vld [vmem:[%s7808_s3 + $0x7f0] sm:$0xff]  ;;  %v5570_v24 = vld [vmem:[%s7808_s3 + $0x7d8] sm:$0xff] }
 0x1fc   :  { %v5604_v19 = vcombine.high %v5569_v39, %v5573_v40  ;;  %v5606_v50 = vcombine.high %v5570_v24, %v5574_v41  ;;  %v5605_v4 = vcombine.low %v5570_v24, %v5574_v41 }
 0x1fd   :  { %5541 = vmatmul.mubr.msk.bf16.vlgmr.msra.gmra.mrb[92].mxu0 %vm1179_vm2, %v6700_v31  ;;  %5542 = vmatmul.mubr.msk.bf16.vlgmr.msra.gmra.mrb[92].mxu1 %vm1179_vm2, %v6700_v31  ;;  %v5566_v31 = vld [vmem:[%s7808_s3 + $0x7b8] sm:$0xff] }
 0x1fe   :  { %3717 = vmatpush1.bf16.msra.mxu0 %v5575_v45  ;;  %3758 = vmatpush1.bf16.msra.mxu1 %v5577_v46  ;;  %v5598_v48 = vcombine.high %v5562_v34, %v5566_v31  ;;  %v5595_v46 = vcombine.low %v5561_v30, %v5565_v33 }
 0x1ff   :  { %3718 = vmatprep.subr.bf16.mxu0 %v5584_v16  ;;  %3759 = vmatprep.subr.bf16.mxu1 %v5586_v47  ;;  %v5597_v16 = vcombine.low %v5562_v34, %v5566_v31 }
 0x200   :  { %v7336_v5 = vpop.f32.mrb[40].mxu0  ;;  %v7338_v6 = vpop.f32.mrb[40].mxu1  ;;  %3748 = vmatprep.mubr.bf16.mxu0 %v6167_v1  ;;  %3789 = vmatprep.mubr.bf16.mxu1 %v6167_v1 }
 0x201   :  { %v7351_v10 = vpop.f32.mrb[41].mxu0  ;;  %v7353_v12 = vpop.f32.mrb[41].mxu1 }
 0x202   :  { %3719 = vmatpush1.bf16.msra.mxu0 %v5583_v54  ;;  %3760 = vmatpush1.bf16.msra.mxu1 %v5585_v55  ;;  %v1221_v35 = vpop.f32.mrb[42].mxu0  ;;  %v1262_v13 = vpop.f32.mrb[42].mxu1  ;;  %v5615_v54 = vld [vmem:[%s7808_s3 + $0x820] sm:$0xff]  ;;  %v5612_v55 = vld [vmem:[%s7808_s3 + $0x808] sm:$0xff] }
 0x203   :  { %v1222_v25 = vpop.f32.mrb[43].mxu0  ;;  %v1263_v8 = vpop.f32.mrb[43].mxu1  ;;  %3720 = vmatprep.subr.bf16.mxu0 %v5592_v56  ;;  %3761 = vmatprep.subr.bf16.mxu1 %v5594_v60  ;;  %v5616_v56 = vld [vmem:[%s7808_s3 + $0x828] sm:$0xff]  ;;  %v5603_v60 = vcombine.low %v5569_v39, %v5573_v40  ;;  %v5644_v7 = vcombine.high %v5611_v53, %v5615_v54  ;;  %v5623_v35 = vld [vmem:[%s7808_s3 + $0x860] sm:$0xff]  ;;  %v5613_v39 = vld [vmem:[%s7808_s3 + $0x810] sm:$0xff] }
 0x204   :  { %v5646_v32 = vcombine.high %v5612_v55, %v5616_v56  ;;  %v5620_v13 = vld [vmem:[%s7808_s3 + $0x848] sm:$0xff]  ;;  %v5645_v25 = vcombine.low %v5612_v55, %v5616_v56  ;;  %v5652_v8 = vcombine.high %v5619_v9, %v5623_v35  ;;  %v5651_v22 = vcombine.low %v5619_v9, %v5623_v35  ;;  %v5618_v40 = vld [vmem:[%s7808_s3 + $0x838] sm:$0xff]  ;;  %v5629_v56 = vld [vmem:[%s7808_s3 + $0x890] sm:$0xff] }
 0x206   :  { %3721 = vmatpush1.bf16.msra.mxu0 %v5591_v14  ;;  %3762 = vmatpush1.bf16.msra.mxu1 %v5593_v15  ;;  %v5624_v14 = vld [vmem:[%s7808_s3 + $0x868] sm:$0xff]  ;;  %v5643_v15 = vcombine.low %v5611_v53, %v5615_v54 }
 0x207   :  { %3722 = vmatprep.subr.bf16.mxu0 %v5600_v17  ;;  %3763 = vmatprep.subr.bf16.mxu1 %v5602_v11  ;;  %v5654_v17 = vcombine.high %v5620_v13, %v5624_v14  ;;  %v5627_v11 = vld [vmem:[%s7808_s3 + $0x880] sm:$0xff] }
 0x208   :  { %v5659_v30 = vcombine.low %v5627_v11, %v5631_v18 }
 0x20a   :  { %3723 = vmatpush1.bf16.msra.mxu0 %v5599_v23  ;;  %3764 = vmatpush1.bf16.msra.mxu1 %v5601_v2  ;;  %v5653_v23 = vcombine.low %v5620_v13, %v5624_v14  ;;  %v5660_v2 = vcombine.high %v5627_v11, %v5631_v18  ;;  %v5637_v14 = vld [vmem:[%s7808_s3 + $0x8d0] sm:$0xff]  ;;  %v5642_v11 = vld [vmem:[%s7808_s3 + $0x8f8] sm:$0xff] }
 0x20b   :  { %3798 = vmatprep.subr.bf16.mxu0 %v5580_v57  ;;  %3839 = vmatprep.subr.bf16.mxu1 %v5582_v58  ;;  %v5662_v57 = vcombine.high %v5628_v20, %v5632_v21  ;;  %v5635_v58 = vld [vmem:[%s7808_s3 + $0x8c0] sm:$0xff] }
 0x20c   :  { %v5667_v24 = vcombine.low %v5635_v58, %v5639_v62 }
 0x20d   :  { %5607 = vmatmul.mubr.msk.bf16.vlgmr.msra.gmra.mrb[96].mxu0 %vm1179_vm2, %v7380_v0  ;;  %5608 = vmatmul.mubr.msk.bf16.vlgmr.msra.gmra.mrb[96].mxu1 %vm1179_vm2, %v7380_v0 }
 0x20e   :  { %3799 = vmatpush1.bf16.msra.mxu0 %v5579_v26  ;;  %3840 = vmatpush1.bf16.msra.mxu1 %v5581_v27  ;;  %v5640_v26 = vld [vmem:[%s7808_s3 + $0x8e8] sm:$0xff] }
 0x20f   :  { %3800 = vmatprep.subr.bf16.mxu0 %v5588_v28  ;;  %3841 = vmatprep.subr.bf16.mxu1 %v5590_v29  ;;  %v5669_v41 = vcombine.low %v5636_v63, %v5640_v26 }
 0x210   :  { %v7401_v51 = vpop.f32.mrb[44].mxu0  ;;  %v7403_v52 = vpop.f32.mrb[44].mxu1  ;;  %3830 = vmatprep.mubr.bf16.mxu0 %v6167_v1  ;;  %3871 = vmatprep.mubr.bf16.mxu1 %v6167_v1 }
 0x211   :  { %v7416_v42 = vpop.f32.mrb[45].mxu0  ;;  %v7418_v43 = vpop.f32.mrb[45].mxu1 }
 0x212   :  { %v1303_v44 = vpop.f32.mrb[46].mxu0  ;;  %v1344_v45 = vpop.f32.mrb[46].mxu1  ;;  %3801 = vmatpush1.bf16.msra.mxu0 %v5587_v36  ;;  %3842 = vmatpush1.bf16.msra.mxu1 %v5589_v37  ;;  %v5661_v37 = vcombine.low %v5628_v20, %v5632_v21 }
 0x213   :  { %v1304_v47 = vpop.f32.mrb[47].mxu0  ;;  %v1345_v49 = vpop.f32.mrb[47].mxu1  ;;  %3802 = vmatprep.subr.bf16.mxu0 %v5596_v3  ;;  %3843 = vmatprep.subr.bf16.mxu1 %v5598_v48  ;;  %v5670_v48 = vcombine.high %v5636_v63, %v5640_v26  ;;  %v946_v44 = vmax.f32 %v6703_v38, 0.0  ;;  %v5626_v38 = vld [vmem:[%s7808_s3 + $0x878] sm:$0xff] }
 0x214   :  { %v5625_v47 = vld [vmem:[%s7808_s3 + $0x870] sm:$0xff]  ;;  %v5622_v49 = vld [vmem:[%s7808_s3 + $0x858] sm:$0xff] }
 0x215   :  { %v951_v53 = vpack.c.bf16 %v946_v44, %v946_v44  ;;  %v5658_v55 = vcombine.high %v5622_v49, %v5626_v38  ;;  %v5657_v9 = vcombine.low %v5622_v49, %v5626_v38 }
 0x216   :  { %3803 = vmatpush1.bf16.msra.mxu0 %v5595_v46  ;;  %3844 = vmatpush1.bf16.msra.mxu1 %v5597_v16  ;;  %v5621_v16 = vld [vmem:[%s7808_s3 + $0x850] sm:$0xff] }
 0x217   :  { %3804 = vmatprep.subr.bf16.mxu0 %v5604_v19  ;;  %3845 = vmatprep.subr.bf16.mxu1 %v5606_v50  ;;  %v5656_v54 = vcombine.high %v5621_v16, %v5625_v47 }
 0x21a   :  { %3805 = vmatpush1.bf16.msra.mxu0 %v5603_v60  ;;  %3846 = vmatpush1.bf16.msra.mxu1 %v5605_v4  ;;  %v5633_v60 = vld [vmem:[%s7808_s3 + $0x8b0] sm:$0xff]  ;;  %v5630_v4 = vld [vmem:[%s7808_s3 + $0x898] sm:$0xff] }
 0x21b   :  { %4084 = vmatprep.subr.bf16.mxu0 %v5644_v7  ;;  %4125 = vmatprep.subr.bf16.mxu1 %v5646_v32  ;;  %v5634_v7 = vld [vmem:[%s7808_s3 + $0x8b8] sm:$0xff]  ;;  %v5655_v32 = vcombine.low %v5621_v16, %v5625_v47  ;;  %v5664_v35 = vcombine.high %v5629_v56, %v5633_v60 }
 0x21c   :  { %v5666_v13 = vcombine.high %v5630_v4, %v5634_v7 }
 0x21d   :  { %5609 = vmatmul.mubr.msk.bf16.vlgmr.msra.gmra.mrb[100].mxu0 %vm1179_vm2, %v7380_v0  ;;  %5610 = vmatmul.mubr.msk.bf16.vlgmr.msra.gmra.mrb[100].mxu1 %vm1179_vm2, %v7380_v0 }
 0x21e   :  { %4085 = vmatpush1.bf16.msra.mxu0 %v5643_v15  ;;  %4126 = vmatpush1.bf16.msra.mxu1 %v5645_v25 }
 0x21f   :  { %4086 = vmatprep.subr.bf16.mxu0 %v5652_v8  ;;  %4127 = vmatprep.subr.bf16.mxu1 %v5654_v17  ;;  %v5641_v8 = vld [vmem:[%s7808_s3 + $0x8f0] sm:$0xff]  ;;  %v5638_v17 = vld [vmem:[%s7808_s3 + $0x8d8] sm:$0xff] }
 0x220   :  { %v1544_v59 = vpop.f32.mrb[48].mxu0  ;;  %v1585_v61 = vpop.f32.mrb[48].mxu1  ;;  %4116 = vmatprep.mubr.bf16.mxu0 %v6167_v1  ;;  %4157 = vmatprep.mubr.bf16.mxu1 %v6167_v1  ;;  %v5673_v26 = vcombine.low %v5638_v17, %v5642_v11 }
 0x221   :  { %v7475_v27 = vadd.f32 %v1544_v59, %v7336_v5  ;;  %v7478_v0 = vadd.f32 %v1585_v61, %v7338_v6  ;;  %v1546_v28 = vpop.f32.mrb[49].mxu0  ;;  %v1587_v29 = vpop.f32.mrb[49].mxu1  ;;  %v5668_v6 = vcombine.high %v5635_v58, %v5639_v62  ;;  %v5665_v61 = vcombine.low %v5630_v4, %v5634_v7  ;;  %v6101_v4 = vld [vmem:[%s7810_s5 + $0x40] sm:$0xff]  }
 0x222   :  { %v7481_v33 = vadd.f32 %v1546_v28, %v7351_v10  ;;  %v7484_v34 = vadd.f32 %v1587_v29, %v7353_v12  ;;  %v1548_v31 = vpop.f32.mrb[50].mxu0  ;;  %v1589_v36 = vpop.f32.mrb[50].mxu1  ;;  %4087 = vmatpush1.bf16.msra.mxu0 %v5651_v22  ;;  %4128 = vmatpush1.bf16.msra.mxu1 %v5653_v23  ;;  %v5617_v10 = vld [vmem:[%s7808_s3 + $0x830] sm:$0xff]  ;;  %v5614_v12 = vld [vmem:[%s7808_s3 + $0x818] sm:$0xff]  ;;  %v5663_v23 = vcombine.low %v5629_v56, %v5633_v60  ;;  %v6102_v7 = vld [vmem:[%s7810_s5 + $0xc0] sm:$0xff]  }
 0x223   :  { %v1549_v3 = vpop.f32.mrb[51].mxu0  ;;  %v1590_v5 = vpop.f32.mrb[51].mxu1  ;;  %4088 = vmatprep.subr.bf16.mxu0 %v5660_v2  ;;  %4129 = vmatprep.subr.bf16.mxu1 %v5662_v57  ;;  %v5648_v45 = vcombine.high %v5613_v39, %v5617_v10  ;;  %v5650_v46 = vcombine.high %v5614_v12, %v5618_v40  ;;  %v5647_v19 = vcombine.low %v5613_v39, %v5617_v10 }
 0x224   :  { %v5649_v50 = vcombine.low %v5614_v12, %v5618_v40 }
 0x226   :  { %4089 = vmatpush1.bf16.msra.mxu0 %v5659_v30  ;;  %4130 = vmatpush1.bf16.msra.mxu1 %v5661_v37 }
 0x227   :  { %4090 = vmatprep.subr.bf16.mxu0 %v5668_v6  ;;  %4131 = vmatprep.subr.bf16.mxu1 %v5670_v48 }
 0x22a   :  { %4091 = vmatpush1.bf16.msra.mxu0 %v5667_v24  ;;  %4132 = vmatpush1.bf16.msra.mxu1 %v5669_v41 }
 0x22b   :  { %4166 = vmatprep.subr.bf16.mxu0 %v5648_v45  ;;  %4207 = vmatprep.subr.bf16.mxu1 %v5650_v46 }
 0x22d   :  { %5675 = vmatmul.mubr.msk.bf16.vlgmr.msra.gmra.mrb[104].mxu0 %vm1179_vm2, %v951_v53  ;;  %5676 = vmatmul.mubr.msk.bf16.vlgmr.msra.gmra.mrb[104].mxu1 %vm1179_vm2, %v951_v53 }
 0x22e   :  { %4167 = vmatpush1.bf16.msra.mxu0 %v5647_v19  ;;  %4208 = vmatpush1.bf16.msra.mxu1 %v5649_v50 }
 0x22f   :  { %4168 = vmatprep.subr.bf16.mxu0 %v5656_v54  ;;  %4209 = vmatprep.subr.bf16.mxu1 %v5658_v55 }
 0x230   :  { %v1626_v15 = vpop.f32.mrb[52].mxu0  ;;  %v1667_v25 = vpop.f32.mrb[52].mxu1  ;;  %4198 = vmatprep.mubr.bf16.mxu0 %v6167_v1  ;;  %4239 = vmatprep.mubr.bf16.mxu1 %v6167_v1  ;;  %v5672_v1 = vcombine.high %v5637_v14, %v5641_v8 }
 0x231   :  { %v1627_v18 = vadd.f32 %v1626_v15, %v7401_v51  ;;  %v1668_v20 = vadd.f32 %v1667_v25, %v7403_v52  ;;  %v1628_v21 = vpop.f32.mrb[53].mxu0  ;;  %v1669_v22 = vpop.f32.mrb[53].mxu1  ;;  %v5674_v51 = vcombine.high %v5638_v17, %v5642_v11  ;;  %v5671_v52 = vcombine.low %v5637_v14, %v5641_v8  ;;  %v6107_v14 = vld [vmem:[%s7810_s5 + $0x8] sm:$0xff]   ;;  %v6109_v17 = vld [vmem:[%s7810_s5 + $0x50] sm:$0xff]  }
 0x232   :  { %v1629_v2 = vadd.f32 %v1628_v21, %v7416_v42  ;;  %v1670_v57 = vadd.f32 %v1669_v22, %v7418_v43  ;;  %v1630_v58 = vpop.f32.mrb[54].mxu0  ;;  %v1671_v59 = vpop.f32.mrb[54].mxu1  ;;  %4169 = vmatpush1.bf16.msra.mxu0 %v5655_v32  ;;  %4210 = vmatpush1.bf16.msra.mxu1 %v5657_v9  ;;  %v6103_v32 = vld [vmem:[%s7810_s5] sm:$0xff]   ;;  %v6108_v15 = vld [vmem:[%s7810_s5 + $0x88] sm:$0xff]   ;;  %v6110_v11 = vld [vmem:[%s7810_s5 + $0xd0] sm:$0xff]  }
 0x233   :  { %v1631_v62 = vpop.f32.mrb[55].mxu0  ;;  %v1672_v63 = vpop.f32.mrb[55].mxu1  ;;  %4170 = vmatprep.subr.bf16.mxu0 %v5664_v35  ;;  %4211 = vmatprep.subr.bf16.mxu1 %v5666_v13  ;;  %v6104_v9 = vld [vmem:[%s7810_s5 + $0x80] sm:$0xff]   ;;  %v6105_v35 = vld [vmem:[%s7810_s5 + $0x48] sm:$0xff]  }
 0x234   :  { %v6106_v13 = vld [vmem:[%s7810_s5 + $0xc8] sm:$0xff]  }
 0x236   :  { %4171 = vmatpush1.bf16.msra.mxu0 %v5663_v23  ;;  %4212 = vmatpush1.bf16.msra.mxu1 %v5665_v61  ;;  %v6111_v23 = vld [vmem:[%s7810_s5 + $0x10] sm:$0xff]  }
 0x237   :  { %4172 = vmatprep.subr.bf16.mxu0 %v5672_v1  ;;  %4213 = vmatprep.subr.bf16.mxu1 %v5674_v51  ;;  %v6113_v1 = vld [vmem:[%s7810_s5 + $0x58] sm:$0xff]  }
 0x238   :  { %v6114_v51 = vld [vmem:[%s7810_s5 + $0xd8] sm:$0xff]  }
 0x23a   :  { %4173 = vmatpush1.bf16.msra.mxu0 %v5671_v52  ;;  %4214 = vmatpush1.bf16.msra.mxu1 %v5673_v26  ;;  %v6115_v52 = vld [vmem:[%s7810_s5 + $0x18] sm:$0xff]  }
 0x23b   :  { %5889 = vmatprep.subr.bf16.mxu0 %v6101_v4  ;;  %5911 = vmatprep.subr.bf16.mxu1 %v6102_v7  ;;  %v6116_v26 = vld [vmem:[%s7810_s5 + $0x98] sm:$0xff]  }
 0x23d   :  { %5677 = vmatmul.mubr.msk.bf16.vlgmr.msra.gmra.mrb[108].mxu0 %vm1179_vm2, %v951_v53  ;;  %5678 = vmatmul.mubr.msk.bf16.vlgmr.msra.gmra.mrb[108].mxu1 %vm1179_vm2, %v951_v53 }
 0x23e   :  { %5890 = vmatpush3.bf16.msra.mxu0 %v6103_v32  ;;  %5912 = vmatpush3.bf16.msra.mxu1 %v6104_v9 }
 0x23f   :  { %5891 = vmatprep.subr.bf16.mxu0 %v6105_v35  ;;  %5913 = vmatprep.subr.bf16.mxu1 %v6106_v13 }
 0x240   :  { %v1904_v42 = vpop.f32.mrb[56].mxu0  ;;  %v1945_v43 = vpop.f32.mrb[56].mxu1 }
 0x241   :  { %v2034_v28 = vadd.f32 %v1904_v42, %v7475_v27  ;;  %v2036_v29 = vadd.f32 %v1945_v43, %v7478_v0  ;;  %v1906_v30 = vpop.f32.mrb[57].mxu0  ;;  %v1947_v31 = vpop.f32.mrb[57].mxu1  ;;  %v6117_v42 = vld [vmem:[%s7810_s5 + $0x60] sm:$0xff]  }
 0x242   :  { %v2035_v36 = vadd.f32 %v1906_v30, %v7481_v33  ;;  %v2037_v37 = vadd.f32 %v1947_v31, %v7484_v34  ;;  %v1908_v3 = vpop.f32.mrb[58].mxu0  ;;  %v1949_v5 = vpop.f32.mrb[58].mxu1  ;;  %5892 = vmatpush3.bf16.msra.mxu0 %v6107_v14  ;;  %5914 = vmatpush3.bf16.msra.mxu1 %v6108_v15  ;;  %v6118_v43 = vld [vmem:[%s7810_s5 + $0xe0] sm:$0xff]   ;;  %v6121_v30 = vld [vmem:[%s7810_s5 + $0x68] sm:$0xff]  }
 0x243   :  { %v1909_v6 = vpop.f32.mrb[59].mxu0  ;;  %v1950_v48 = vpop.f32.mrb[59].mxu1  ;;  %5893 = vmatprep.subr.bf16.mxu0 %v6109_v17  ;;  %5915 = vmatprep.subr.bf16.mxu1 %v6110_v11  ;;  %v6122_v31 = vld [vmem:[%s7810_s5 + $0xe8] sm:$0xff]  }
 0x244   :  { %v6125_v6 = vld [vmem:[%s7810_s5 + $0x70] sm:$0xff]  }
 0x246   :  { %5894 = vmatpush3.bf16.msra.mxu0 %v6111_v23 }
 0x247   :  { %5895 = vmatprep.subr.bf16.mxu0 %v6113_v1 }
 0x24a   :  { %5896 = vmatpush3.bf16.msra.mxu0 %v6115_v52 }
 0x24b   :  { %5897 = vmatprep.subr.bf16.mxu0 %v6117_v42 }
 0x250   :  { %v1986_v39 = vpop.f32.mrb[60].mxu0  ;;  %v2027_v10 = vpop.f32.mrb[60].mxu1 }
 0x251   :  { %v2038_v12 = vadd.f32 %v1986_v39, %v1627_v18  ;;  %v2040_v40 = vadd.f32 %v2027_v10, %v1668_v20  ;;  %v1988_v24 = vpop.f32.mrb[61].mxu0  ;;  %v2029_v41 = vpop.f32.mrb[61].mxu1 }
 0x252   :  { %v2039_v44 = vadd.f32 %v1988_v24, %v1629_v2  ;;  %v2041_v27 = vadd.f32 %v2029_v41, %v1670_v57  ;;  %v1990_v45 = vpop.f32.mrb[62].mxu0  ;;  %v2031_v0 = vpop.f32.mrb[62].mxu1  ;;  %v6112_v2 = vld [vmem:[%s7810_s5 + $0x90] sm:$0xff]  }
 0x253   :  { %v1991_v46 = vpop.f32.mrb[63].mxu0  ;;  %v2032_v16 = vpop.f32.mrb[63].mxu1  ;;  %5916 = vmatpush3.bf16.msra.mxu1 %v6112_v2  ;;  %v6127_v24 = vld [vmem:[%s7810_s5 + $0x30] sm:$0xff]  }
 0x254   :  { %5917 = vmatprep.subr.bf16.mxu1 %v6114_v51  ;;  %v6128_v41 = vld [vmem:[%s7810_s5 + $0xb0] sm:$0xff]  }
 0x257   :  { %5918 = vmatpush3.bf16.msra.mxu1 %v6116_v26 }
 0x258   :  { %5919 = vmatprep.subr.bf16.mxu1 %v6118_v43 }
 0x260   :  { %v2274_v47 = vpop.f32.mrb[64].mxu0  ;;  %v2315_v33 = vpop.f32.mrb[64].mxu1 }
 0x261   :  { %v7549_v49 = vadd.f32 %v2274_v47, %v2034_v28  ;;  %v7551_v34 = vadd.f32 %v2315_v33, %v2036_v29  ;;  %v2276_v38 = vpop.f32.mrb[65].mxu0  ;;  %v2317_v19 = vpop.f32.mrb[65].mxu1  ;;  %v6119_v28 = vld [vmem:[%s7810_s5 + $0x20] sm:$0xff]   ;;  %v6129_v47 = vld [vmem:[%s7810_s5 + $0x78] sm:$0xff]  }
 0x262   :  { %v7553_v50 = vadd.f32 %v2276_v38, %v2035_v36  ;;  %v7555_v53 = vadd.f32 %v2317_v19, %v2037_v37  ;;  %v2278_v54 = vpop.f32.mrb[66].mxu0  ;;  %v2319_v55 = vpop.f32.mrb[66].mxu1  ;;  %v6120_v29 = vld [vmem:[%s7810_s5 + $0xa0] sm:$0xff]   ;;  %5898 = vmatpush3.bf16.msra.mxu0 %v6119_v28  ;;  %v6123_v36 = vld [vmem:[%s7810_s5 + $0x28] sm:$0xff]   ;;  %v6130_v33 = vld [vmem:[%s7810_s5 + $0xf8] sm:$0xff]  }
 0x263   :  { %v2279_v56 = vpop.f32.mrb[67].mxu0  ;;  %v2320_v60 = vpop.f32.mrb[67].mxu1  ;;  %5920 = vmatpush3.bf16.msra.mxu1 %v6120_v29  ;;  %5899 = vmatprep.subr.bf16.mxu0 %v6121_v30  ;;  %v6124_v37 = vld [vmem:[%s7810_s5 + $0xa8] sm:$0xff]   ;;  %v6133_v38 = vld [vmem:[%s7810_s5 + $0x140] sm:$0xff]  }
 0x264   :  { %5921 = vmatprep.subr.bf16.mxu1 %v6122_v31  ;;  %v6134_v19 = vld [vmem:[%s7810_s5 + $0x1c0] sm:$0xff]  }
 0x266   :  { %5900 = vmatpush3.bf16.msra.mxu0 %v6123_v36 }
 0x267   :  { %5922 = vmatpush3.bf16.msra.mxu1 %v6124_v37  ;;  %5901 = vmatprep.subr.bf16.mxu0 %v6125_v6 }
 0x26a   :  { %5902 = vmatpush3.bf16.msra.mxu0 %v6127_v24 }
 0x26b   :  { %5903 = vmatprep.subr.bf16.mxu0 %v6129_v47 }
 0x270   :  { %v2356_v25 = vpop.f32.mrb[68].mxu0  ;;  %v2397_v8 = vpop.f32.mrb[68].mxu1 }
 0x271   :  { %v7587_v18 = vadd.f32 %v2356_v25, %v2038_v12  ;;  %v7589_v20 = vadd.f32 %v2397_v8, %v2040_v40  ;;  %v2358_v21 = vpop.f32.mrb[69].mxu0  ;;  %v2399_v22 = vpop.f32.mrb[69].mxu1  ;;  %v6126_v40 = vld [vmem:[%s7810_s5 + $0xf0] sm:$0xff]  }
 0x272   :  { %v7597_v57 = vadd.f32 %v2358_v21, %v2039_v44  ;;  %v7599_v58 = vadd.f32 %v2399_v22, %v2041_v27  ;;  %v2360_v59 = vpop.f32.mrb[70].mxu0  ;;  %v2401_v61 = vpop.f32.mrb[70].mxu1  ;;  %5923 = vmatprep.subr.bf16.mxu1 %v6126_v40 }
 0x273   :  { %v2361_v62 = vpop.f32.mrb[71].mxu0  ;;  %v2402_v63 = vpop.f32.mrb[71].mxu1  ;;  %5924 = vmatpush3.bf16.msra.mxu1 %v6128_v41 }
 0x274   :  { %5925 = vmatprep.subr.bf16.mxu1 %v6130_v33 }
 0x280   :  { %v2642_v3 = vpop.f32.mrb[72].mxu0  ;;  %v2683_v5 = vpop.f32.mrb[72].mxu1 }
 0x281   :  { %v2772_v48 = vadd.f32 %v2642_v3, %v7549_v49  ;;  %v2774_v39 = vadd.f32 %v2683_v5, %v7551_v34  ;;  %v2644_v10 = vpop.f32.mrb[73].mxu0  ;;  %v2685_v12 = vpop.f32.mrb[73].mxu1  ;;  %v6131_v49 = vld [vmem:[%s7810_s5 + $0x38] sm:$0xff]  }
 0x282   :  { %v2773_v44 = vadd.f32 %v2644_v10, %v7553_v50  ;;  %v2775_v27 = vadd.f32 %v2685_v12, %v7555_v53  ;;  %v2646_v45 = vpop.f32.mrb[74].mxu0  ;;  %v2687_v0 = vpop.f32.mrb[74].mxu1  ;;  %v6132_v34 = vld [vmem:[%s7810_s5 + $0xb8] sm:$0xff]   ;;  %5904 = vmatpush3.bf16.msra.mxu0 %v6131_v49 }
 0x283   :  { %v2647_v46 = vpop.f32.mrb[75].mxu0  ;;  %v2688_v16 = vpop.f32.mrb[75].mxu1  ;;  %5926 = vmatpush3.bf16.msra.mxu1 %v6132_v34  ;;  %5933 = vmatprep.subr.bf16.mxu0 %v6133_v38 }
 0x284   :  { %5955 = vmatprep.subr.bf16.mxu1 %v6134_v19 }
 0x290   :  { %v2724_v50 = vpop.f32.mrb[76].mxu0  ;;  %v2765_v53 = vpop.f32.mrb[76].mxu1 }
 0x291   :  { %v2776_v54 = vadd.f32 %v2724_v50, %v7587_v18  ;;  %v2778_v55 = vadd.f32 %v2765_v53, %v7589_v20  ;;  %v2726_v56 = vpop.f32.mrb[77].mxu0  ;;  %v2767_v60 = vpop.f32.mrb[77].mxu1 }
 0x292   :  { %v2777_v4 = vadd.f32 %v2726_v56, %v7597_v57  ;;  %v2779_v7 = vadd.f32 %v2767_v60, %v7599_v58  ;;  %v2728_v32 = vpop.f32.mrb[78].mxu0  ;;  %v2769_v9 = vpop.f32.mrb[78].mxu1 }
 0x293   :  { %v2729_v35 = vpop.f32.mrb[79].mxu0  ;;  %v2770_v13 = vpop.f32.mrb[79].mxu1 }
 0x2a0   :  { %v3012_v14 = vpop.f32.mrb[80].mxu0  ;;  %v3053_v15 = vpop.f32.mrb[80].mxu1 }
 0x2a1   :  { %v3142_v25 = vadd.f32 %v3012_v14, %v2772_v48  ;;  %v3144_v8 = vadd.f32 %v3053_v15, %v2774_v39  ;;  %v3014_v17 = vpop.f32.mrb[81].mxu0  ;;  %v3055_v11 = vpop.f32.mrb[81].mxu1 }
 0x2a2   :  { %v3143_v21 = vadd.f32 %v3014_v17, %v2773_v44  ;;  %v3145_v18 = vadd.f32 %v3055_v11, %v2775_v27  ;;  %v3016_v22 = vpop.f32.mrb[82].mxu0  ;;  %v3057_v20 = vpop.f32.mrb[82].mxu1 }
 0x2a3   :  { %v3017_v23 = vpop.f32.mrb[83].mxu0  ;;  %v3058_v2 = vpop.f32.mrb[83].mxu1  ;;  %v4258_v22 = vlaneseq }
 0x2a5   :  { %v7683_v20 = vshrl.u32 %v4258_v22, 7 }
 0x2a7   :  { %v4260_v23 = vsub.s32 0, %v7683_v20  ;;  %v4268_v2 = vsub.s32 2, %v7683_v20 }
 0x2b0   :  { %v3094_v59 = vpop.f32.mrb[84].mxu0  ;;  %v3135_v57 = vpop.f32.mrb[84].mxu1 }
 0x2b1   :  { %v3146_v61 = vadd.f32 %v3094_v59, %v2776_v54  ;;  %v3148_v58 = vadd.f32 %v3135_v57, %v2778_v55  ;;  %v3096_v62 = vpop.f32.mrb[85].mxu0  ;;  %v3137_v63 = vpop.f32.mrb[85].mxu1  ;;  %v7690_v59 = vld [vmem:[%s7811_s4] sm:$0xff]  ;;  %v4264_v57 = vsub.s32 1, %v7683_v20 }
 0x2b2   :  { %v3147_v1 = vadd.f32 %v3096_v62, %v2777_v4  ;;  %v3149_v51 = vadd.f32 %v3137_v63, %v2779_v7  ;;  %v3098_v52 = vpop.f32.mrb[86].mxu0  ;;  %v3139_v26 = vpop.f32.mrb[86].mxu1  ;;  %v4269_v62 = vrot.slane %v7690_v59, %v4268_v2 }
 0x2b3   :  { %v3099_v42 = vpop.f32.mrb[87].mxu0  ;;  %v3140_v43 = vpop.f32.mrb[87].mxu1 }
 0x2c0   :  { %v3380_v28 = vpop.f32.mrb[88].mxu0  ;;  %v3421_v29 = vpop.f32.mrb[88].mxu1 }
 0x2c1   :  { %v3510_v30 = vadd.f32 %v3380_v28, %v3142_v25  ;;  %v3512_v31 = vadd.f32 %v3421_v29, %v3144_v8  ;;  %v3382_v36 = vpop.f32.mrb[89].mxu0  ;;  %v3423_v37 = vpop.f32.mrb[89].mxu1 }
 0x2c2   :  { %v3511_v3 = vadd.f32 %v3382_v36, %v3143_v21  ;;  %v3513_v5 = vadd.f32 %v3423_v37, %v3145_v18  ;;  %v3384_v6 = vpop.f32.mrb[90].mxu0  ;;  %v3425_v48 = vpop.f32.mrb[90].mxu1 }
 0x2c3   :  { %v3385_v39 = vpop.f32.mrb[91].mxu0  ;;  %v3426_v10 = vpop.f32.mrb[91].mxu1 }
 0x2d0   :  { %v3462_v12 = vpop.f32.mrb[92].mxu0  ;;  %v3503_v40 = vpop.f32.mrb[92].mxu1 }
 0x2d1   :  { %v3514_v24 = vadd.f32 %v3462_v12, %v3146_v61  ;;  %v3516_v41 = vadd.f32 %v3503_v40, %v3148_v58  ;;  %v3464_v44 = vpop.f32.mrb[93].mxu0  ;;  %v3505_v27 = vpop.f32.mrb[93].mxu1  ;;  %v4272_v61 = vsub.s32 3, %v7683_v20  ;;  %v4261_v58 = vrot.slane %v7690_v59, %v4260_v23 }
 0x2d2   :  { %v3515_v45 = vadd.f32 %v3464_v44, %v3147_v1  ;;  %v3517_v0 = vadd.f32 %v3505_v27, %v3149_v51  ;;  %v3466_v46 = vpop.f32.mrb[94].mxu0  ;;  %v3507_v16 = vpop.f32.mrb[94].mxu1  ;;  %v4265_v51 = vrot.slane %v7690_v59, %v4264_v57  ;;  %v6135_v27 = vld [vmem:[%s7810_s5 + $0x100] sm:$0xff]   ;;  %v6147_v57 = vld [vmem:[%s7810_s5 + $0x118] sm:$0xff]  }
 0x2d3   :  { %v3467_v47 = vpop.f32.mrb[95].mxu0  ;;  %v3508_v33 = vpop.f32.mrb[95].mxu1  ;;  %v4273_v52 = vrot.slane %v7690_v59, %v4272_v61  ;;  %v6137_v16 = vld [vmem:[%s7810_s5 + $0x148] sm:$0xff]   ;;  %v6148_v61 = vld [vmem:[%s7810_s5 + $0x198] sm:$0xff]  }
 0x2d4   :  { %v6138_v47 = vld [vmem:[%s7810_s5 + $0x1c8] sm:$0xff]  }
 0x2d5   :  { %v6139_v33 = vld [vmem:[%s7810_s5 + $0x108] sm:$0xff]  }
 0x2e0   :  { %v3750_v49 = vpop.f32.mrb[96].mxu0  ;;  %v3791_v34 = vpop.f32.mrb[96].mxu1 }
 0x2e1   :  { %v3880_v38 = vadd.f32 %v3750_v49, %v3510_v30  ;;  %v3882_v19 = vadd.f32 %v3791_v34, %v3512_v31  ;;  %v3752_v50 = vpop.f32.mrb[97].mxu0  ;;  %v3793_v53 = vpop.f32.mrb[97].mxu1  ;;  %v6140_v49 = vld [vmem:[%s7810_s5 + $0x188] sm:$0xff]   ;;  %v4280_v34 = vsub.s32 5, %v7683_v20 }
 0x2e2   :  { %v3881_v54 = vadd.f32 %v3752_v50, %v3511_v3  ;;  %v3883_v55 = vadd.f32 %v3793_v53, %v3513_v5  ;;  %v3754_v56 = vpop.f32.mrb[98].mxu0  ;;  %v3795_v60 = vpop.f32.mrb[98].mxu1  ;;  %v6142_v50 = vld [vmem:[%s7810_s5 + $0x1d0] sm:$0xff]  }
 0x2e3   :  { %v3755_v4 = vpop.f32.mrb[99].mxu0  ;;  %v3796_v7 = vpop.f32.mrb[99].mxu1  ;;  %v6143_v60 = vld [vmem:[%s7810_s5 + $0x110] sm:$0xff]  }
 0x2e4   :  { %v6144_v4 = vld [vmem:[%s7810_s5 + $0x190] sm:$0xff]  }
 0x2f0   :  { %v3832_v32 = vpop.f32.mrb[100].mxu0  ;;  %v3873_v9 = vpop.f32.mrb[100].mxu1 }
 0x2f1   :  { %v7675_v35 = vadd.f32 %v3832_v32, %v3514_v24  ;;  %v7677_v13 = vadd.f32 %v3873_v9, %v3516_v41  ;;  %v3834_v14 = vpop.f32.mrb[101].mxu0  ;;  %v3875_v15 = vpop.f32.mrb[101].mxu1 }
 0x2f2   :  { %v7679_v25 = vadd.f32 %v3834_v14, %v3515_v45  ;;  %v7681_v8 = vadd.f32 %v3875_v15, %v3517_v0  ;;  %v3836_v17 = vpop.f32.mrb[102].mxu0  ;;  %v3877_v11 = vpop.f32.mrb[102].mxu1  ;;  %v6136_v45 = vld [vmem:[%s7810_s5 + $0x180] sm:$0xff]   ;;  %v6145_v15 = vld [vmem:[%s7810_s5 + $0x158] sm:$0xff]  }
 0x2f3   :  { %v3837_v21 = vpop.f32.mrb[103].mxu0  ;;  %v3878_v18 = vpop.f32.mrb[103].mxu1  ;;  %v6146_v17 = vld [vmem:[%s7810_s5 + $0x1d8] sm:$0xff]  }
 0x300   :  { %v4118_v63 = vpop.f32.mrb[104].mxu0  ;;  %v4159_v1 = vpop.f32.mrb[104].mxu1 }
 0x301   :  { %v4248_v26 = vadd.f32 %v4118_v63, %v3880_v38  ;;  %v4250_v42 = vadd.f32 %v4159_v1, %v3882_v19  ;;  %v4120_v43 = vpop.f32.mrb[105].mxu0  ;;  %v4161_v28 = vpop.f32.mrb[105].mxu1  ;;  %v4288_v38 = vsub.s32 7, %v7683_v20  ;;  %v6141_v19 = vld [vmem:[%s7810_s5 + $0x150] sm:$0xff]  }
 0x302   :  { %v4249_v29 = vadd.f32 %v4120_v43, %v3881_v54  ;;  %v4251_v30 = vadd.f32 %v4161_v28, %v3883_v55  ;;  %v4122_v31 = vpop.f32.mrb[106].mxu0  ;;  %v4163_v36 = vpop.f32.mrb[106].mxu1  ;;  %v4281_v55 = vrot.slane %v7690_v59, %v4280_v34  ;;  %v6153_v43 = vld [vmem:[%s7810_s5 + $0x168] sm:$0xff]  }
 0x303   :  { %v4298_v37 = vadd.f32 %v4261_v58, %v4248_v26  ;;  %v4300_v3 = vadd.f32 %v4269_v62, %v4250_v42  ;;  %v4123_v5 = vpop.f32.mrb[107].mxu0  ;;  %v4164_v6 = vpop.f32.mrb[107].mxu1  ;;  %v4289_v56 = vrot.slane %v7690_v59, %v4288_v38  ;;  %v4276_v26 = vsub.s32 4, %v7683_v20  ;;  %v6154_v28 = vld [vmem:[%s7810_s5 + $0x1e8] sm:$0xff]   ;;  %v6157_v36 = vld [vmem:[%s7810_s5 + $0x170] sm:$0xff]  }
 0x304   :  { %v4299_v48 = vadd.f32 %v4265_v51, %v4249_v29  ;;  %v4301_v39 = vadd.f32 %v4273_v52, %v4251_v30  ;;  %v6151_v51 = vld [vmem:[%s7810_s5 + $0x120] sm:$0xff]   ;;  %v4284_v42 = vsub.s32 6, %v7683_v20  ;;  %v6155_v29 = vld [vmem:[%s7810_s5 + $0x128] sm:$0xff]  }
 0x305   :  { %v4306_v10 = vmax.f32 %v4298_v37, 0.0  ;;  %v4308_v12 = vmax.f32 %v4300_v3, 0.0  ;;  %v6152_v52 = vld [vmem:[%s7810_s5 + $0x1a0] sm:$0xff]   ;;  %v6156_v20 = vld [vmem:[%s7810_s5 + $0x1a8] sm:$0xff]   ;;  %v4277_v30 = vrot.slane %v7690_v59, %v4276_v26  ;;  %v6158_v37 = vld [vmem:[%s7810_s5 + $0x1f0] sm:$0xff]  }
 0x306   :  { %v4307_v40 = vmax.f32 %v4299_v48, 0.0  ;;  %v4309_v24 = vmax.f32 %v4301_v39, 0.0  ;;  %v4285_v31 = vrot.slane %v7690_v59, %v4284_v42  ;;  %v6159_v3 = vld [vmem:[%s7810_s5 + $0x130] sm:$0xff]   ;;  %v6161_v48 = vld [vmem:[%s7810_s5 + $0x178] sm:$0xff]  }
 0x307   :  { %v4314_v0 = vpack.c.bf16 %v4306_v10, %v4306_v10  ;;  %v4316_v46 = vpack.c.bf16 %v4308_v12, %v4308_v12  ;;  %v6160_v59 = vld [vmem:[%s7810_s5 + $0x1b0] sm:$0xff]   ;;  %v6162_v39 = vld [vmem:[%s7810_s5 + $0x1f8] sm:$0xff]  }
 0x308   :  { %v4315_v41 = vpack.c.bf16 %v4307_v40, %v4307_v40  ;;  %v4317_v44 = vpack.c.bf16 %v4309_v24, %v4309_v24  ;;  %v6163_v10 = vld [vmem:[%s7810_s5 + $0x138] sm:$0xff]  }
 0x309   :  { %v6164_v12 = vld [vmem:[%s7810_s5 + $0x1b8] sm:$0xff]  }
 0x30a   :  { %4873 = vmatprep.mubr.bf16.mxu0 %v4315_v41  ;;  %4913 = vmatprep.mubr.bf16.mxu1 %v4317_v44 }
 0x30b   :  { %4874 = vmatmul.mubr.bf16.vlgmr.msra.gmra.mrb[112].mxu0 %v4314_v0  ;;  %4914 = vmatmul.mubr.bf16.vlgmr.msra.gmra.mrb[112].mxu1 %v4316_v46  ;;  %v5679_v0 = vld [vmem:[%s7812_s6] ss:$0 sm:$0xff] }
 0x30c   :  { %5934 = vmatpush3.bf16.msra.mxu0 %v6135_v27  ;;  %5956 = vmatpush3.bf16.msra.mxu1 %v6136_v45 }
 0x30d   :  { %5935 = vmatprep.subr.bf16.mxu0 %v6137_v16  ;;  %5957 = vmatprep.subr.bf16.mxu1 %v6138_v47 }
 0x310   :  { %5936 = vmatpush3.bf16.msra.mxu0 %v6139_v33  ;;  %5958 = vmatpush3.bf16.msra.mxu1 %v6140_v49  ;;  %v4200_v53 = vpop.f32.mrb[108].mxu0  ;;  %v4241_v54 = vpop.f32.mrb[108].mxu1 }
 0x311   :  { %v4252_v7 = vadd.f32 %v4200_v53, %v7675_v35  ;;  %v4254_v32 = vadd.f32 %v4241_v54, %v7677_v13  ;;  %v4202_v9 = vpop.f32.mrb[109].mxu0  ;;  %v4243_v14 = vpop.f32.mrb[109].mxu1  ;;  %5937 = vmatprep.subr.bf16.mxu0 %v6141_v19  ;;  %5959 = vmatprep.subr.bf16.mxu1 %v6142_v50 }
 0x312   :  { %v4253_v11 = vadd.f32 %v4202_v9, %v7679_v25  ;;  %v4255_v21 = vadd.f32 %v4243_v14, %v7681_v8  ;;  %v4204_v18 = vpop.f32.mrb[110].mxu0  ;;  %v4245_v35 = vpop.f32.mrb[110].mxu1  ;;  %v6149_v25 = vld [vmem:[%s7810_s5 + $0x160] sm:$0xff]  }
 0x313   :  { %v4205_v22 = vpop.f32.mrb[111].mxu0  ;;  %v4246_v13 = vpop.f32.mrb[111].mxu1  ;;  %v6150_v8 = vld [vmem:[%s7810_s5 + $0x1e0] sm:$0xff]   ;;  %v4302_v5 = vadd.f32 %v4277_v30, %v4252_v7  ;;  %v4304_v6 = vadd.f32 %v4285_v31, %v4254_v32 }
 0x314   :  { %v4303_v23 = vadd.f32 %v4281_v55, %v4253_v11  ;;  %v4305_v2 = vadd.f32 %v4289_v56, %v4255_v21  ;;  %5938 = vmatpush3.bf16.msra.mxu0 %v6143_v60  ;;  %5960 = vmatpush3.bf16.msra.mxu1 %v6144_v4 }
 0x315   :  { %5939 = vmatprep.subr.bf16.mxu0 %v6145_v15  ;;  %5961 = vmatprep.subr.bf16.mxu1 %v6146_v17  ;;  %v4310_v40 = vmax.f32 %v4302_v5, 0.0  ;;  %v4312_v24 = vmax.f32 %v4304_v6, 0.0 }
 0x316   :  { %v4311_v58 = vmax.f32 %v4303_v23, 0.0  ;;  %v4313_v62 = vmax.f32 %v4305_v2, 0.0 }
 0x317   :  { %v4318_v41 = vpack.c.bf16 %v4310_v40, %v4310_v40  ;;  %v4320_v44 = vpack.c.bf16 %v4312_v24, %v4312_v24 }
 0x318   :  { %v4319_v63 = vpack.c.bf16 %v4311_v58, %v4311_v58  ;;  %v4321_v1 = vpack.c.bf16 %v4313_v62, %v4313_v62  ;;  %5940 = vmatpush3.bf16.msra.mxu0 %v6147_v57  ;;  %5962 = vmatpush3.bf16.msra.mxu1 %v6148_v61 }
 0x319   :  { %5941 = vmatprep.subr.bf16.mxu0 %v6149_v25  ;;  %5963 = vmatprep.subr.bf16.mxu1 %v6150_v8 }
 0x31a   :  { %4953 = vmatprep.mubr.bf16.mxu0 %v4319_v63  ;;  %4993 = vmatprep.mubr.bf16.mxu1 %v4321_v1 }
 0x31c   :  { %5942 = vmatpush3.bf16.msra.mxu0 %v6151_v51  ;;  %5964 = vmatpush3.bf16.msra.mxu1 %v6152_v52 }
 0x31d   :  { %5943 = vmatprep.subr.bf16.mxu0 %v6153_v43  ;;  %5965 = vmatprep.subr.bf16.mxu1 %v6154_v28 }
 0x320   :  { %5944 = vmatpush3.bf16.msra.mxu0 %v6155_v29  ;;  %5966 = vmatpush3.bf16.msra.mxu1 %v6156_v20 }
 0x321   :  { %5945 = vmatprep.subr.bf16.mxu0 %v6157_v36  ;;  %5967 = vmatprep.subr.bf16.mxu1 %v6158_v37 }
 0x324   :  { %5946 = vmatpush3.bf16.msra.mxu0 %v6159_v3  ;;  %5968 = vmatpush3.bf16.msra.mxu1 %v6160_v59 }
 0x325   :  { %5947 = vmatprep.subr.bf16.mxu0 %v6161_v48  ;;  %5969 = vmatprep.subr.bf16.mxu1 %v6162_v39 }
 0x328   :  { %5948 = vmatpush3.bf16.msra.mxu0 %v6163_v10  ;;  %5970 = vmatpush3.bf16.msra.mxu1 %v6164_v12 }
 0x32b   :  { %4954 = vmatmul.mubr.bf16.vlgmr.msra.gmra.mrb[116].mxu0 %v4318_v41  ;;  %4994 = vmatmul.mubr.bf16.vlgmr.msra.gmra.mrb[116].mxu1 %v4320_v44 }
 0x3de   :  { %v5905_v27 = vpop.f32.mrb[112].mxu0  ;;  %v5927_v45 = vpop.f32.mrb[112].mxu1 }
 0x3df   :  { %v5906_v46 = vpop.f32.mrb[113].mxu0  ;;  %v5928_v16 = vpop.f32.mrb[113].mxu1 }
 0x3e0   :  { %v5907_v47 = vadd.f32 %v5906_v46, %v5905_v27  ;;  %v5929_v33 = vadd.f32 %v5928_v16, %v5927_v45  ;;  %v5908_v49 = vpop.f32.mrb[114].mxu0  ;;  %v5930_v34 = vpop.f32.mrb[114].mxu1 }
 0x3e1   :  { %v5909_v38 = vpop.f32.mrb[115].mxu0  ;;  %v5931_v19 = vpop.f32.mrb[115].mxu1 }
 0x3e2   :  { %v4876_v50 = vadd.f32 %v5907_v47, %v5679_v0 }
 0x3e4   :  { %v4916_v53 = vadd.f32 %v5929_v33, %v4876_v50 }
 0x3fe   :  { %v5949_v54 = vpop.f32.mrb[116].mxu0  ;;  %v5971_v55 = vpop.f32.mrb[116].mxu1 }
 0x3ff   :  { %v5950_v56 = vpop.f32.mrb[117].mxu0  ;;  %v5972_v60 = vpop.f32.mrb[117].mxu1 }
 0x400   :  { %v5951_v4 = vadd.f32 %v5950_v56, %v5949_v54  ;;  %v5973_v7 = vadd.f32 %v5972_v60, %v5971_v55  ;;  %v5952_v32 = vpop.f32.mrb[118].mxu0  ;;  %v5974_v9 = vpop.f32.mrb[118].mxu1 }
 0x401   :  { %v5953_v14 = vpop.f32.mrb[119].mxu0  ;;  %v5975_v15 = vpop.f32.mrb[119].mxu1 }
 0x402   :  { %v4956_v17 = vadd.f32 %v5951_v4, %v4916_v53 }
 0x404   :  { %v4996_v11 = vadd.f32 %v5973_v7, %v4956_v17 }
 0x406   :  { %v5001_v21 = vmax.f32 %v4996_v11, 0.0 }
 0x408   :  { %5003 = vst.msk [vmem:[%s7813_s7] sm:$0xff] %vm5002_vm3, %v5001_v21 }

</bundles_post_ra>
